<compile_context>
chip_gen: v7x
topology: tpu7x:2x2x1
jax: 0.10.0
libtpu: 0.0.40
codegen_flags: <defaults>
</compile_context>

<pallas_src>
import functools

import jax
import jax.numpy as jnp
from jax.experimental import pallas as pl
from jax.experimental.pallas import tpu as pltpu


# ---------------------------------------------------------------------------
# Fully fused kernel: embedding -> BiLSTM -> hidden2tag -> CRF Viterbi decode
# ---------------------------------------------------------------------------
def ner_bilstm_crf_kernel(tok_ref, emb_ref, wih_ref, whh_ref, bias_ref,
                          wtag_ref, btag_ref, transT_ref, start_ref, end_ref,
                          tags_ref):
    B, T = tags_ref.shape
    V, _ = emb_ref.shape
    G = wih_ref.shape[1]          # 8*H, gate-major layout [i_f i_b|f_f f_b|g_f g_b|o_f o_b]
    H2 = whh_ref.shape[0]         # 2*H, state layout [fwd | bwd]
    H = H2 // 2
    K = wtag_ref.shape[1]
    f32 = jnp.float32

    # ---- Embedding lookup for the whole (T*B) token block: one-hot @ table (MXU)
    tok = tok_ref[...]                                               # (T*B, 1) int32
    onehot = (jax.lax.broadcasted_iota(jnp.int32, (T * B, V), 1) == tok).astype(f32)
    x_emb = jnp.dot(onehot, emb_ref[...], preferred_element_type=f32)   # (T*B, E)

    # ---- Input projection for BOTH directions, all timesteps at once:
    #      (T*B, E) @ (E, 8H=128): lane-dense, hoisted out of the recurrence.
    xproj = (jnp.dot(x_emb, wih_ref[...], preferred_element_type=f32)
             + bias_ref[...])                                        # (T*B, 8H)

    # Static lane masks (hoisted, shared by every unrolled step).
    fwd_lane_g = (jax.lax.broadcasted_iota(jnp.int32, (B, G), 1) % H2) < H
    fwd_lane_h = jax.lax.broadcasted_iota(jnp.int32, (B, H2), 1) < H

    # ---- Fused bidirectional recurrence: step s = fwd @ time s, bwd @ time T-1-s
    h_cat = jnp.zeros((B, H2), f32)       # [h_fwd | h_bwd]
    c_cat = jnp.zeros((B, H2), f32)
    h_steps = []
    for s in range(T):
        xp_f = xproj[s * B:(s + 1) * B, :]               # fwd-direction lanes valid
        xp_b = xproj[(T - 1 - s) * B:(T - s) * B, :]     # bwd-direction lanes valid
        xp = jnp.where(fwd_lane_g, xp_f, xp_b)           # one VPU select, no shuffles
        gates = xp + jnp.dot(h_cat, whh_ref[...], preferred_element_type=f32)
        i_g = jax.nn.sigmoid(gates[:, 0 * H2:1 * H2])
        f_g = jax.nn.sigmoid(gates[:, 1 * H2:2 * H2])
        g_g = jnp.tanh(gates[:, 2 * H2:3 * H2])
        o_g = jax.nn.sigmoid(gates[:, 3 * H2:4 * H2])
        c_cat = f_g * c_cat + i_g * g_g
        h_cat = o_g * jnp.tanh(c_cat)
        h_steps.append(h_cat)             # [h_fwd(s) | h_bwd(T-1-s)]

    # ---- Time-align the two directions, then ONE batched hidden2tag matmul.
    # TODO(synk): dropout is inference-mode identity; training-mode dropout mask not implemented.
    h_time = [jnp.where(fwd_lane_h, h_steps[t], h_steps[T - 1 - t]) for t in range(T)]
    h_all = jnp.concatenate(h_time, axis=0)                          # (T*B, 2H)
    em = (jnp.dot(h_all, wtag_ref[...], preferred_element_type=f32)
          + btag_ref[...])                                           # (T*B, K)

    # ---- CRF Viterbi forward (emission added after max; single max reused).
    transT = transT_ref[...]                                         # transT[j, i] = trans[i -> j]
    prev_iota = jax.lax.broadcasted_iota(jnp.int32, (B, K, K), 2)
    score = start_ref[...] + em[0:B, :]                              # (B, K)
    history = []
    for t in range(1, T):
        arr = score[:, None, :] + transT[None, :, :]                 # (B, K_next, K_prev)
        mx = jnp.max(arr, axis=-1, keepdims=True)                    # (B, K, 1)
        bp = jnp.min(jnp.where(arr >= mx, prev_iota, K), axis=-1)    # first-argmax (B, K)
        score = mx[:, :, 0] + em[t * B:(t + 1) * B, :]
        history.append(bp)
    final = score + end_ref[...]                                     # (B, K)

    # ---- In-kernel backtrack -> decoded tags (B, T), single lane-dense store.
    tag_iota = jax.lax.broadcasted_iota(jnp.int32, (B, K), 1)
    mxf = jnp.max(final, axis=-1, keepdims=True)
    best = jnp.min(jnp.where(final >= mxf, tag_iota, K),
                   axis=-1, keepdims=True)                           # (B, 1) int32
    tags_rev = [best]
    for t in range(T - 2, -1, -1):
        bp_t = history[t]                                            # backpointers into time t+1
        best = jnp.sum(jnp.where(tag_iota == best, bp_t, 0), axis=-1, keepdims=True)
        tags_rev.append(best)
    tags_ref[...] = jnp.concatenate(tags_rev[::-1], axis=-1).astype(jnp.int32)


# ---------------------------------------------------------------------------
# Wrapper
# ---------------------------------------------------------------------------
def ner_lstm_crf_forward(fused, x_tokens):
    """x_tokens: (B, T) int32 tokens. Returns decoded tags (B, T) int32."""
    B, T = x_tokens.shape
    # x.transpose(0, 1): (B, T) -> (T, B), flattened time-major for the kernel.
    tok = jnp.transpose(x_tokens, (1, 0)).reshape(T * B, 1).astype(jnp.int32)
    vmem = pl.BlockSpec(memory_space=pltpu.MemorySpace.VMEM)   # whole array, VMEM-resident
    return pl.pallas_call(
        ner_bilstm_crf_kernel,
        out_shape=jax.ShapeDtypeStruct((B, T), jnp.int32),
        in_specs=[vmem] * 10,
        out_specs=vmem,
    )(tok, fused["emb"], fused["w_ih"], fused["w_hh"], fused["bias"],
      fused["w_tag"], fused["b_tag"], fused["transT"], fused["start"],
      fused["end"])


# ---------------------------------------------------------------------------
# One-time weight repacking (PyTorch layout -> fused lane-dense kernel layout)
# ---------------------------------------------------------------------------
def build_fused_params(params):
    H = params["w_hh_f"].shape[1]

    def gate_cols(w):            # (4H, X) torch rows [i; f; g; o] -> 4x (X, H)
        return [w[g * H:(g + 1) * H].T for g in range(4)]

    wih_f, wih_b = gate_cols(params["w_ih_f"]), gate_cols(params["w_ih_b"])
    # (E, 8H): per gate, forward columns then backward columns.
    w_ih = jnp.concatenate(
        [jnp.concatenate([wih_f[g], wih_b[g]], axis=1) for g in range(4)], axis=1)

    whh_f, whh_b = gate_cols(params["w_hh_f"]), gate_cols(params["w_hh_b"])
    z = jnp.zeros((H, H), jnp.float32)
    # (2H, 8H) block-diagonal: h_fwd rows drive fwd gate cols, h_bwd rows drive bwd gate cols.
    w_hh = jnp.concatenate(
        [jnp.concatenate([jnp.concatenate([whh_f[g], z], axis=0),
                          jnp.concatenate([z, whh_b[g]], axis=0)], axis=1)
         for g in range(4)], axis=1)

    def gate_bias(b):
        return [b[g * H:(g + 1) * H] for g in range(4)]
    bf, bb = gate_bias(params["b_f"]), gate_bias(params["b_b"])
    bias = jnp.concatenate(
        [jnp.concatenate([bf[g], bb[g]]) for g in range(4)]).reshape(1, -1)   # (1, 8H)

    return {
        "emb": params["embedding"],
        "w_ih": w_ih, "w_hh": w_hh, "bias": bias,
        "w_tag": params["w_tag"].T,                     # (2H, K)
        "b_tag": params["b_tag"].reshape(1, -1),        # (1, K)
        "transT": params["transitions"].T,              # transT[j, i] = trans[i, j]
        "start": params["start_trans"].reshape(1, -1),  # (1, K)
        "end": params["end_trans"].reshape(1, -1),      # (1, K)
    }


# ---------------------------------------------------------------------------
# Deterministic parameter construction (PyTorch-equivalent layout)
# ---------------------------------------------------------------------------
def init_params(key, vocab_size, embedding_dim, hidden_dim, target_size):
    H = hidden_dim // 2
    keys = jax.random.split(key, 12)
    u = lambda k, shape, s: jax.random.uniform(k, shape, jnp.float32, -s, s)
    scale = 1.0 / jnp.sqrt(H)
    return {
        "embedding": jax.random.normal(keys[0], (vocab_size, embedding_dim),
                                       jnp.float32) * 0.1,
        # forward-direction LSTM params (PyTorch gate order: i, f, g, o)
        "w_ih_f": u(keys[1], (4 * H, embedding_dim), scale),
        "w_hh_f": u(keys[2], (4 * H, H), scale),
        "b_f": u(keys[3], (4 * H,), scale),
        # backward direction
        "w_ih_b": u(keys[4], (4 * H, embedding_dim), scale),
        "w_hh_b": u(keys[5], (4 * H, H), scale),
        "b_b": u(keys[6], (4 * H,), scale),
        # hidden2tag linear
        "w_tag": u(keys[7], (target_size, hidden_dim), 1.0 / jnp.sqrt(hidden_dim)),
        "b_tag": u(keys[8], (target_size,), 1.0 / jnp.sqrt(hidden_dim)),
        # CRF params (torchcrf init: uniform(-0.1, 0.1))
        "transitions": u(keys[9], (target_size, target_size), 0.1),
        "start_trans": u(keys[10], (target_size,), 0.1),
        "end_trans": u(keys[11], (target_size,), 0.1),
    }


if __name__ == "__main__":
    embedding_dim = 32
    hidden_dim = 32          # -> H=16 per direction; fused gate width 8H = 128 lanes
    vocab_size = 21          # len(word2id) + 1 with 20 words
    target_size = 5          # len(tag2id)
    B, T = 2, 8

    key = jax.random.PRNGKey(0)
    pkey, xkey = jax.random.split(key)
    params = init_params(pkey, vocab_size, embedding_dim, hidden_dim, target_size)
    fused = build_fused_params(params)
    x = jax.random.randint(xkey, (B, T), 0, vocab_size, dtype=jnp.int32)

    fwd = jax.jit(functools.partial(ner_lstm_crf_forward, fused))
    tags = fwd(x)
    jax.block_until_ready(tags)
    assert tags.shape == (B, T) and tags.dtype == jnp.int32
    print("KERNEL_OK")
</pallas_src>

<mosaic_0001>
module attributes {stable_mosaic.version = 11 : i64} {
  func.func @ner_bilstm_crf_kernel(%arg0: memref<16x1xi32, #tpu.memory_space<vmem>>, %arg1: memref<21x32xf32, #tpu.memory_space<vmem>>, %arg2: memref<32x128xf32, #tpu.memory_space<vmem>>, %arg3: memref<32x128xf32, #tpu.memory_space<vmem>>, %arg4: memref<1x128xf32, #tpu.memory_space<vmem>>, %arg5: memref<32x5xf32, #tpu.memory_space<vmem>>, %arg6: memref<1x5xf32, #tpu.memory_space<vmem>>, %arg7: memref<5x5xf32, #tpu.memory_space<vmem>>, %arg8: memref<1x5xf32, #tpu.memory_space<vmem>>, %arg9: memref<1x5xf32, #tpu.memory_space<vmem>>, %arg10: memref<2x8xi32, #tpu.memory_space<vmem>>) attributes {dimension_semantics = [], scalar_prefetch = 0 : i64, scratch_operands = 0 : i64, tpu.core_type = #tpu.core_type<tc>} {
    %c0 = arith.constant 0 : index
    %c0_0 = arith.constant 0 : index
    %0 = vector.load %arg0[%c0, %c0_0] : memref<16x1xi32, #tpu.memory_space<vmem>>, vector<16x1xi32>
    %1 = tpu.iota {dimensions = array<i32: 1>} : vector<16x21xi32>
    %2 = vector.broadcast %0 : vector<16x1xi32> to vector<16x21xi32>
    %3 = arith.cmpi eq, %1, %2 : vector<16x21xi32>
    %4 = arith.extui %3 : vector<16x21xi1> to vector<16x21xi32>
    %5 = arith.sitofp %4 : vector<16x21xi32> to vector<16x21xf32>
    %c0_1 = arith.constant 0 : index
    %c0_2 = arith.constant 0 : index
    %6 = vector.load %arg1[%c0_1, %c0_2] : memref<21x32xf32, #tpu.memory_space<vmem>>, vector<21x32xf32>
    %cst = arith.constant dense<0.000000e+00> : vector<16x32xf32>
    %7 = tpu.matmul %5, %6, %cst {dimension_numbers = #tpu.dot_dimension_numbers<[1], [0], [0], [1], [0, 0, 1, 1], [], []>} : vector<16x21xf32>, vector<21x32xf32>, vector<16x32xf32> -> vector<16x32xf32>
    %c0_3 = arith.constant 0 : index
    %c0_4 = arith.constant 0 : index
    %8 = vector.load %arg2[%c0_3, %c0_4] : memref<32x128xf32, #tpu.memory_space<vmem>>, vector<32x128xf32>
    %cst_5 = arith.constant dense<0.000000e+00> : vector<16x128xf32>
    %9 = tpu.matmul %7, %8, %cst_5 {dimension_numbers = #tpu.dot_dimension_numbers<[1], [0], [0], [1], [0, 0, 1, 1], [], []>} : vector<16x32xf32>, vector<32x128xf32>, vector<16x128xf32> -> vector<16x128xf32>
    %c0_6 = arith.constant 0 : index
    %c0_7 = arith.constant 0 : index
    %10 = vector.load %arg4[%c0_6, %c0_7] : memref<1x128xf32, #tpu.memory_space<vmem>>, vector<1x128xf32>
    %11 = vector.broadcast %10 : vector<1x128xf32> to vector<16x128xf32>
    %12 = arith.addf %9, %11 : vector<16x128xf32>
    %13 = tpu.iota {dimensions = array<i32: 1>} : vector<2x128xi32>
    %c32_i32 = arith.constant 32 : i32
    %c0_i32 = arith.constant 0 : i32
    %14 = arith.cmpi eq, %c32_i32, %c0_i32 : i32
    %c1_i32 = arith.constant 1 : i32
    %15 = arith.select %14, %c1_i32, %c32_i32 : i32
    %16 = vector.broadcast %15 : i32 to vector<2x128xi32>
    %17 = arith.remsi %13, %16 : vector<2x128xi32>
    %c0_i32_8 = arith.constant 0 : i32
    %18 = vector.broadcast %c0_i32_8 : i32 to vector<2x128xi32>
    %19 = arith.cmpi ne, %17, %18 : vector<2x128xi32>
    %c0_i32_9 = arith.constant 0 : i32
    %20 = vector.broadcast %c0_i32_9 : i32 to vector<2x128xi32>
    %21 = arith.cmpi slt, %17, %20 : vector<2x128xi32>
    %c0_i32_10 = arith.constant 0 : i32
    %22 = arith.cmpi slt, %15, %c0_i32_10 : i32
    %23 = vector.broadcast %22 : i1 to vector<2x128xi1>
    %24 = vector.broadcast %23 : vector<2x128xi1> to vector<2x128xi1>
    %25 = arith.xori %21, %24 : vector<2x128xi1>
    %26 = arith.andi %25, %19 : vector<2x128xi1>
    %27 = vector.broadcast %15 : i32 to vector<2x128xi32>
    %28 = arith.addi %17, %27 : vector<2x128xi32>
    %29 = arith.select %26, %28, %17 : vector<2x128xi1>, vector<2x128xi32>
    %c16_i32 = arith.constant 16 : i32
    %30 = vector.broadcast %c16_i32 : i32 to vector<2x128xi32>
    %31 = arith.cmpi slt, %29, %30 : vector<2x128xi32>
    %32 = tpu.iota {dimensions = array<i32: 1>} : vector<2x32xi32>
    %c16_i32_11 = arith.constant 16 : i32
    %33 = vector.broadcast %c16_i32_11 : i32 to vector<2x32xi32>
    %34 = arith.cmpi slt, %32, %33 : vector<2x32xi32>
    %cst_12 = arith.constant 0.000000e+00 : f32
    %35 = vector.broadcast %cst_12 : f32 to vector<2x32xf32>
    %cst_13 = arith.constant 0.000000e+00 : f32
    %36 = vector.broadcast %cst_13 : f32 to vector<2x32xf32>
    %37 = vector.extract_strided_slice %12 {offsets = [0, 0], sizes = [2, 128], strides = [1, 1]} : vector<16x128xf32> to vector<2x128xf32>
    %38 = vector.extract_strided_slice %12 {offsets = [14, 0], sizes = [2, 128], strides = [1, 1]} : vector<16x128xf32> to vector<2x128xf32>
    %39 = arith.select %31, %37, %38 : vector<2x128xi1>, vector<2x128xf32>
    %c0_14 = arith.constant 0 : index
    %c0_15 = arith.constant 0 : index
    %40 = vector.load %arg3[%c0_14, %c0_15] : memref<32x128xf32, #tpu.memory_space<vmem>>, vector<32x128xf32>
    %cst_16 = arith.constant dense<0.000000e+00> : vector<2x128xf32>
    %41 = tpu.matmul %35, %40, %cst_16 {dimension_numbers = #tpu.dot_dimension_numbers<[1], [0], [0], [1], [0, 0, 1, 1], [], []>} : vector<2x32xf32>, vector<32x128xf32>, vector<2x128xf32> -> vector<2x128xf32>
    %42 = arith.addf %39, %41 : vector<2x128xf32>
    %43 = vector.extract_strided_slice %42 {offsets = [0, 0], sizes = [2, 32], strides = [1, 1]} : vector<2x128xf32> to vector<2x32xf32>
    %44 = arith.negf %43 : vector<2x32xf32>
    %45 = math.exp %44 : vector<2x32xf32>
    %cst_17 = arith.constant 1.000000e+00 : f32
    %46 = vector.broadcast %cst_17 : f32 to vector<2x32xf32>
    %47 = arith.addf %46, %45 : vector<2x32xf32>
    %48 = arith.divf %46, %47 : vector<2x32xf32>
    %49 = vector.extract_strided_slice %42 {offsets = [0, 32], sizes = [2, 32], strides = [1, 1]} : vector<2x128xf32> to vector<2x32xf32>
    %50 = arith.negf %49 : vector<2x32xf32>
    %51 = math.exp %50 : vector<2x32xf32>
    %cst_18 = arith.constant 1.000000e+00 : f32
    %52 = vector.broadcast %cst_18 : f32 to vector<2x32xf32>
    %53 = arith.addf %52, %51 : vector<2x32xf32>
    %54 = arith.divf %52, %53 : vector<2x32xf32>
    %55 = vector.extract_strided_slice %42 {offsets = [0, 64], sizes = [2, 32], strides = [1, 1]} : vector<2x128xf32> to vector<2x32xf32>
    %56 = math.tanh %55 : vector<2x32xf32>
    %57 = vector.extract_strided_slice %42 {offsets = [0, 96], sizes = [2, 32], strides = [1, 1]} : vector<2x128xf32> to vector<2x32xf32>
    %58 = arith.negf %57 : vector<2x32xf32>
    %59 = math.exp %58 : vector<2x32xf32>
    %cst_19 = arith.constant 1.000000e+00 : f32
    %60 = vector.broadcast %cst_19 : f32 to vector<2x32xf32>
    %61 = arith.addf %60, %59 : vector<2x32xf32>
    %62 = arith.divf %60, %61 : vector<2x32xf32>
    %63 = arith.mulf %54, %36 : vector<2x32xf32>
    %64 = arith.mulf %48, %56 : vector<2x32xf32>
    %65 = arith.addf %63, %64 : vector<2x32xf32>
    %66 = math.tanh %65 : vector<2x32xf32>
    %67 = arith.mulf %62, %66 : vector<2x32xf32>
    %68 = vector.extract_strided_slice %12 {offsets = [2, 0], sizes = [2, 128], strides = [1, 1]} : vector<16x128xf32> to vector<2x128xf32>
    %69 = vector.extract_strided_slice %12 {offsets = [12, 0], sizes = [2, 128], strides = [1, 1]} : vector<16x128xf32> to vector<2x128xf32>
    %70 = arith.select %31, %68, %69 : vector<2x128xi1>, vector<2x128xf32>
    %c0_20 = arith.constant 0 : index
    %c0_21 = arith.constant 0 : index
    %71 = vector.load %arg3[%c0_20, %c0_21] : memref<32x128xf32, #tpu.memory_space<vmem>>, vector<32x128xf32>
    %cst_22 = arith.constant dense<0.000000e+00> : vector<2x128xf32>
    %72 = tpu.matmul %67, %71, %cst_22 {dimension_numbers = #tpu.dot_dimension_numbers<[1], [0], [0], [1], [0, 0, 1, 1], [], []>} : vector<2x32xf32>, vector<32x128xf32>, vector<2x128xf32> -> vector<2x128xf32>
    %73 = arith.addf %70, %72 : vector<2x128xf32>
    %74 = vector.extract_strided_slice %73 {offsets = [0, 0], sizes = [2, 32], strides = [1, 1]} : vector<2x128xf32> to vector<2x32xf32>
    %75 = arith.negf %74 : vector<2x32xf32>
    %76 = math.exp %75 : vector<2x32xf32>
    %cst_23 = arith.constant 1.000000e+00 : f32
    %77 = vector.broadcast %cst_23 : f32 to vector<2x32xf32>
    %78 = arith.addf %77, %76 : vector<2x32xf32>
    %79 = arith.divf %77, %78 : vector<2x32xf32>
    %80 = vector.extract_strided_slice %73 {offsets = [0, 32], sizes = [2, 32], strides = [1, 1]} : vector<2x128xf32> to vector<2x32xf32>
    %81 = arith.negf %80 : vector<2x32xf32>
    %82 = math.exp %81 : vector<2x32xf32>
    %cst_24 = arith.constant 1.000000e+00 : f32
    %83 = vector.broadcast %cst_24 : f32 to vector<2x32xf32>
    %84 = arith.addf %83, %82 : vector<2x32xf32>
    %85 = arith.divf %83, %84 : vector<2x32xf32>
    %86 = vector.extract_strided_slice %73 {offsets = [0, 64], sizes = [2, 32], strides = [1, 1]} : vector<2x128xf32> to vector<2x32xf32>
    %87 = math.tanh %86 : vector<2x32xf32>
    %88 = vector.extract_strided_slice %73 {offsets = [0, 96], sizes = [2, 32], strides = [1, 1]} : vector<2x128xf32> to vector<2x32xf32>
    %89 = arith.negf %88 : vector<2x32xf32>
    %90 = math.exp %89 : vector<2x32xf32>
    %cst_25 = arith.constant 1.000000e+00 : f32
    %91 = vector.broadcast %cst_25 : f32 to vector<2x32xf32>
    %92 = arith.addf %91, %90 : vector<2x32xf32>
    %93 = arith.divf %91, %92 : vector<2x32xf32>
    %94 = arith.mulf %85, %65 : vector<2x32xf32>
    %95 = arith.mulf %79, %87 : vector<2x32xf32>
    %96 = arith.addf %94, %95 : vector<2x32xf32>
    %97 = math.tanh %96 : vector<2x32xf32>
    %98 = arith.mulf %93, %97 : vector<2x32xf32>
    %99 = vector.extract_strided_slice %12 {offsets = [4, 0], sizes = [2, 128], strides = [1, 1]} : vector<16x128xf32> to vector<2x128xf32>
    %100 = vector.extract_strided_slice %12 {offsets = [10, 0], sizes = [2, 128], strides = [1, 1]} : vector<16x128xf32> to vector<2x128xf32>
    %101 = arith.select %31, %99, %100 : vector<2x128xi1>, vector<2x128xf32>
    %c0_26 = arith.constant 0 : index
    %c0_27 = arith.constant 0 : index
    %102 = vector.load %arg3[%c0_26, %c0_27] : memref<32x128xf32, #tpu.memory_space<vmem>>, vector<32x128xf32>
    %cst_28 = arith.constant dense<0.000000e+00> : vector<2x128xf32>
    %103 = tpu.matmul %98, %102, %cst_28 {dimension_numbers = #tpu.dot_dimension_numbers<[1], [0], [0], [1], [0, 0, 1, 1], [], []>} : vector<2x32xf32>, vector<32x128xf32>, vector<2x128xf32> -> vector<2x128xf32>
    %104 = arith.addf %101, %103 : vector<2x128xf32>
    %105 = vector.extract_strided_slice %104 {offsets = [0, 0], sizes = [2, 32], strides = [1, 1]} : vector<2x128xf32> to vector<2x32xf32>
    %106 = arith.negf %105 : vector<2x32xf32>
    %107 = math.exp %106 : vector<2x32xf32>
    %cst_29 = arith.constant 1.000000e+00 : f32
    %108 = vector.broadcast %cst_29 : f32 to vector<2x32xf32>
    %109 = arith.addf %108, %107 : vector<2x32xf32>
    %110 = arith.divf %108, %109 : vector<2x32xf32>
    %111 = vector.extract_strided_slice %104 {offsets = [0, 32], sizes = [2, 32], strides = [1, 1]} : vector<2x128xf32> to vector<2x32xf32>
    %112 = arith.negf %111 : vector<2x32xf32>
    %113 = math.exp %112 : vector<2x32xf32>
    %cst_30 = arith.constant 1.000000e+00 : f32
    %114 = vector.broadcast %cst_30 : f32 to vector<2x32xf32>
    %115 = arith.addf %114, %113 : vector<2x32xf32>
    %116 = arith.divf %114, %115 : vector<2x32xf32>
    %117 = vector.extract_strided_slice %104 {offsets = [0, 64], sizes = [2, 32], strides = [1, 1]} : vector<2x128xf32> to vector<2x32xf32>
    %118 = math.tanh %117 : vector<2x32xf32>
    %119 = vector.extract_strided_slice %104 {offsets = [0, 96], sizes = [2, 32], strides = [1, 1]} : vector<2x128xf32> to vector<2x32xf32>
    %120 = arith.negf %119 : vector<2x32xf32>
    %121 = math.exp %120 : vector<2x32xf32>
    %cst_31 = arith.constant 1.000000e+00 : f32
    %122 = vector.broadcast %cst_31 : f32 to vector<2x32xf32>
    %123 = arith.addf %122, %121 : vector<2x32xf32>
    %124 = arith.divf %122, %123 : vector<2x32xf32>
    %125 = arith.mulf %116, %96 : vector<2x32xf32>
    %126 = arith.mulf %110, %118 : vector<2x32xf32>
    %127 = arith.addf %125, %126 : vector<2x32xf32>
    %128 = math.tanh %127 : vector<2x32xf32>
    %129 = arith.mulf %124, %128 : vector<2x32xf32>
    %130 = vector.extract_strided_slice %12 {offsets = [6, 0], sizes = [2, 128], strides = [1, 1]} : vector<16x128xf32> to vector<2x128xf32>
    %131 = vector.extract_strided_slice %12 {offsets = [8, 0], sizes = [2, 128], strides = [1, 1]} : vector<16x128xf32> to vector<2x128xf32>
    %132 = arith.select %31, %130, %131 : vector<2x128xi1>, vector<2x128xf32>
    %c0_32 = arith.constant 0 : index
    %c0_33 = arith.constant 0 : index
    %133 = vector.load %arg3[%c0_32, %c0_33] : memref<32x128xf32, #tpu.memory_space<vmem>>, vector<32x128xf32>
    %cst_34 = arith.constant dense<0.000000e+00> : vector<2x128xf32>
    %134 = tpu.matmul %129, %133, %cst_34 {dimension_numbers = #tpu.dot_dimension_numbers<[1], [0], [0], [1], [0, 0, 1, 1], [], []>} : vector<2x32xf32>, vector<32x128xf32>, vector<2x128xf32> -> vector<2x128xf32>
    %135 = arith.addf %132, %134 : vector<2x128xf32>
    %136 = vector.extract_strided_slice %135 {offsets = [0, 0], sizes = [2, 32], strides = [1, 1]} : vector<2x128xf32> to vector<2x32xf32>
    %137 = arith.negf %136 : vector<2x32xf32>
    %138 = math.exp %137 : vector<2x32xf32>
    %cst_35 = arith.constant 1.000000e+00 : f32
    %139 = vector.broadcast %cst_35 : f32 to vector<2x32xf32>
    %140 = arith.addf %139, %138 : vector<2x32xf32>
    %141 = arith.divf %139, %140 : vector<2x32xf32>
    %142 = vector.extract_strided_slice %135 {offsets = [0, 32], sizes = [2, 32], strides = [1, 1]} : vector<2x128xf32> to vector<2x32xf32>
    %143 = arith.negf %142 : vector<2x32xf32>
    %144 = math.exp %143 : vector<2x32xf32>
    %cst_36 = arith.constant 1.000000e+00 : f32
    %145 = vector.broadcast %cst_36 : f32 to vector<2x32xf32>
    %146 = arith.addf %145, %144 : vector<2x32xf32>
    %147 = arith.divf %145, %146 : vector<2x32xf32>
    %148 = vector.extract_strided_slice %135 {offsets = [0, 64], sizes = [2, 32], strides = [1, 1]} : vector<2x128xf32> to vector<2x32xf32>
    %149 = math.tanh %148 : vector<2x32xf32>
    %150 = vector.extract_strided_slice %135 {offsets = [0, 96], sizes = [2, 32], strides = [1, 1]} : vector<2x128xf32> to vector<2x32xf32>
    %151 = arith.negf %150 : vector<2x32xf32>
    %152 = math.exp %151 : vector<2x32xf32>
    %cst_37 = arith.constant 1.000000e+00 : f32
    %153 = vector.broadcast %cst_37 : f32 to vector<2x32xf32>
    %154 = arith.addf %153, %152 : vector<2x32xf32>
    %155 = arith.divf %153, %154 : vector<2x32xf32>
    %156 = arith.mulf %147, %127 : vector<2x32xf32>
    %157 = arith.mulf %141, %149 : vector<2x32xf32>
    %158 = arith.addf %156, %157 : vector<2x32xf32>
    %159 = math.tanh %158 : vector<2x32xf32>
    %160 = arith.mulf %155, %159 : vector<2x32xf32>
    %161 = vector.extract_strided_slice %12 {offsets = [8, 0], sizes = [2, 128], strides = [1, 1]} : vector<16x128xf32> to vector<2x128xf32>
    %162 = vector.extract_strided_slice %12 {offsets = [6, 0], sizes = [2, 128], strides = [1, 1]} : vector<16x128xf32> to vector<2x128xf32>
    %163 = arith.select %31, %161, %162 : vector<2x128xi1>, vector<2x128xf32>
    %c0_38 = arith.constant 0 : index
    %c0_39 = arith.constant 0 : index
    %164 = vector.load %arg3[%c0_38, %c0_39] : memref<32x128xf32, #tpu.memory_space<vmem>>, vector<32x128xf32>
    %cst_40 = arith.constant dense<0.000000e+00> : vector<2x128xf32>
    %165 = tpu.matmul %160, %164, %cst_40 {dimension_numbers = #tpu.dot_dimension_numbers<[1], [0], [0], [1], [0, 0, 1, 1], [], []>} : vector<2x32xf32>, vector<32x128xf32>, vector<2x128xf32> -> vector<2x128xf32>
    %166 = arith.addf %163, %165 : vector<2x128xf32>
    %167 = vector.extract_strided_slice %166 {offsets = [0, 0], sizes = [2, 32], strides = [1, 1]} : vector<2x128xf32> to vector<2x32xf32>
    %168 = arith.negf %167 : vector<2x32xf32>
    %169 = math.exp %168 : vector<2x32xf32>
    %cst_41 = arith.constant 1.000000e+00 : f32
    %170 = vector.broadcast %cst_41 : f32 to vector<2x32xf32>
    %171 = arith.addf %170, %169 : vector<2x32xf32>
    %172 = arith.divf %170, %171 : vector<2x32xf32>
    %173 = vector.extract_strided_slice %166 {offsets = [0, 32], sizes = [2, 32], strides = [1, 1]} : vector<2x128xf32> to vector<2x32xf32>
    %174 = arith.negf %173 : vector<2x32xf32>
    %175 = math.exp %174 : vector<2x32xf32>
    %cst_42 = arith.constant 1.000000e+00 : f32
    %176 = vector.broadcast %cst_42 : f32 to vector<2x32xf32>
    %177 = arith.addf %176, %175 : vector<2x32xf32>
    %178 = arith.divf %176, %177 : vector<2x32xf32>
    %179 = vector.extract_strided_slice %166 {offsets = [0, 64], sizes = [2, 32], strides = [1, 1]} : vector<2x128xf32> to vector<2x32xf32>
    %180 = math.tanh %179 : vector<2x32xf32>
    %181 = vector.extract_strided_slice %166 {offsets = [0, 96], sizes = [2, 32], strides = [1, 1]} : vector<2x128xf32> to vector<2x32xf32>
    %182 = arith.negf %181 : vector<2x32xf32>
    %183 = math.exp %182 : vector<2x32xf32>
    %cst_43 = arith.constant 1.000000e+00 : f32
    %184 = vector.broadcast %cst_43 : f32 to vector<2x32xf32>
    %185 = arith.addf %184, %183 : vector<2x32xf32>
    %186 = arith.divf %184, %185 : vector<2x32xf32>
    %187 = arith.mulf %178, %158 : vector<2x32xf32>
    %188 = arith.mulf %172, %180 : vector<2x32xf32>
    %189 = arith.addf %187, %188 : vector<2x32xf32>
    %190 = math.tanh %189 : vector<2x32xf32>
    %191 = arith.mulf %186, %190 : vector<2x32xf32>
    %192 = vector.extract_strided_slice %12 {offsets = [10, 0], sizes = [2, 128], strides = [1, 1]} : vector<16x128xf32> to vector<2x128xf32>
    %193 = vector.extract_strided_slice %12 {offsets = [4, 0], sizes = [2, 128], strides = [1, 1]} : vector<16x128xf32> to vector<2x128xf32>
    %194 = arith.select %31, %192, %193 : vector<2x128xi1>, vector<2x128xf32>
    %c0_44 = arith.constant 0 : index
    %c0_45 = arith.constant 0 : index
    %195 = vector.load %arg3[%c0_44, %c0_45] : memref<32x128xf32, #tpu.memory_space<vmem>>, vector<32x128xf32>
    %cst_46 = arith.constant dense<0.000000e+00> : vector<2x128xf32>
    %196 = tpu.matmul %191, %195, %cst_46 {dimension_numbers = #tpu.dot_dimension_numbers<[1], [0], [0], [1], [0, 0, 1, 1], [], []>} : vector<2x32xf32>, vector<32x128xf32>, vector<2x128xf32> -> vector<2x128xf32>
    %197 = arith.addf %194, %196 : vector<2x128xf32>
    %198 = vector.extract_strided_slice %197 {offsets = [0, 0], sizes = [2, 32], strides = [1, 1]} : vector<2x128xf32> to vector<2x32xf32>
    %199 = arith.negf %198 : vector<2x32xf32>
    %200 = math.exp %199 : vector<2x32xf32>
    %cst_47 = arith.constant 1.000000e+00 : f32
    %201 = vector.broadcast %cst_47 : f32 to vector<2x32xf32>
    %202 = arith.addf %201, %200 : vector<2x32xf32>
    %203 = arith.divf %201, %202 : vector<2x32xf32>
    %204 = vector.extract_strided_slice %197 {offsets = [0, 32], sizes = [2, 32], strides = [1, 1]} : vector<2x128xf32> to vector<2x32xf32>
    %205 = arith.negf %204 : vector<2x32xf32>
    %206 = math.exp %205 : vector<2x32xf32>
    %cst_48 = arith.constant 1.000000e+00 : f32
    %207 = vector.broadcast %cst_48 : f32 to vector<2x32xf32>
    %208 = arith.addf %207, %206 : vector<2x32xf32>
    %209 = arith.divf %207, %208 : vector<2x32xf32>
    %210 = vector.extract_strided_slice %197 {offsets = [0, 64], sizes = [2, 32], strides = [1, 1]} : vector<2x128xf32> to vector<2x32xf32>
    %211 = math.tanh %210 : vector<2x32xf32>
    %212 = vector.extract_strided_slice %197 {offsets = [0, 96], sizes = [2, 32], strides = [1, 1]} : vector<2x128xf32> to vector<2x32xf32>
    %213 = arith.negf %212 : vector<2x32xf32>
    %214 = math.exp %213 : vector<2x32xf32>
    %cst_49 = arith.constant 1.000000e+00 : f32
    %215 = vector.broadcast %cst_49 : f32 to vector<2x32xf32>
    %216 = arith.addf %215, %214 : vector<2x32xf32>
    %217 = arith.divf %215, %216 : vector<2x32xf32>
    %218 = arith.mulf %209, %189 : vector<2x32xf32>
    %219 = arith.mulf %203, %211 : vector<2x32xf32>
    %220 = arith.addf %218, %219 : vector<2x32xf32>
    %221 = math.tanh %220 : vector<2x32xf32>
    %222 = arith.mulf %217, %221 : vector<2x32xf32>
    %223 = vector.extract_strided_slice %12 {offsets = [12, 0], sizes = [2, 128], strides = [1, 1]} : vector<16x128xf32> to vector<2x128xf32>
    %224 = vector.extract_strided_slice %12 {offsets = [2, 0], sizes = [2, 128], strides = [1, 1]} : vector<16x128xf32> to vector<2x128xf32>
    %225 = arith.select %31, %223, %224 : vector<2x128xi1>, vector<2x128xf32>
    %c0_50 = arith.constant 0 : index
    %c0_51 = arith.constant 0 : index
    %226 = vector.load %arg3[%c0_50, %c0_51] : memref<32x128xf32, #tpu.memory_space<vmem>>, vector<32x128xf32>
    %cst_52 = arith.constant dense<0.000000e+00> : vector<2x128xf32>
    %227 = tpu.matmul %222, %226, %cst_52 {dimension_numbers = #tpu.dot_dimension_numbers<[1], [0], [0], [1], [0, 0, 1, 1], [], []>} : vector<2x32xf32>, vector<32x128xf32>, vector<2x128xf32> -> vector<2x128xf32>
    %228 = arith.addf %225, %227 : vector<2x128xf32>
    %229 = vector.extract_strided_slice %228 {offsets = [0, 0], sizes = [2, 32], strides = [1, 1]} : vector<2x128xf32> to vector<2x32xf32>
    %230 = arith.negf %229 : vector<2x32xf32>
    %231 = math.exp %230 : vector<2x32xf32>
    %cst_53 = arith.constant 1.000000e+00 : f32
    %232 = vector.broadcast %cst_53 : f32 to vector<2x32xf32>
    %233 = arith.addf %232, %231 : vector<2x32xf32>
    %234 = arith.divf %232, %233 : vector<2x32xf32>
    %235 = vector.extract_strided_slice %228 {offsets = [0, 32], sizes = [2, 32], strides = [1, 1]} : vector<2x128xf32> to vector<2x32xf32>
    %236 = arith.negf %235 : vector<2x32xf32>
    %237 = math.exp %236 : vector<2x32xf32>
    %cst_54 = arith.constant 1.000000e+00 : f32
    %238 = vector.broadcast %cst_54 : f32 to vector<2x32xf32>
    %239 = arith.addf %238, %237 : vector<2x32xf32>
    %240 = arith.divf %238, %239 : vector<2x32xf32>
    %241 = vector.extract_strided_slice %228 {offsets = [0, 64], sizes = [2, 32], strides = [1, 1]} : vector<2x128xf32> to vector<2x32xf32>
    %242 = math.tanh %241 : vector<2x32xf32>
    %243 = vector.extract_strided_slice %228 {offsets = [0, 96], sizes = [2, 32], strides = [1, 1]} : vector<2x128xf32> to vector<2x32xf32>
    %244 = arith.negf %243 : vector<2x32xf32>
    %245 = math.exp %244 : vector<2x32xf32>
    %cst_55 = arith.constant 1.000000e+00 : f32
    %246 = vector.broadcast %cst_55 : f32 to vector<2x32xf32>
    %247 = arith.addf %246, %245 : vector<2x32xf32>
    %248 = arith.divf %246, %247 : vector<2x32xf32>
    %249 = arith.mulf %240, %220 : vector<2x32xf32>
    %250 = arith.mulf %234, %242 : vector<2x32xf32>
    %251 = arith.addf %249, %250 : vector<2x32xf32>
    %252 = math.tanh %251 : vector<2x32xf32>
    %253 = arith.mulf %248, %252 : vector<2x32xf32>
    %254 = vector.extract_strided_slice %12 {offsets = [14, 0], sizes = [2, 128], strides = [1, 1]} : vector<16x128xf32> to vector<2x128xf32>
    %255 = vector.extract_strided_slice %12 {offsets = [0, 0], sizes = [2, 128], strides = [1, 1]} : vector<16x128xf32> to vector<2x128xf32>
    %256 = arith.select %31, %254, %255 : vector<2x128xi1>, vector<2x128xf32>
    %c0_56 = arith.constant 0 : index
    %c0_57 = arith.constant 0 : index
    %257 = vector.load %arg3[%c0_56, %c0_57] : memref<32x128xf32, #tpu.memory_space<vmem>>, vector<32x128xf32>
    %cst_58 = arith.constant dense<0.000000e+00> : vector<2x128xf32>
    %258 = tpu.matmul %253, %257, %cst_58 {dimension_numbers = #tpu.dot_dimension_numbers<[1], [0], [0], [1], [0, 0, 1, 1], [], []>} : vector<2x32xf32>, vector<32x128xf32>, vector<2x128xf32> -> vector<2x128xf32>
    %259 = arith.addf %256, %258 : vector<2x128xf32>
    %260 = vector.extract_strided_slice %259 {offsets = [0, 0], sizes = [2, 32], strides = [1, 1]} : vector<2x128xf32> to vector<2x32xf32>
    %261 = arith.negf %260 : vector<2x32xf32>
    %262 = math.exp %261 : vector<2x32xf32>
    %cst_59 = arith.constant 1.000000e+00 : f32
    %263 = vector.broadcast %cst_59 : f32 to vector<2x32xf32>
    %264 = arith.addf %263, %262 : vector<2x32xf32>
    %265 = arith.divf %263, %264 : vector<2x32xf32>
    %266 = vector.extract_strided_slice %259 {offsets = [0, 32], sizes = [2, 32], strides = [1, 1]} : vector<2x128xf32> to vector<2x32xf32>
    %267 = arith.negf %266 : vector<2x32xf32>
    %268 = math.exp %267 : vector<2x32xf32>
    %cst_60 = arith.constant 1.000000e+00 : f32
    %269 = vector.broadcast %cst_60 : f32 to vector<2x32xf32>
    %270 = arith.addf %269, %268 : vector<2x32xf32>
    %271 = arith.divf %269, %270 : vector<2x32xf32>
    %272 = vector.extract_strided_slice %259 {offsets = [0, 64], sizes = [2, 32], strides = [1, 1]} : vector<2x128xf32> to vector<2x32xf32>
    %273 = math.tanh %272 : vector<2x32xf32>
    %274 = vector.extract_strided_slice %259 {offsets = [0, 96], sizes = [2, 32], strides = [1, 1]} : vector<2x128xf32> to vector<2x32xf32>
    %275 = arith.negf %274 : vector<2x32xf32>
    %276 = math.exp %275 : vector<2x32xf32>
    %cst_61 = arith.constant 1.000000e+00 : f32
    %277 = vector.broadcast %cst_61 : f32 to vector<2x32xf32>
    %278 = arith.addf %277, %276 : vector<2x32xf32>
    %279 = arith.divf %277, %278 : vector<2x32xf32>
    %280 = arith.mulf %271, %251 : vector<2x32xf32>
    %281 = arith.mulf %265, %273 : vector<2x32xf32>
    %282 = arith.addf %280, %281 : vector<2x32xf32>
    %283 = math.tanh %282 : vector<2x32xf32>
    %284 = arith.mulf %279, %283 : vector<2x32xf32>
    %285 = arith.select %34, %67, %284 : vector<2x32xi1>, vector<2x32xf32>
    %286 = arith.select %34, %98, %253 : vector<2x32xi1>, vector<2x32xf32>
    %287 = arith.select %34, %129, %222 : vector<2x32xi1>, vector<2x32xf32>
    %288 = arith.select %34, %160, %191 : vector<2x32xi1>, vector<2x32xf32>
    %289 = arith.select %34, %191, %160 : vector<2x32xi1>, vector<2x32xf32>
    %290 = arith.select %34, %222, %129 : vector<2x32xi1>, vector<2x32xf32>
    %291 = arith.select %34, %253, %98 : vector<2x32xi1>, vector<2x32xf32>
    %292 = arith.select %34, %284, %67 : vector<2x32xi1>, vector<2x32xf32>
    %293 = tpu.concatenate %285, %286, %287, %288, %289, %290, %291, %292 in 0 : vector<2x32xf32>, vector<2x32xf32>, vector<2x32xf32>, vector<2x32xf32>, vector<2x32xf32>, vector<2x32xf32>, vector<2x32xf32>, vector<2x32xf32> -> vector<16x32xf32>
    %c0_62 = arith.constant 0 : index
    %c0_63 = arith.constant 0 : index
    %294 = vector.load %arg5[%c0_62, %c0_63] : memref<32x5xf32, #tpu.memory_space<vmem>>, vector<32x5xf32>
    %cst_64 = arith.constant dense<0.000000e+00> : vector<16x5xf32>
    %295 = tpu.matmul %293, %294, %cst_64 {dimension_numbers = #tpu.dot_dimension_numbers<[1], [0], [0], [1], [0, 0, 1, 1], [], []>} : vector<16x32xf32>, vector<32x5xf32>, vector<16x5xf32> -> vector<16x5xf32>
    %c0_65 = arith.constant 0 : index
    %c0_66 = arith.constant 0 : index
    %296 = vector.load %arg6[%c0_65, %c0_66] : memref<1x5xf32, #tpu.memory_space<vmem>>, vector<1x5xf32>
    %297 = vector.broadcast %296 : vector<1x5xf32> to vector<16x5xf32>
    %298 = arith.addf %295, %297 : vector<16x5xf32>
    %c0_67 = arith.constant 0 : index
    %c0_68 = arith.constant 0 : index
    %299 = vector.load %arg7[%c0_67, %c0_68] : memref<5x5xf32, #tpu.memory_space<vmem>>, vector<5x5xf32>
    %300 = tpu.iota {dimensions = array<i32: 2>} : vector<2x5x5xi32>
    %c0_69 = arith.constant 0 : index
    %c0_70 = arith.constant 0 : index
    %301 = vector.load %arg8[%c0_69, %c0_70] : memref<1x5xf32, #tpu.memory_space<vmem>>, vector<1x5xf32>
    %302 = vector.extract_strided_slice %298 {offsets = [0, 0], sizes = [2, 5], strides = [1, 1]} : vector<16x5xf32> to vector<2x5xf32>
    %303 = vector.broadcast %301 : vector<1x5xf32> to vector<2x5xf32>
    %304 = arith.addf %303, %302 : vector<2x5xf32>
    %305 = vector.shape_cast %304 : vector<2x5xf32> to vector<2x1x5xf32>
    %306 = vector.shape_cast %299 : vector<5x5xf32> to vector<1x5x5xf32>
    %307 = vector.broadcast %305 : vector<2x1x5xf32> to vector<2x5x5xf32>
    %308 = vector.broadcast %306 : vector<1x5x5xf32> to vector<2x5x5xf32>
    %309 = arith.addf %307, %308 : vector<2x5x5xf32>
    %cst_71 = arith.constant dense<0xFF800000> : vector<2x5xf32>
    %310 = vector.multi_reduction <maximumf>, %309, %cst_71 [2] : vector<2x5x5xf32> to vector<2x5xf32>
    %311 = vector.shape_cast %310 : vector<2x5xf32> to vector<2x5x1xf32>
    %312 = vector.broadcast %311 : vector<2x5x1xf32> to vector<2x5x5xf32>
    %313 = arith.cmpf oge, %309, %312 : vector<2x5x5xf32>
    %c5_i32 = arith.constant 5 : i32
    %314 = vector.broadcast %c5_i32 : i32 to vector<2x5x5xi32>
    %315 = arith.select %313, %300, %314 : vector<2x5x5xi1>, vector<2x5x5xi32>
    %cst_72 = arith.constant dense<2147483647> : vector<2x5xi32>
    %316 = vector.multi_reduction <minsi>, %315, %cst_72 [2] : vector<2x5x5xi32> to vector<2x5xi32>
    %317 = vector.shape_cast %311 : vector<2x5x1xf32> to vector<2x5xf32>
    %318 = vector.extract_strided_slice %298 {offsets = [2, 0], sizes = [2, 5], strides = [1, 1]} : vector<16x5xf32> to vector<2x5xf32>
    %319 = arith.addf %317, %318 : vector<2x5xf32>
    %320 = vector.shape_cast %319 : vector<2x5xf32> to vector<2x1x5xf32>
    %321 = vector.shape_cast %299 : vector<5x5xf32> to vector<1x5x5xf32>
    %322 = vector.broadcast %320 : vector<2x1x5xf32> to vector<2x5x5xf32>
    %323 = vector.broadcast %321 : vector<1x5x5xf32> to vector<2x5x5xf32>
    %324 = arith.addf %322, %323 : vector<2x5x5xf32>
    %cst_73 = arith.constant dense<0xFF800000> : vector<2x5xf32>
    %325 = vector.multi_reduction <maximumf>, %324, %cst_73 [2] : vector<2x5x5xf32> to vector<2x5xf32>
    %326 = vector.shape_cast %325 : vector<2x5xf32> to vector<2x5x1xf32>
    %327 = vector.broadcast %326 : vector<2x5x1xf32> to vector<2x5x5xf32>
    %328 = arith.cmpf oge, %324, %327 : vector<2x5x5xf32>
    %c5_i32_74 = arith.constant 5 : i32
    %329 = vector.broadcast %c5_i32_74 : i32 to vector<2x5x5xi32>
    %330 = arith.select %328, %300, %329 : vector<2x5x5xi1>, vector<2x5x5xi32>
    %cst_75 = arith.constant dense<2147483647> : vector<2x5xi32>
    %331 = vector.multi_reduction <minsi>, %330, %cst_75 [2] : vector<2x5x5xi32> to vector<2x5xi32>
    %332 = vector.shape_cast %326 : vector<2x5x1xf32> to vector<2x5xf32>
    %333 = vector.extract_strided_slice %298 {offsets = [4, 0], sizes = [2, 5], strides = [1, 1]} : vector<16x5xf32> to vector<2x5xf32>
    %334 = arith.addf %332, %333 : vector<2x5xf32>
    %335 = vector.shape_cast %334 : vector<2x5xf32> to vector<2x1x5xf32>
    %336 = vector.shape_cast %299 : vector<5x5xf32> to vector<1x5x5xf32>
    %337 = vector.broadcast %335 : vector<2x1x5xf32> to vector<2x5x5xf32>
    %338 = vector.broadcast %336 : vector<1x5x5xf32> to vector<2x5x5xf32>
    %339 = arith.addf %337, %338 : vector<2x5x5xf32>
    %cst_76 = arith.constant dense<0xFF800000> : vector<2x5xf32>
    %340 = vector.multi_reduction <maximumf>, %339, %cst_76 [2] : vector<2x5x5xf32> to vector<2x5xf32>
    %341 = vector.shape_cast %340 : vector<2x5xf32> to vector<2x5x1xf32>
    %342 = vector.broadcast %341 : vector<2x5x1xf32> to vector<2x5x5xf32>
    %343 = arith.cmpf oge, %339, %342 : vector<2x5x5xf32>
    %c5_i32_77 = arith.constant 5 : i32
    %344 = vector.broadcast %c5_i32_77 : i32 to vector<2x5x5xi32>
    %345 = arith.select %343, %300, %344 : vector<2x5x5xi1>, vector<2x5x5xi32>
    %cst_78 = arith.constant dense<2147483647> : vector<2x5xi32>
    %346 = vector.multi_reduction <minsi>, %345, %cst_78 [2] : vector<2x5x5xi32> to vector<2x5xi32>
    %347 = vector.shape_cast %341 : vector<2x5x1xf32> to vector<2x5xf32>
    %348 = vector.extract_strided_slice %298 {offsets = [6, 0], sizes = [2, 5], strides = [1, 1]} : vector<16x5xf32> to vector<2x5xf32>
    %349 = arith.addf %347, %348 : vector<2x5xf32>
    %350 = vector.shape_cast %349 : vector<2x5xf32> to vector<2x1x5xf32>
    %351 = vector.shape_cast %299 : vector<5x5xf32> to vector<1x5x5xf32>
    %352 = vector.broadcast %350 : vector<2x1x5xf32> to vector<2x5x5xf32>
    %353 = vector.broadcast %351 : vector<1x5x5xf32> to vector<2x5x5xf32>
    %354 = arith.addf %352, %353 : vector<2x5x5xf32>
    %cst_79 = arith.constant dense<0xFF800000> : vector<2x5xf32>
    %355 = vector.multi_reduction <maximumf>, %354, %cst_79 [2] : vector<2x5x5xf32> to vector<2x5xf32>
    %356 = vector.shape_cast %355 : vector<2x5xf32> to vector<2x5x1xf32>
    %357 = vector.broadcast %356 : vector<2x5x1xf32> to vector<2x5x5xf32>
    %358 = arith.cmpf oge, %354, %357 : vector<2x5x5xf32>
    %c5_i32_80 = arith.constant 5 : i32
    %359 = vector.broadcast %c5_i32_80 : i32 to vector<2x5x5xi32>
    %360 = arith.select %358, %300, %359 : vector<2x5x5xi1>, vector<2x5x5xi32>
    %cst_81 = arith.constant dense<2147483647> : vector<2x5xi32>
    %361 = vector.multi_reduction <minsi>, %360, %cst_81 [2] : vector<2x5x5xi32> to vector<2x5xi32>
    %362 = vector.shape_cast %356 : vector<2x5x1xf32> to vector<2x5xf32>
    %363 = vector.extract_strided_slice %298 {offsets = [8, 0], sizes = [2, 5], strides = [1, 1]} : vector<16x5xf32> to vector<2x5xf32>
    %364 = arith.addf %362, %363 : vector<2x5xf32>
    %365 = vector.shape_cast %364 : vector<2x5xf32> to vector<2x1x5xf32>
    %366 = vector.shape_cast %299 : vector<5x5xf32> to vector<1x5x5xf32>
    %367 = vector.broadcast %365 : vector<2x1x5xf32> to vector<2x5x5xf32>
    %368 = vector.broadcast %366 : vector<1x5x5xf32> to vector<2x5x5xf32>
    %369 = arith.addf %367, %368 : vector<2x5x5xf32>
    %cst_82 = arith.constant dense<0xFF800000> : vector<2x5xf32>
    %370 = vector.multi_reduction <maximumf>, %369, %cst_82 [2] : vector<2x5x5xf32> to vector<2x5xf32>
    %371 = vector.shape_cast %370 : vector<2x5xf32> to vector<2x5x1xf32>
    %372 = vector.broadcast %371 : vector<2x5x1xf32> to vector<2x5x5xf32>
    %373 = arith.cmpf oge, %369, %372 : vector<2x5x5xf32>
    %c5_i32_83 = arith.constant 5 : i32
    %374 = vector.broadcast %c5_i32_83 : i32 to vector<2x5x5xi32>
    %375 = arith.select %373, %300, %374 : vector<2x5x5xi1>, vector<2x5x5xi32>
    %cst_84 = arith.constant dense<2147483647> : vector<2x5xi32>
    %376 = vector.multi_reduction <minsi>, %375, %cst_84 [2] : vector<2x5x5xi32> to vector<2x5xi32>
    %377 = vector.shape_cast %371 : vector<2x5x1xf32> to vector<2x5xf32>
    %378 = vector.extract_strided_slice %298 {offsets = [10, 0], sizes = [2, 5], strides = [1, 1]} : vector<16x5xf32> to vector<2x5xf32>
    %379 = arith.addf %377, %378 : vector<2x5xf32>
    %380 = vector.shape_cast %379 : vector<2x5xf32> to vector<2x1x5xf32>
    %381 = vector.shape_cast %299 : vector<5x5xf32> to vector<1x5x5xf32>
    %382 = vector.broadcast %380 : vector<2x1x5xf32> to vector<2x5x5xf32>
    %383 = vector.broadcast %381 : vector<1x5x5xf32> to vector<2x5x5xf32>
    %384 = arith.addf %382, %383 : vector<2x5x5xf32>
    %cst_85 = arith.constant dense<0xFF800000> : vector<2x5xf32>
    %385 = vector.multi_reduction <maximumf>, %384, %cst_85 [2] : vector<2x5x5xf32> to vector<2x5xf32>
    %386 = vector.shape_cast %385 : vector<2x5xf32> to vector<2x5x1xf32>
    %387 = vector.broadcast %386 : vector<2x5x1xf32> to vector<2x5x5xf32>
    %388 = arith.cmpf oge, %384, %387 : vector<2x5x5xf32>
    %c5_i32_86 = arith.constant 5 : i32
    %389 = vector.broadcast %c5_i32_86 : i32 to vector<2x5x5xi32>
    %390 = arith.select %388, %300, %389 : vector<2x5x5xi1>, vector<2x5x5xi32>
    %cst_87 = arith.constant dense<2147483647> : vector<2x5xi32>
    %391 = vector.multi_reduction <minsi>, %390, %cst_87 [2] : vector<2x5x5xi32> to vector<2x5xi32>
    %392 = vector.shape_cast %386 : vector<2x5x1xf32> to vector<2x5xf32>
    %393 = vector.extract_strided_slice %298 {offsets = [12, 0], sizes = [2, 5], strides = [1, 1]} : vector<16x5xf32> to vector<2x5xf32>
    %394 = arith.addf %392, %393 : vector<2x5xf32>
    %395 = vector.shape_cast %394 : vector<2x5xf32> to vector<2x1x5xf32>
    %396 = vector.shape_cast %299 : vector<5x5xf32> to vector<1x5x5xf32>
    %397 = vector.broadcast %395 : vector<2x1x5xf32> to vector<2x5x5xf32>
    %398 = vector.broadcast %396 : vector<1x5x5xf32> to vector<2x5x5xf32>
    %399 = arith.addf %397, %398 : vector<2x5x5xf32>
    %cst_88 = arith.constant dense<0xFF800000> : vector<2x5xf32>
    %400 = vector.multi_reduction <maximumf>, %399, %cst_88 [2] : vector<2x5x5xf32> to vector<2x5xf32>
    %401 = vector.shape_cast %400 : vector<2x5xf32> to vector<2x5x1xf32>
    %402 = vector.broadcast %401 : vector<2x5x1xf32> to vector<2x5x5xf32>
    %403 = arith.cmpf oge, %399, %402 : vector<2x5x5xf32>
    %c5_i32_89 = arith.constant 5 : i32
    %404 = vector.broadcast %c5_i32_89 : i32 to vector<2x5x5xi32>
    %405 = arith.select %403, %300, %404 : vector<2x5x5xi1>, vector<2x5x5xi32>
    %cst_90 = arith.constant dense<2147483647> : vector<2x5xi32>
    %406 = vector.multi_reduction <minsi>, %405, %cst_90 [2] : vector<2x5x5xi32> to vector<2x5xi32>
    %407 = vector.shape_cast %401 : vector<2x5x1xf32> to vector<2x5xf32>
    %408 = vector.extract_strided_slice %298 {offsets = [14, 0], sizes = [2, 5], strides = [1, 1]} : vector<16x5xf32> to vector<2x5xf32>
    %409 = arith.addf %407, %408 : vector<2x5xf32>
    %c0_91 = arith.constant 0 : index
    %c0_92 = arith.constant 0 : index
    %410 = vector.load %arg9[%c0_91, %c0_92] : memref<1x5xf32, #tpu.memory_space<vmem>>, vector<1x5xf32>
    %411 = vector.broadcast %410 : vector<1x5xf32> to vector<2x5xf32>
    %412 = arith.addf %409, %411 : vector<2x5xf32>
    %413 = tpu.iota {dimensions = array<i32: 1>} : vector<2x5xi32>
    %cst_93 = arith.constant dense<0xFF800000> : vector<2xf32>
    %414 = vector.multi_reduction <maximumf>, %412, %cst_93 [1] : vector<2x5xf32> to vector<2xf32>
    %415 = vector.shape_cast %414 : vector<2xf32> to vector<2x1xf32>
    %416 = vector.broadcast %415 : vector<2x1xf32> to vector<2x5xf32>
    %417 = arith.cmpf oge, %412, %416 : vector<2x5xf32>
    %c5_i32_94 = arith.constant 5 : i32
    %418 = vector.broadcast %c5_i32_94 : i32 to vector<2x5xi32>
    %419 = arith.select %417, %413, %418 : vector<2x5xi1>, vector<2x5xi32>
    %cst_95 = arith.constant dense<2147483647> : vector<2xi32>
    %420 = vector.multi_reduction <minsi>, %419, %cst_95 [1] : vector<2x5xi32> to vector<2xi32>
    %421 = vector.shape_cast %420 : vector<2xi32> to vector<2x1xi32>
    %422 = vector.broadcast %421 : vector<2x1xi32> to vector<2x5xi32>
    %423 = arith.cmpi eq, %413, %422 : vector<2x5xi32>
    %c0_i32_96 = arith.constant 0 : i32
    %424 = vector.broadcast %c0_i32_96 : i32 to vector<2x5xi32>
    %425 = arith.select %423, %406, %424 : vector<2x5xi1>, vector<2x5xi32>
    %cst_97 = arith.constant dense<0> : vector<2xi32>
    %426 = vector.multi_reduction <add>, %425, %cst_97 [1] : vector<2x5xi32> to vector<2xi32>
    %427 = vector.shape_cast %426 : vector<2xi32> to vector<2x1xi32>
    %428 = vector.broadcast %427 : vector<2x1xi32> to vector<2x5xi32>
    %429 = arith.cmpi eq, %413, %428 : vector<2x5xi32>
    %c0_i32_98 = arith.constant 0 : i32
    %430 = vector.broadcast %c0_i32_98 : i32 to vector<2x5xi32>
    %431 = arith.select %429, %391, %430 : vector<2x5xi1>, vector<2x5xi32>
    %cst_99 = arith.constant dense<0> : vector<2xi32>
    %432 = vector.multi_reduction <add>, %431, %cst_99 [1] : vector<2x5xi32> to vector<2xi32>
    %433 = vector.shape_cast %432 : vector<2xi32> to vector<2x1xi32>
    %434 = vector.broadcast %433 : vector<2x1xi32> to vector<2x5xi32>
    %435 = arith.cmpi eq, %413, %434 : vector<2x5xi32>
    %c0_i32_100 = arith.constant 0 : i32
    %436 = vector.broadcast %c0_i32_100 : i32 to vector<2x5xi32>
    %437 = arith.select %435, %376, %436 : vector<2x5xi1>, vector<2x5xi32>
    %cst_101 = arith.constant dense<0> : vector<2xi32>
    %438 = vector.multi_reduction <add>, %437, %cst_101 [1] : vector<2x5xi32> to vector<2xi32>
    %439 = vector.shape_cast %438 : vector<2xi32> to vector<2x1xi32>
    %440 = vector.broadcast %439 : vector<2x1xi32> to vector<2x5xi32>
    %441 = arith.cmpi eq, %413, %440 : vector<2x5xi32>
    %c0_i32_102 = arith.constant 0 : i32
    %442 = vector.broadcast %c0_i32_102 : i32 to vector<2x5xi32>
    %443 = arith.select %441, %361, %442 : vector<2x5xi1>, vector<2x5xi32>
    %cst_103 = arith.constant dense<0> : vector<2xi32>
    %444 = vector.multi_reduction <add>, %443, %cst_103 [1] : vector<2x5xi32> to vector<2xi32>
    %445 = vector.shape_cast %444 : vector<2xi32> to vector<2x1xi32>
    %446 = vector.broadcast %445 : vector<2x1xi32> to vector<2x5xi32>
    %447 = arith.cmpi eq, %413, %446 : vector<2x5xi32>
    %c0_i32_104 = arith.constant 0 : i32
    %448 = vector.broadcast %c0_i32_104 : i32 to vector<2x5xi32>
    %449 = arith.select %447, %346, %448 : vector<2x5xi1>, vector<2x5xi32>
    %cst_105 = arith.constant dense<0> : vector<2xi32>
    %450 = vector.multi_reduction <add>, %449, %cst_105 [1] : vector<2x5xi32> to vector<2xi32>
    %451 = vector.shape_cast %450 : vector<2xi32> to vector<2x1xi32>
    %452 = vector.broadcast %451 : vector<2x1xi32> to vector<2x5xi32>
    %453 = arith.cmpi eq, %413, %452 : vector<2x5xi32>
    %c0_i32_106 = arith.constant 0 : i32
    %454 = vector.broadcast %c0_i32_106 : i32 to vector<2x5xi32>
    %455 = arith.select %453, %331, %454 : vector<2x5xi1>, vector<2x5xi32>
    %cst_107 = arith.constant dense<0> : vector<2xi32>
    %456 = vector.multi_reduction <add>, %455, %cst_107 [1] : vector<2x5xi32> to vector<2xi32>
    %457 = vector.shape_cast %456 : vector<2xi32> to vector<2x1xi32>
    %458 = vector.broadcast %457 : vector<2x1xi32> to vector<2x5xi32>
    %459 = arith.cmpi eq, %413, %458 : vector<2x5xi32>
    %c0_i32_108 = arith.constant 0 : i32
    %460 = vector.broadcast %c0_i32_108 : i32 to vector<2x5xi32>
    %461 = arith.select %459, %316, %460 : vector<2x5xi1>, vector<2x5xi32>
    %cst_109 = arith.constant dense<0> : vector<2xi32>
    %462 = vector.multi_reduction <add>, %461, %cst_109 [1] : vector<2x5xi32> to vector<2xi32>
    %463 = vector.shape_cast %462 : vector<2xi32> to vector<2x1xi32>
    %464 = tpu.concatenate %463, %457, %451, %445, %439, %433, %427, %421 in 1 : vector<2x1xi32>, vector<2x1xi32>, vector<2x1xi32>, vector<2x1xi32>, vector<2x1xi32>, vector<2x1xi32>, vector<2x1xi32>, vector<2x1xi32> -> vector<2x8xi32>
    %c0_110 = arith.constant 0 : index
    %c0_111 = arith.constant 0 : index
    %465 = vector.load %arg10[%c0_110, %c0_111] : memref<2x8xi32, #tpu.memory_space<vmem>>, vector<2x8xi32>
    tpu.vector_store %arg10[%c0_110, %c0_111], %464 {strides = array<i32>} : memref<2x8xi32, #tpu.memory_space<vmem>>, vector<2x8xi32>,
    return
  }
}

</mosaic_0001>

<bundles_post_ra>
// kernel: ner_lstm_crf_forward.1
= control target key start
LH: loop header
LB: loop body
LE: loop exit
PB: predicated region body
PF: predicated region fallthrough
CT: control target
= control target key end

     0   :  { %15 = vsyncpa [#allocation3], 0  ;;  %s5390_s0 = inlined_call_operand.vmem [shape: s32[16,1], index: 0, kind: input, shape index: {}]   ;;  %s5391_s1 = inlined_call_operand.vmem [shape: f32[21,32], index: 1, kind: input, shape index: {}]   ;;  %s5392_s2 = inlined_call_operand.hbm [shape: f32[32,128], index: 2, kind: input, shape index: {}]   ;;  %s5393_s3 = inlined_call_operand.hbm [shape: f32[32,128], index: 3, kind: input, shape index: {}]   ;;  %s5394_s4 = inlined_call_operand.hbm [shape: f32[1,128], index: 4, kind: input, shape index: {}]   ;;  %s5395_s5 = inlined_call_operand.vmem [shape: f32[32,5], index: 5, kind: input, shape index: {}]   ;;  %s5396_s6 = inlined_call_operand.hbm [shape: f32[1,5], index: 6, kind: input, shape index: {}]   ;;  %s5397_s7 = inlined_call_operand.vmem [shape: f32[5,5], index: 7, kind: input, shape index: {}]   ;;  %s5398_s8 = inlined_call_operand.vmem [shape: f32[1,5], index: 8, kind: input, shape index: {}]   ;;  %s5399_s9 = inlined_call_operand.vmem [shape: f32[1,5], index: 9, kind: input, shape index: {}]   ;;  %s5400_s10 = inlined_call_operand.hbm [shape: s32[2,8], index: 10, kind: output, shape index: {}]  }
   0x1   :  { %16 = vsyncpa [#allocation6], 0 }
   0x2   :  { %17 = vsyncpa [#allocation9], 0 }
   0x3   :  { %18 = vsyncpa [#allocation4], 0  ;;  %s4025_s13 = smov [#allocation5]   ;;  %s4026_s15 = smov [#allocation2]  }
   0x4   :  { %s40_s14 = sshll.u32 %s4025_s13, 4  ;;  %s28_s16 = sshll.u32 %s4026_s15, 4  ;;  %s41_s14 = int_to_ptr.vmem [resolvable:$true] %s40_s14  ;;  %s4094_s16 = int_to_ptr.vmem [resolvable:$true] %s28_s16 }
   0x5   :  { %s3907_s19 = scalar_lea.hbm %s5393_s3, 512 }
   0x6   :  { %p3908_p0 = scmp.ne.s32.totalorder %s5393_s3, %s3907_s19  ;;  %p3911_p1 = scmp.lt.u32.totalorder %s3907_s19, %s5393_s3 }
   0x8   :  { %p3913_p2 = pnand %p3911_p1, %p3908_p0 }
   0xa   :  { %3916 = shalt.err (!%p3913_p2)
}
   0xb   :  { %s3917_s24 = scalar_lea.vmem %s41_s14, 512  ;;  %p3922_p4 = scmp.lt.s32.totalorder %s41_s14, %s41_s14 }
   0xc   :  { %p3918_p3 = scmp.ne.s32.totalorder %s41_s14, %s3917_s24  ;;  %p3923_p5 = scmp.lt.s32.totalorder %s3917_s24, %s3917_s24 }
   0xe   :  { %p3924_p6 = por %p3923_p5, %p3922_p4 }
  0x10   :  { %p3925_p7 = pnand %p3924_p6, %p3918_p3 }
  0x12   :  { %3928 = shalt.err (!%p3925_p7)
}
  0x13   :  { %s4027_s25 = smov 128   ;;  %s4028_s26 = smov 8  }
  0x14   :  { %46 = dma.hbm_to_vmem [thread:$0]  %s5393_s3, 512, %s41_s14, [#allocation6], %s4027_s25, %s4027_s25, %s4028_s26  }
  0x15   :  { %s3929_s11 = scalar_lea.hbm %s5392_s2, 512 }
  0x16   :  { %p3930_p8 = scmp.ne.s32.totalorder %s5392_s2, %s3929_s11  ;;  %p3933_p9 = scmp.lt.u32.totalorder %s3929_s11, %s5392_s2 }
  0x18   :  { %p3935_p10 = pnand %p3933_p9, %p3930_p8 }
  0x1a   :  { %3938 = shalt.err (!%p3935_p10)
}
  0x1b   :  { %s3939_s18 = scalar_lea.vmem %s4094_s16, 512  ;;  %p3944_p12 = scmp.lt.s32.totalorder %s4094_s16, %s4094_s16 }
  0x1c   :  { %p3940_p11 = scmp.ne.s32.totalorder %s4094_s16, %s3939_s18  ;;  %p3945_p13 = scmp.lt.s32.totalorder %s3939_s18, %s3939_s18 }
  0x1e   :  { %p3946_p0 = por %p3945_p13, %p3944_p12 }
  0x20   :  { %p3947_p1 = pnand %p3946_p0, %p3940_p11 }
  0x22   :  { %3950 = shalt.err (!%p3947_p1)
}
  0x23   :  { %34 = dma.hbm_to_vmem [thread:$0]  %s5392_s2, 512, %s4094_s16, [#allocation3], %s4027_s25, %s4027_s25, %s4028_s26  }
  0x24   :  { %s4029_s19 = smov [#allocation7]   ;;  %s4030_s21 = smov [#allocation8]  }
  0x25   :  { %s53_s20 = sshll.u32 %s4029_s19, 4  ;;  %s65_s22 = sshll.u32 %s4030_s21, 4  ;;  %s54_s20 = int_to_ptr.vmem [resolvable:$true] %s53_s20  ;;  %s66_s22 = int_to_ptr.vmem [resolvable:$true] %s65_s22 }
  0x26   :  { %s3951_s27 = scalar_lea.hbm %s5394_s4, 16 }
  0x27   :  { %p3952_p2 = scmp.ne.s32.totalorder %s5394_s4, %s3951_s27  ;;  %p3955_p3 = scmp.lt.u32.totalorder %s3951_s27, %s5394_s4 }
  0x29   :  { %p3957_p4 = pnand %p3955_p3, %p3952_p2 }
  0x2b   :  { %3960 = shalt.err (!%p3957_p4)
}
  0x2c   :  { %s3961_s2 = scalar_lea.vmem %s54_s20, 16  ;;  %s3965_s16 = scalar_lea.vmem %s54_s20, 32 }
  0x2d   :  { %p3962_p5 = scmp.ne.s32.totalorder %s54_s20, %s3961_s2  ;;  %p3966_p6 = scmp.lt.s32.totalorder %s54_s20, %s54_s20 }
  0x2e   :  { %p3967_p7 = scmp.lt.s32.totalorder %s3965_s16, %s3961_s2 }
  0x30   :  { %p3968_p8 = por %p3967_p7, %p3966_p6 }
  0x32   :  { %p3969_p9 = pnand %p3968_p8, %p3962_p5 }
  0x34   :  { %3972 = shalt.err (!%p3969_p9)
}
  0x35   :  { %56 = dma.hbm_to_vmem [thread:$0]  %s5394_s4, 16, %s54_s20, [#allocation6]  }
  0x36   :  { %s3973_s15 = scalar_lea.hbm %s5396_s6, 16 }
  0x37   :  { %p3974_p10 = scmp.ne.s32.totalorder %s5396_s6, %s3973_s15  ;;  %p3977_p11 = scmp.lt.u32.totalorder %s3973_s15, %s5396_s6 }
  0x39   :  { %p3979_p12 = pnand %p3977_p11, %p3974_p10 }
  0x3b   :  { %3982 = shalt.err (!%p3979_p12)
}
  0x3c   :  { %s3983_s19 = scalar_lea.vmem %s66_s22, 16  ;;  %s3987_s21 = scalar_lea.vmem %s66_s22, 32 }
  0x3d   :  { %p3984_p13 = scmp.ne.s32.totalorder %s66_s22, %s3983_s19  ;;  %p3988_p0 = scmp.lt.s32.totalorder %s66_s22, %s66_s22 }
  0x3e   :  { %p3989_p1 = scmp.lt.s32.totalorder %s3987_s21, %s3983_s19 }
  0x40   :  { %p3990_p2 = por %p3989_p1, %p3988_p0 }
  0x42   :  { %p3991_p3 = pnand %p3990_p2, %p3984_p13 }
  0x44   :  { %3994 = shalt.err (!%p3991_p3)
}
  0x45   :  { %68 = dma.hbm_to_vmem [thread:$0]  %s5396_s6, 16, %s66_s22, [#allocation9]  }
  0x46   :  { %4017 = dma.done.wait [#allocation3], 512  }
  0x47   :  { %4018 = vsyncadd [#allocation3], 4294966784 }
  0x48   :  { %4019 = dma.done.wait [#allocation6], 528  }
  0x49   :  { %4020 = vsyncadd [#allocation6], 4294966768 }
  0x4a   :  { %4021 = dma.done.wait [#allocation9], 16  }
  0x4b   :  { %4022 = vsyncadd [#allocation9], 4294967280  ;;  %v4031_v0 = vmov 0   ;;  %v87_v1 = vld [vmem:[%s5390_s0] sm:$0xff]  ;;  %v104_v3 = vld [vmem:[%s5391_s1 + $0x8] sm:$0xff]  ;;  %vm113_vm0 = vcmask 1044480   ;;  %v89_v14 = vlaneseq }
  0x4c   :  { %3841 = vset.pattern.permute.xlu0 %v4031_v0  ;;  %3842 = vset.pattern.permute.xlu1 %v4031_v0  ;;  %v103_v2 = vld [vmem:[%s5391_s1] sm:$0xff]  ;;  %v88_v4 = vld [vmem:[%s5390_s0 + $0x8] sm:$0xff]  ;;  %v105_v6 = vld [vmem:[%s5391_s1 + $0x10] sm:$0x1f]  ;;  %v4032_v13 = vmov 0.0|0.0   ;;  %vm106_vm1 = vcmask 171008  }
  0x4d   :  { %92 = vperm.xlu0 %3841, %v87_v1   ;;  %v3759_v5 = vpack.c.bf16 %v104_v3, %v103_v2  ;;  %v192_v7 = vld [vmem:[#allocation2] sm:$0xff]  ;;  %v193_v8 = vld [vmem:[#allocation2 + $0x8] sm:$0xff]  ;;  %v194_v9 = vld [vmem:[#allocation2 + $0x10] sm:$0xff]  ;;  %v4167_v15 = vand.u32 127, %v89_v14  ;;  %v4033_v17 = vmov 0.0   ;;  %vm4034_vm4 = vmmov 0  }
  0x4e   :  { %v3763_v10 = vpack.c.bf16 %v193_v8, %v192_v7  ;;  %v195_v11 = vld [vmem:[#allocation2 + $0x18] sm:$0xff]  ;;  %v303_v21 = vld [vmem:[#allocation5] sm:$0xff]  ;;  %v304_v22 = vld [vmem:[#allocation5 + $0x8] sm:$0xff]  ;;  %vm203_vm5 = vcmask 261120   ;;  %s4035_s0 = smov 64   ;;  %s4036_s1 = smov 32  }
  0x4f   :  { %3760 = vmatprep.subr.bf16.mxu0 %v3759_v5  ;;  %v3767_v12 = vpack.c.bf16 %v195_v11, %v194_v9  ;;  %v4173_v23 = vpack.c.bf16 %v304_v22, %v303_v21  ;;  %v305_v24 = vld [vmem:[#allocation5 + $0x10] sm:$0xff]  ;;  %v306_v25 = vld [vmem:[#allocation5 + $0x18] sm:$0xff]  ;;  %v3560_v31 = vld [vmem:[#allocation7] ss:$0 sm:$0xff]  ;;  %v289_v32 = vand.u32 31, %v4167_v15  ;;  %vm298_vm7 = vcmp.lt.s32.totalorder %v4167_v15, 16 }
  0x50   :  { %3762 = vmatpush3.bf16.msra.mxu0 %v3759_v5  ;;  %3764 = vmatprep.subr.bf16.mxu1 %v3763_v10  ;;  %v4177_v26 = vpack.c.bf16 %v306_v25, %v305_v24  ;;  %vm1197_vm8 = vcmask 1041408   ;;  %vm1199_vm9 = vcmask 1043456   ;;  %vm1201_vm10 = vcmask 1045504  }
  0x51   :  { %95 = vperm.xlu0 %3841, %v88_v4   ;;  %3644 = vmatprep.subr.msk.mxu0 %vm113_vm0, %v105_v6  ;;  %vm297_vm6 = vcmp.lt.s32.totalorder %v289_v32, 16  ;;  %vm1342_vm11 = vcmask 36864   ;;  %vm1533_vm12 = vcmask 1041409   ;;  %vm1535_vm13 = vcmask 1042434  }
  0x52   :  { %3766 = vmatpush3.bf16.msra.mxu1 %v3763_v10  ;;  %vm1537_vm14 = vcmask 1043459   ;;  %vm1539_vm15 = vcmask 1044484  }
  0x53   :  { %3768 = vmatprep.subr.bf16.mxu1 %v3767_v12 }
  0x54   :  { %3645 = vmatpush3.msk.msra.mxu0 %vm113_vm0, %v105_v6  ;;  %vm3305_vm0 = vcmask 33792  }
  0x55   :  { %3771 = vmatprep.subr.bf16.mxu0 %v4032_v13 }
  0x56   :  { %3770 = vmatpush3.bf16.msra.mxu1 %v3767_v12 }
  0x57   :  { %3777 = vmatprep.subr.bf16.mxu1 %v4032_v13 }
  0xcc   :  { %v93_v16 = vpop.permute.xlu0 %92 }
  0xcd   :  { %vm97_vm2 = vcmp.eq.s32.totalorder %v4167_v15, %v93_v16 }
  0xce   :  { %v3555_v18 = vsel %vm97_vm2, 1.0, %v4033_v17 }
  0xcf   :  { %3646 = vmatprep.mubr.msk.f32.mxu0 %vm106_vm1, %v3555_v18 }
  0xd0   :  { %v96_v19 = vpop.permute.xlu0 %95 }
  0xd1   :  { %vm98_vm3 = vcmp.eq.s32.totalorder %v4167_v15, %v96_v19 }
  0xd2   :  { %v3556_v20 = vsel %vm98_vm3, 1.0, %v4033_v17 }
  0xd3   :  { %3647 = vmatmul.mubr.msk.f32.vlgmr.msra.gmra.mrb[0].mxu0 %vm106_vm1, %v3556_v20 }
  0xd4   :  { %3773 = vmatpush3.bf16.msra.mxu0 %v4173_v23  ;;  %3668 = vmatprep.mubr.msk.f32.mxu0 %vm4034_vm4, %v4033_v17 }
  0xd5   :  { %3774 = vmatprep.subr.bf16.mxu0 %v4032_v13 }
  0xd8   :  { %3776 = vmatpush3.bf16.msra.mxu0 %v4177_v26 }
  0xd9   :  { %3783 = vmatprep.subr.bf16.mxu0 %v4032_v13 }
  0xdb   :  { %3669 = vmatmul.mubr.f32.vlgmr.msra.gmra.mrb[2].mxu0 %v4033_v17 }
  0xdc   :  { %3785 = vmatpush3.bf16.msra.mxu0 %v4173_v23  ;;  %3690 = vmatprep.mubr.msk.f32.mxu0 %vm4034_vm4, %v4033_v17 }
  0xdd   :  { %3786 = vmatprep.subr.bf16.mxu0 %v4032_v13 }
  0xe0   :  { %3788 = vmatpush3.bf16.msra.mxu0 %v4177_v26 }
  0xe1   :  { %3795 = vmatprep.subr.bf16.mxu0 %v4032_v13 }
 0x1a6   :  { %v3648_v27 = vpop.f32.mrb[0].mxu0 }
 0x1a7   :  { %v183_v28 = vpop.f32.mrb[1].mxu0 }
 0x1a8   :  { %3657 = vmatprep.mubr.msk.f32.mxu1 %vm203_vm5, %v183_v28 }
 0x1a9   :  { %3658 = vmatmul.mubr.msk.f32.vlgmr.msra.gmra.mrb[0].mxu1 %vm203_vm5, %v3648_v27 }
 0x1aa   :  { %3779 = vmatpush3.bf16.msra.mxu1 %v4173_v23  ;;  %3679 = vmatprep.mubr.msk.f32.mxu1 %vm4034_vm4, %v4033_v17 }
 0x1ab   :  { %3780 = vmatprep.subr.bf16.mxu1 %v4032_v13 }
 0x1ae   :  { %3782 = vmatpush3.bf16.msra.mxu1 %v4177_v26  ;;  %v376_v29 = vpop.f32.mrb[2].mxu0 }
 0x1af   :  { %3789 = vmatprep.subr.bf16.mxu1 %v4032_v13  ;;  %v3670_v30 = vpop.f32.mrb[3].mxu0 }
 0x27c   :  { %v3659_v33 = vpop.f32.mrb[0].mxu1 }
 0x27d   :  { %v282_v34 = vadd.f32 %v3659_v33, %v3560_v31  ;;  %v276_v35 = vpop.f32.mrb[1].mxu1 }
 0x27e   :  { %v277_v36 = vadd.f32 %v3560_v31, %v276_v35 }
 0x27f   :  { %v300_v37 = vrot.slane %v282_v34, 6  ;;  %v405_v38 = vrot.slane %v282_v34, 2 }
 0x280   :  { %v729_v39 = vrot.slane %v277_v36, 6  ;;  %v836_v40 = vrot.slane %v277_v36, 2 }
 0x281   :  { %v4199_v41 = vsel %vm297_vm6, %v277_v36, %v300_v37  ;;  %v4201_v42 = vsel %vm297_vm6, %v277_v36, %v405_v38 }
 0x282   :  { %v380_v43 = vadd.f32 %v376_v29, %v4199_v41  ;;  %v4204_v44 = vsel %vm297_vm6, %v282_v34, %v729_v39  ;;  %v4206_v45 = vsel %vm297_vm6, %v282_v34, %v836_v40 }
 0x284   :  { %3843 = vtanh.f32 %v380_v43  ;;  %v3563_v47 = vmul.f32 -1.442695, %v380_v43 }
 0x286   :  { %3845 = vpow2.f32 %v3563_v47 }
 0x28e   :  { %v3844_v46 = vpop.eup %3843 }
 0x28f   :  { %390 = vrot.lane.b32.xlu1 %v3844_v46, %s4035_s0 }
 0x290   :  { %v3846_v48 = vpop.eup %3845 }
 0x291   :  { %v384_v49 = vadd.f32 1.0, %v3846_v48 }
 0x293   :  { %3847 = vrcp.f32 %v384_v49 }
 0x29d   :  { %v3848_v50 = vpop.eup %3847 }
 0x29e   :  { %v388_v53 = vmul.f32 0.0, %v3848_v50 }
 0x301   :  { %v391_v51 = vpop.permute.xlu1 %390 }
 0x302   :  { %v393_v52 = vmul.f32 %v3848_v50, %v391_v51 }
 0x304   :  { %395 = vrot.lane.b32.xlu1 %v393_v52, %s4036_s1 }
 0x376   :  { %v396_v54 = vpop.permute.xlu1 %395 }
 0x377   :  { %v398_v55 = vadd.f32 %v396_v54, %v388_v53 }
 0x379   :  { %3849 = vtanh.f32 %v398_v55  ;;  %v495_v7 = vrot.slane %v398_v55, 6 }
 0x383   :  { %v3850_v56 = vpop.eup %3849 }
 0x384   :  { %401 = vrot.lane.b32.xlu0 %v3850_v56, %s4035_s0 }
 0x3f6   :  { %v402_v57 = vpop.permute.xlu0 %401 }
 0x3f7   :  { %v404_v58 = vmul.f32 %v3848_v50, %v402_v57 }
 0x3f9   :  { %409 = vrot.lane.b32.xlu1 %v404_v58, %s4036_s1 }
 0x46b   :  { %v4212_v59 = vpop.permute.xlu1 %409 }
 0x46c   :  { %3680 = vmatmul.mubr.msk.f32.vlgmr.msra.gmra.mrb[2].mxu1 %vm203_vm5, %v4212_v59 }
 0x46d   :  { %3791 = vmatpush3.bf16.msra.mxu1 %v4173_v23  ;;  %3701 = vmatprep.mubr.msk.f32.mxu1 %vm4034_vm4, %v4033_v17 }
 0x46e   :  { %3792 = vmatprep.subr.bf16.mxu1 %v4032_v13 }
 0x471   :  { %3794 = vmatpush3.bf16.msra.mxu1 %v4177_v26 }
 0x472   :  { %3801 = vmatprep.subr.bf16.mxu1 %v4032_v13 }
 0x53f   :  { %v479_v60 = vpop.f32.mrb[2].mxu1 }
 0x540   :  { %v484_v61 = vrot.slane %v479_v60, 6  ;;  %v3681_v62 = vpop.f32.mrb[3].mxu1 }
 0x542   :  { %v486_v63 = vadd.f32 %v484_v61, %v4201_v42 }
 0x544   :  { %3851 = vtanh.f32 %v486_v63  ;;  %v3565_v1 = vmul.f32 -1.442695, %v486_v63 }
 0x546   :  { %3853 = vpow2.f32 %v3565_v1 }
 0x54e   :  { %v3852_v0 = vpop.eup %3851 }
 0x54f   :  { %499 = vrot.lane.b32.xlu0 %v3852_v0, %s4035_s0 }
 0x550   :  { %v3854_v2 = vpop.eup %3853 }
 0x551   :  { %v490_v3 = vadd.f32 1.0, %v3854_v2 }
 0x553   :  { %3855 = vrcp.f32 %v490_v3 }
 0x55d   :  { %v3856_v4 = vpop.eup %3855 }
 0x55e   :  { %v497_v8 = vmul.f32 %v3856_v4, %v495_v7 }
 0x5c1   :  { %v500_v5 = vpop.permute.xlu0 %499 }
 0x5c2   :  { %v502_v6 = vmul.f32 %v3856_v4, %v500_v5 }
 0x5c4   :  { %504 = vrot.lane.b32.xlu1 %v502_v6, %s4036_s1 }
 0x636   :  { %v505_v9 = vpop.permute.xlu1 %504 }
 0x637   :  { %v507_v10 = vadd.f32 %v505_v9, %v497_v8 }
 0x639   :  { %3857 = vtanh.f32 %v507_v10  ;;  %v602_v33 = vrot.slane %v507_v10, 6 }
 0x643   :  { %v3858_v11 = vpop.eup %3857 }
 0x644   :  { %510 = vrot.lane.b32.xlu0 %v3858_v11, %s4035_s0 }
 0x6b6   :  { %v511_v12 = vpop.permute.xlu0 %510 }
 0x6b7   :  { %v513_v16 = vmul.f32 %v3856_v4, %v511_v12 }
 0x6b9   :  { %v515_v18 = vrot.slane %v513_v16, 2 }
 0x6bb   :  { %516 = vrot.lane.b32.xlu1 %v515_v18, %s4036_s1 }
 0x72d   :  { %v4227_v19 = vpop.permute.xlu1 %516 }
 0x72e   :  { %3691 = vmatmul.mubr.msk.f32.vlgmr.msra.gmra.mrb[4].mxu0 %vm203_vm5, %v4227_v19 }
 0x72f   :  { %3797 = vmatpush3.bf16.msra.mxu0 %v4173_v23  ;;  %3712 = vmatprep.mubr.msk.f32.mxu0 %vm4034_vm4, %v4033_v17 }
 0x730   :  { %3798 = vmatprep.subr.bf16.mxu0 %v4032_v13 }
 0x733   :  { %3800 = vmatpush3.bf16.msra.mxu0 %v4177_v26 }
 0x734   :  { %3807 = vmatprep.subr.bf16.mxu0 %v4032_v13 }
 0x801   :  { %v586_v20 = vpop.f32.mrb[4].mxu0 }
 0x802   :  { %v591_v21 = vrot.slane %v586_v20, 4  ;;  %v3692_v22 = vpop.f32.mrb[5].mxu0 }
 0x804   :  { %v593_v24 = vadd.f32 %v591_v21, %v4199_v41 }
 0x806   :  { %3859 = vtanh.f32 %v593_v24  ;;  %v3567_v27 = vmul.f32 -1.442695, %v593_v24 }
 0x808   :  { %3861 = vpow2.f32 %v3567_v27 }
 0x810   :  { %v3860_v25 = vpop.eup %3859 }
 0x811   :  { %606 = vrot.lane.b32.xlu0 %v3860_v25, %s4035_s0 }
 0x812   :  { %v3862_v28 = vpop.eup %3861 }
 0x813   :  { %v597_v29 = vadd.f32 1.0, %v3862_v28 }
 0x815   :  { %3863 = vrcp.f32 %v597_v29 }
 0x81f   :  { %v3864_v30 = vpop.eup %3863 }
 0x820   :  { %v604_v34 = vmul.f32 %v3864_v30, %v602_v33 }
 0x883   :  { %v607_v31 = vpop.permute.xlu0 %606 }
 0x884   :  { %v609_v32 = vmul.f32 %v3864_v30, %v607_v31 }
 0x886   :  { %611 = vrot.lane.b32.xlu1 %v609_v32, %s4036_s1 }
 0x8f8   :  { %v612_v35 = vpop.permute.xlu1 %611 }
 0x8f9   :  { %v614_v36 = vadd.f32 %v612_v35, %v604_v34 }
 0x8fb   :  { %3865 = vtanh.f32 %v614_v36  ;;  %v709_v56 = vrot.slane %v614_v36, 6 }
 0x905   :  { %v3866_v37 = vpop.eup %3865 }
 0x906   :  { %617 = vrot.lane.b32.xlu0 %v3866_v37, %s4035_s0 }
 0x978   :  { %v618_v38 = vpop.permute.xlu0 %617 }
 0x979   :  { %v620_v39 = vmul.f32 %v3864_v30, %v618_v38 }
 0x97b   :  { %v622_v40 = vrot.slane %v620_v39, 4 }
 0x97d   :  { %623 = vrot.lane.b32.xlu1 %v622_v40, %s4036_s1 }
 0x9ef   :  { %v4242_v41 = vpop.permute.xlu1 %623 }
 0x9f0   :  { %3702 = vmatmul.mubr.msk.f32.vlgmr.msra.gmra.mrb[4].mxu1 %vm203_vm5, %v4242_v41 }
 0x9f1   :  { %3803 = vmatpush3.bf16.msra.mxu1 %v4173_v23  ;;  %3723 = vmatprep.mubr.msk.f32.mxu1 %vm4034_vm4, %v4033_v17 }
 0x9f2   :  { %3804 = vmatprep.subr.bf16.mxu1 %v4032_v13 }
 0x9f5   :  { %3806 = vmatpush3.bf16.msra.mxu1 %v4177_v26 }
 0x9f6   :  { %3813 = vmatprep.subr.bf16.mxu1 %v4032_v13 }
 0xac3   :  { %v693_v43 = vpop.f32.mrb[4].mxu1 }
 0xac4   :  { %v698_v46 = vrot.slane %v693_v43, 2  ;;  %v3703_v47 = vpop.f32.mrb[5].mxu1 }
 0xac6   :  { %v700_v48 = vadd.f32 %v698_v46, %v4201_v42 }
 0xac8   :  { %3867 = vtanh.f32 %v700_v48  ;;  %v3569_v50 = vmul.f32 -1.442695, %v700_v48 }
 0xaca   :  { %3869 = vpow2.f32 %v3569_v50 }
 0xad2   :  { %v3868_v49 = vpop.eup %3867 }
 0xad3   :  { %713 = vrot.lane.b32.xlu0 %v3868_v49, %s4035_s0 }
 0xad4   :  { %v3870_v51 = vpop.eup %3869 }
 0xad5   :  { %v704_v52 = vadd.f32 1.0, %v3870_v51 }
 0xad7   :  { %3871 = vrcp.f32 %v704_v52 }
 0xae1   :  { %v3872_v53 = vpop.eup %3871 }
 0xae2   :  { %v711_v57 = vmul.f32 %v3872_v53, %v709_v56 }
 0xb45   :  { %v714_v54 = vpop.permute.xlu0 %713 }
 0xb46   :  { %v716_v55 = vmul.f32 %v3872_v53, %v714_v54 }
 0xb48   :  { %718 = vrot.lane.b32.xlu1 %v716_v55, %s4036_s1 }
 0xbba   :  { %v719_v58 = vpop.permute.xlu1 %718 }
 0xbbb   :  { %v721_v60 = vadd.f32 %v719_v58, %v711_v57 }
 0xbbd   :  { %3873 = vtanh.f32 %v721_v60  ;;  %v817_v11 = vrot.slane %v721_v60, 6 }
 0xbc7   :  { %v3874_v42 = vpop.eup %3873 }
 0xbc8   :  { %724 = vrot.lane.b32.xlu0 %v3874_v42, %s4035_s0 }
 0xc3a   :  { %v725_v61 = vpop.permute.xlu0 %724 }
 0xc3b   :  { %v727_v62 = vmul.f32 %v3872_v53, %v725_v61 }
 0xc3d   :  { %v733_v63 = vrot.slane %v727_v62, 6 }
 0xc3f   :  { %734 = vrot.lane.b32.xlu1 %v733_v63, %s4036_s1 }
 0xcb1   :  { %v4257_v0 = vpop.permute.xlu1 %734 }
 0xcb2   :  { %3713 = vmatmul.mubr.msk.f32.vlgmr.msra.gmra.mrb[6].mxu0 %vm203_vm5, %v4257_v0 }
 0xcb3   :  { %3809 = vmatpush3.bf16.msra.mxu0 %v4173_v23  ;;  %3734 = vmatprep.mubr.msk.f32.mxu0 %vm4034_vm4, %v4033_v17 }
 0xcb4   :  { %3810 = vmatprep.subr.bf16.mxu0 %v4032_v13 }
 0xcb7   :  { %3812 = vmatpush3.bf16.msra.mxu0 %v4177_v26 }
 0xd85   :  { %v804_v1 = vpop.f32.mrb[6].mxu0 }
 0xd86   :  { %v808_v2 = vadd.f32 %v804_v1, %v4204_v44  ;;  %v3714_v3 = vpop.f32.mrb[7].mxu0 }
 0xd88   :  { %3875 = vtanh.f32 %v808_v2  ;;  %v3571_v5 = vmul.f32 -1.442695, %v808_v2 }
 0xd8a   :  { %3877 = vpow2.f32 %v3571_v5 }
 0xd92   :  { %v3876_v4 = vpop.eup %3875 }
 0xd93   :  { %821 = vrot.lane.b32.xlu0 %v3876_v4, %s4035_s0 }
 0xd94   :  { %v3878_v6 = vpop.eup %3877 }
 0xd95   :  { %v812_v7 = vadd.f32 1.0, %v3878_v6 }
 0xd97   :  { %3879 = vrcp.f32 %v812_v7 }
 0xda1   :  { %v3880_v8 = vpop.eup %3879 }
 0xda2   :  { %v819_v12 = vmul.f32 %v3880_v8, %v817_v11 }
 0xe05   :  { %v822_v9 = vpop.permute.xlu0 %821 }
 0xe06   :  { %v824_v10 = vmul.f32 %v3880_v8, %v822_v9 }
 0xe08   :  { %826 = vrot.lane.b32.xlu1 %v824_v10, %s4036_s1 }
 0xe7a   :  { %v827_v16 = vpop.permute.xlu1 %826 }
 0xe7b   :  { %v829_v18 = vadd.f32 %v827_v16, %v819_v12 }
 0xe7d   :  { %3881 = vtanh.f32 %v829_v18 }
 0xe87   :  { %v3882_v20 = vpop.eup %3881 }
 0xe88   :  { %832 = vrot.lane.b32.xlu0 %v3882_v20, %s4035_s0 }
 0xefa   :  { %v833_v21 = vpop.permute.xlu0 %832 }
 0xefb   :  { %v835_v22 = vmul.f32 %v3880_v8, %v833_v21 }
 0xefd   :  { %840 = vrot.lane.b32.xlu1 %v835_v22, %s4036_s1  ;;  %v1207_v22 = vld [vmem:[%s5395_s5 + $0x8] sm:$0xff] }
 0xf6f   :  { %v4271_v24 = vpop.permute.xlu1 %840 }
 0xf70   :  { %3724 = vmatmul.mubr.msk.f32.vlgmr.msra.gmra.mrb[6].mxu1 %vm203_vm5, %v4271_v24 }
 0xf71   :  { %3815 = vmatpush3.bf16.msra.mxu1 %v4173_v23  ;;  %3745 = vmatprep.mubr.msk.f32.mxu1 %vm4034_vm4, %v4033_v17 }
 0xf72   :  { %3816 = vmatprep.subr.bf16.mxu1 %v4032_v13  ;;  %v926_v13 = vrot.slane %v829_v18, 6 }
 0xf75   :  { %3818 = vmatpush3.bf16.msra.mxu1 %v4177_v26 }
0x1043   :  { %v910_v25 = vpop.f32.mrb[6].mxu1 }
0x1044   :  { %v915_v27 = vrot.slane %v910_v25, 6  ;;  %v3725_v28 = vpop.f32.mrb[7].mxu1 }
0x1045   :  { %v1208_v28 = vld [vmem:[%s5395_s5 + $0x10] sm:$0xff] }
0x1046   :  { %v917_v29 = vadd.f32 %v915_v27, %v4206_v45 }
0x1048   :  { %3883 = vtanh.f32 %v917_v29  ;;  %v3573_v31 = vmul.f32 -1.442695, %v917_v29  ;;  %v1209_v29 = vld [vmem:[%s5395_s5 + $0x18] sm:$0xff] }
0x104a   :  { %3885 = vpow2.f32 %v3573_v31  ;;  %v4312_v31 = vshrl.u32 %v89_v14, 7 }
0x1052   :  { %v3884_v30 = vpop.eup %3883 }
0x1053   :  { %930 = vrot.lane.b32.xlu0 %v3884_v30, %s4035_s0  ;;  %v3823_v30 = vpack.c.bf16 %v1209_v29, %v1208_v28 }
0x1054   :  { %v3886_v32 = vpop.eup %3885 }
0x1055   :  { %v921_v23 = vadd.f32 1.0, %v3886_v32  ;;  %v4317_v32 = vld [vmem:[%s5397_s7] sm:$0x1f] }
0x1057   :  { %3887 = vrcp.f32 %v921_v23  ;;  %v4320_v23 = vsub.s32 0, %v4312_v31 }
0x1061   :  { %v3888_v33 = vpop.eup %3887 }
0x1062   :  { %v928_v26 = vmul.f32 %v3888_v33, %v926_v13 }
0x10c5   :  { %v931_v17 = vpop.permute.xlu0 %930 }
0x10c6   :  { %v933_v34 = vmul.f32 %v3888_v33, %v931_v17 }
0x10c8   :  { %935 = vrot.lane.b32.xlu1 %v933_v34, %s4036_s1 }
0x113a   :  { %v936_v35 = vpop.permute.xlu1 %935 }
0x113b   :  { %v938_v36 = vadd.f32 %v936_v35, %v928_v26 }
0x113d   :  { %3889 = vtanh.f32 %v938_v36  ;;  %v1033_v57 = vrot.slane %v938_v36, 6 }
0x1147   :  { %v3890_v37 = vpop.eup %3889 }
0x1148   :  { %941 = vrot.lane.b32.xlu0 %v3890_v37, %s4035_s0 }
0x11ba   :  { %v942_v38 = vpop.permute.xlu0 %941 }
0x11bb   :  { %v944_v39 = vmul.f32 %v3888_v33, %v942_v38  ;;  %v1406_v33 = vrot.slane %v4317_v32, %v4320_v23  ;;  %v1174_v38 = vsel %vm298_vm7, %v4257_v0, %v4271_v24 }
0x11bd   :  { %v946_v40 = vrot.slane %v944_v39, 2 }
0x11bf   :  { %947 = vrot.lane.b32.xlu1 %v946_v40, %s4036_s1  ;;  %v1175_v40 = vsel %vm298_vm7, %v4271_v24, %v4257_v0  ;;  %v4341_v0 = vsub.s32 2, %v4312_v31  ;;  %v4344_v24 = vsub.s32 1, %v4312_v31 }
0x1231   :  { %v4285_v43 = vpop.permute.xlu1 %947 }
0x1232   :  { %3735 = vmatmul.mubr.msk.f32.vlgmr.msra.gmra.mrb[8].mxu0 %vm203_vm5, %v4285_v43  ;;  %v1176_v14 = vsel %vm298_vm7, %v4285_v43, %v4242_v41  ;;  %v1171_v36 = vsel %vm298_vm7, %v4242_v41, %v4285_v43 }
0x1233   :  { %v1189_v37 = vrot.slane %v1176_v14, 6 }
0x1305   :  { %v1017_v46 = vpop.f32.mrb[8].mxu0 }
0x1306   :  { %v1022_v47 = vrot.slane %v1017_v46, 4  ;;  %v3736_v48 = vpop.f32.mrb[9].mxu0 }
0x1307   :  { %v1183_v48 = vrot.slane %v1171_v36, 4 }
0x1308   :  { %v1024_v49 = vadd.f32 %v1022_v47, %v4204_v44 }
0x130a   :  { %3891 = vtanh.f32 %v1024_v49  ;;  %v3575_v51 = vmul.f32 -1.442695, %v1024_v49 }
0x130c   :  { %3893 = vpow2.f32 %v3575_v51  ;;  %v1203_v51 = vsel %vm1197_vm8, %v1175_v40, %v1189_v37 }
0x1314   :  { %v3892_v50 = vpop.eup %3891 }
0x1315   :  { %1037 = vrot.lane.b32.xlu0 %v3892_v50, %s4035_s0  ;;  %v1186_v50 = vrot.slane %v1174_v38, 2 }
0x1316   :  { %v3894_v52 = vpop.eup %3893 }
0x1317   :  { %v1028_v53 = vadd.f32 1.0, %v3894_v52 }
0x1319   :  { %3895 = vrcp.f32 %v1028_v53 }
0x1323   :  { %v3896_v54 = vpop.eup %3895 }
0x1324   :  { %v1035_v58 = vmul.f32 %v3896_v54, %v1033_v57  ;;  %v3578_v57 = vld [vmem:[#allocation8] ss:$0 sm:$0xff] }
0x1387   :  { %v1038_v55 = vpop.permute.xlu0 %1037 }
0x1388   :  { %v1040_v56 = vmul.f32 %v3896_v54, %v1038_v55 }
0x138a   :  { %1042 = vrot.lane.b32.xlu1 %v1040_v56, %s4036_s1  ;;  %v1413_v56 = vrot.slane %v4317_v32, %v4344_v24 }
0x13fc   :  { %v1043_v60 = vpop.permute.xlu1 %1042 }
0x13fd   :  { %v1045_v42 = vadd.f32 %v1043_v60, %v1035_v58  ;;  %v4351_v60 = vsub.s32 3, %v4312_v31 }
0x13ff   :  { %3897 = vtanh.f32 %v1045_v42  ;;  %v1140_v16 = vrot.slane %v1045_v42, 6 }
0x1409   :  { %v3898_v44 = vpop.eup %3897 }
0x140a   :  { %1048 = vrot.lane.b32.xlu0 %v3898_v44, %s4035_s0 }
0x147c   :  { %v1049_v61 = vpop.permute.xlu0 %1048 }
0x147d   :  { %v1051_v62 = vmul.f32 %v3896_v54, %v1049_v61  ;;  %v1745_v61 = vsub.s32 5, %v4312_v31 }
0x147f   :  { %v1053_v63 = vrot.slane %v1051_v62, 4 }
0x1481   :  { %1054 = vrot.lane.b32.xlu1 %v1053_v63, %s4036_s1  ;;  %v2049_v63 = vsub.s32 7, %v4312_v31 }
0x14f3   :  { %v1055_v1 = vpop.permute.xlu1 %1054 }
0x14f4   :  { %3746 = vmatmul.mubr.msk.f32.vlgmr.msra.gmra.mrb[8].mxu1 %vm203_vm5, %v1055_v1  ;;  %v1177_v26 = vsel %vm298_vm7, %v1055_v1, %v4227_v19  ;;  %v1168_v35 = vsel %vm298_vm7, %v4227_v19, %v1055_v1  ;;  %v5401_v1 = vsub.s32 6, %v4312_v31 }
0x14f5   :  { %v1192_v39 = vrot.slane %v1177_v26, 4  ;;  %v1180_v46 = vrot.slane %v1168_v35, 6 }
0x14f7   :  { %v1204_v53 = vsel %vm1199_vm9, %v1203_v51, %v1192_v39 }
0x15c7   :  { %v1124_v2 = vpop.f32.mrb[8].mxu1 }
0x15c8   :  { %v1129_v3 = vrot.slane %v1124_v2, 2  ;;  %v3747_v4 = vpop.f32.mrb[9].mxu1 }
0x15ca   :  { %v1131_v5 = vadd.f32 %v1129_v3, %v4206_v45  ;;  %v1206_v45 = vld [vmem:[%s5395_s5] sm:$0xff] }
0x15cb   :  { %v3819_v25 = vpack.c.bf16 %v1207_v22, %v1206_v45 }
0x15cc   :  { %3899 = vtanh.f32 %v1131_v5  ;;  %v3577_v7 = vmul.f32 -1.442695, %v1131_v5 }
0x15cd   :  { %3820 = vmatprep.subr.bf16.mxu0 %v3819_v25 }
0x15ce   :  { %3901 = vpow2.f32 %v3577_v7  ;;  %3822 = vmatpush3.bf16.msra.mxu0 %v3819_v25  ;;  %v4037_v7 = vmov 1966171168  }
0x15cf   :  { %3824 = vmatprep.subr.bf16.mxu0 %v3823_v30 }
0x15d2   :  { %3826 = vmatpush3.bf16.msra.mxu0 %v3823_v30  ;;  %v4397_v30 = vsub.s32 4, %v4312_v31 }
0x15d6   :  { %v3900_v6 = vpop.eup %3899 }
0x15d7   :  { %1144 = vrot.lane.b32.xlu0 %v3900_v6, %s4035_s0 }
0x15d8   :  { %v3902_v8 = vpop.eup %3901 }
0x15d9   :  { %v1135_v9 = vadd.f32 1.0, %v3902_v8  ;;  %v1309_v8 = vunpack.c.l.s4 %v4037_v7 }
0x15db   :  { %3903 = vrcp.f32 %v1135_v9  ;;  %v1310_v9 = vunpack.c.0.s8 %v1309_v8 }
0x15e5   :  { %v3904_v10 = vpop.eup %3903 }
0x15e6   :  { %v1142_v18 = vmul.f32 %v3904_v10, %v1140_v16 }
0x1649   :  { %v1145_v11 = vpop.permute.xlu0 %1144 }
0x164a   :  { %v1147_v12 = vmul.f32 %v3904_v10, %v1145_v11 }
0x164c   :  { %1149 = vrot.lane.b32.xlu1 %v1147_v12, %s4036_s1  ;;  %v1313_v12 = vsub.s32 %v1310_v9, %v4312_v31 }
0x16be   :  { %v1150_v20 = vpop.permute.xlu1 %1149 }
0x16bf   :  { %v1152_v21 = vadd.f32 %v1150_v20, %v1142_v18 }
0x16c1   :  { %3905 = vtanh.f32 %v1152_v21 }
0x16cb   :  { %v3906_v27 = vpop.eup %3905 }
0x16cc   :  { %1155 = vrot.lane.b32.xlu0 %v3906_v27, %s4035_s0 }
0x16d0   :  { %1408 = vbcast.lane.b32.xlu0 %v1406_v33, 256  ;;  %v1434_v33 = vrot.slane %v4317_v32, %v4397_v30 }
0x173e   :  { %v1156_v17 = vpop.permute.xlu0 %1155 }
0x173f   :  { %v1158_v34 = vmul.f32 %v3904_v10, %v1156_v17  ;;  %v3581_v10 = vld [vmem:[%s5398_s8] ss:$0 sm:$0xff]  ;;  %v1427_v17 = vrot.slane %v4317_v32, %v4351_v60 }
0x1741   :  { %v1161_v13 = vrot.slane %v1158_v34, 6 }
0x1742   :  { %v4403_v34 = vpop.permute.xlu0 %1408 }
0x1743   :  { %1162 = vrot.lane.b32.xlu1 %v1161_v13, %s4036_s1 }
0x1747   :  { %1415 = vbcast.lane.b32.xlu1 %v1413_v56, 256  ;;  %v4461_v56 = vsub.s32 %v4167_v15, %v4312_v31 }
0x17b5   :  { %v1163_v47 = vpop.permute.xlu1 %1162 }
0x17b6   :  { %v1165_v49 = vsel %vm298_vm7, %v4212_v59, %v1163_v47  ;;  %v1178_v19 = vsel %vm298_vm7, %v1163_v47, %v4212_v59  ;;  %v1420_v59 = vrot.slane %v4317_v32, %v4341_v0 }
0x17b7   :  { %v1195_v41 = vrot.slane %v1178_v19, 2  ;;  %v1198_v43 = vsel %vm1197_vm8, %v1165_v49, %v1180_v46 }
0x17b8   :  { %v1200_v52 = vsel %vm1199_vm9, %v1198_v43, %v1183_v48  ;;  %1422 = vbcast.lane.b32.xlu0 %v1420_v59, 256 }
0x17b9   :  { %v1202_v54 = vsel %vm1201_vm10, %v1200_v52, %v1186_v50  ;;  %v1205_v55 = vsel %vm1201_vm10, %v1204_v53, %v1195_v41  ;;  %v4407_v14 = vpop.permute.xlu1 %1415 }
0x17ba   :  { %3756 = vmatprep.mubr.msk.f32.mxu0 %vm203_vm5, %v1202_v54 }
0x17bb   :  { %3757 = vmatmul.mubr.msk.f32.vlgmr.msra.gmra.mrb[10].mxu0 %vm203_vm5, %v1205_v55 }
0x182a   :  { %v4405_v13 = vpop.permute.xlu0 %1422 }
0x188e   :  { %v3758_v58 = vpop.f32.mrb[10].mxu0 }
0x188f   :  { %v4353_v42 = vadd.f32 %v3758_v58, %v3578_v57  ;;  %v1289_v44 = vpop.f32.mrb[11].mxu0 }
0x1890   :  { %v4356_v62 = vadd.f32 %v3578_v57, %v1289_v44 }
0x1891   :  { %v4367_v4 = vrot.slane %v4353_v42, %v1745_v61  ;;  %v4372_v5 = vrot.slane %v4353_v42, %v2049_v63  ;;  %v4377_v6 = vrot.slane %v4353_v42, %v5401_v1 }
0x1892   :  { %v1394_v2 = vrot.slane %v4356_v62, %v4351_v60  ;;  %v1387_v3 = vrot.slane %v4356_v62, %v4341_v0  ;;  %v1306_v11 = vadd.f32 %v3581_v10, %v4356_v62 }
0x1894   :  { %1396 = vbcast.lane.b32.xlu1 %v1394_v2, 256  ;;  %1389 = vbcast.lane.b32.xlu0 %v1387_v3, 256  ;;  %v1314_v16 = vrot.slane %v1306_v11, %v1313_v12 }
0x1896   :  { %v1322_v18 = vrot.slane %v1314_v16, %v1313_v12  ;;  %v1315_v20 = vcombine.high %v1314_v16, %v1314_v16 }
0x1898   :  { %v1333_v21 = vrot.slane %v1322_v18, %v4320_v23  ;;  %v1329_v45 = vrot.slane %v1315_v20, %v1313_v12 }
0x189a   :  { %v4386_v22 = vadd.f32 %v1333_v21, %v4317_v32  ;;  %v1337_v25 = vrot.slane %v1329_v45, %v4320_v23 }
0x189c   :  { %5445 = vst [vmem:[#allocation15_spill] sm:$0xff] %v4386_v22  ;;  %v1343_v27 = vsel %vm1342_vm11, %v4386_v22, -inf  ;;  %v4392_v28 = vadd.f32 %v1337_v25, %v4317_v32 }
0x189e   :  { %5446 = vst [vmem:[#allocation16_spill] sm:$0xff] %v4392_v28  ;;  %v1346_v29 = vsel %vm1342_vm11, %v4392_v28, -inf }
0x18b3   :  { %1344 = vmax.xlane.f32.xlu0 %v1343_v27 }
0x18b8   :  { %1347 = vmax.xlane.f32.xlu1 %v1346_v29 }
0x18c9   :  { %1436 = vbcast.lane.b32.xlu0 %v1434_v33, 256  ;;  %1429 = vbcast.lane.b32.xlu1 %v1427_v17, 256 }
0x1906   :  { %v1390_v26 = vpop.permute.xlu0 %1389  ;;  %v1397_v36 = vpop.permute.xlu1 %1396 }
0x1940   :  { %v4409_v35 = vpop.xlane.xlu0 %1344 }
0x1941   :  { %5447 = vst [vmem:[#allocation17_spill] sm:$0xff] %v4409_v35  ;;  %v1400_v37 = vadd.f32 %v1390_v26, %v4409_v35 }
0x1943   :  { %v4413_v38 = vadd.f32 %v4407_v14, %v1400_v37  ;;  %v4416_v39 = vadd.f32 %v4403_v34, %v1400_v37  ;;  %v4424_v46 = vadd.f32 %v4405_v13, %v1400_v37 }
0x1944   :  { %v4444_v41 = vpop.permute.xlu0 %1436 }
0x1945   :  { %5448 = vst [vmem:[#allocation18_spill] sm:$0xff] %v4413_v38  ;;  %5449 = vst [vmem:[#allocation19_spill] sm:$0xff] %v4416_v39  ;;  %v4418_v32 = vpop.xlane.xlu1 %1347  ;;  %1467 = vperm.xlu0 %3841, %v4413_v38   ;;  %1464 = vperm.xlu1 %3842, %v4416_v39   ;;  %v4452_v51 = vadd.f32 %v4444_v41, %v1400_v37 }
0x1946   :  { %5450 = vst [vmem:[#allocation20_spill] sm:$0xff] %v4418_v32  ;;  %v1401_v40 = vadd.f32 %v1397_v36, %v4418_v32  ;;  %5451 = vst [vmem:[#allocation21_spill] sm:$0xff] %v4424_v46 }
0x1947   :  { %5457 = vst [vmem:[#allocation27_spill] sm:$0xff] %v4452_v51 }
0x1948   :  { %v4427_v47 = vadd.f32 %v4407_v14, %v1401_v40  ;;  %v4437_v19 = vadd.f32 %v4405_v13, %v1401_v40  ;;  %v4442_v50 = vadd.f32 %v4403_v34, %v1401_v40  ;;  %v4455_v52 = vadd.f32 %v4444_v41, %v1401_v40 }
0x1949   :  { %v4429_v48 = vpop.permute.xlu1 %1429  ;;  %1470 = vperm.xlu1 %3842, %v4424_v46  }
0x194a   :  { %5452 = vst [vmem:[#allocation22_spill] sm:$0xff] %v4427_v47  ;;  %1482 = vperm.xlu0 %3841, %v4427_v47   ;;  %v4434_v49 = vadd.f32 %v4429_v48, %v1400_v37  ;;  %5454 = vst [vmem:[#allocation24_spill] sm:$0xff] %v4437_v19  ;;  %v4447_v43 = vadd.f32 %v4429_v48, %v1401_v40 }
0x194b   :  { %5455 = vst [vmem:[#allocation25_spill] sm:$0xff] %v4442_v50  ;;  %5458 = vst [vmem:[#allocation28_spill] sm:$0xff] %v4455_v52 }
0x194c   :  { %5453 = vst [vmem:[#allocation23_spill] sm:$0xff] %v4434_v49  ;;  %5456 = vst [vmem:[#allocation26_spill] sm:$0xff] %v4447_v43 }
0x194d   :  { %1473 = vperm.xlu1 %3842, %v4434_v49  }
0x194e   :  { %1485 = vperm.xlu0 %3841, %v4437_v19  }
0x1951   :  { %1479 = vperm.xlu1 %3842, %v4442_v50  }
0x1952   :  { %1488 = vperm.xlu0 %3841, %v4447_v43  }
0x1955   :  { %1476 = vperm.xlu1 %3842, %v4452_v51  }
0x1956   :  { %1491 = vperm.xlu0 %3841, %v4455_v52  }
0x19c4   :  { %v1465_v53 = vpop.permute.xlu1 %1464  ;;  %v1468_v54 = vpop.permute.xlu0 %1467 }
0x19c5   :  { %v1496_v44 = vrot.slane %v1465_v53, %v4461_v56  ;;  %v1500_v2 = vrot.slane %v1468_v54, %v4461_v56  ;;  %v1746_v54 = vrot.slane %v4356_v62, %v1745_v61 }
0x19c7   :  { %v1534_v20 = vsel %vm1533_vm12, %v1500_v2, %v1496_v44 }
0x19c8   :  { %v1471_v55 = vpop.permute.xlu1 %1470 }
0x19c9   :  { %v1483_v59 = vpop.permute.xlu0 %1482  ;;  %v1504_v7 = vrot.slane %v1471_v55, %v4461_v56  ;;  %v1739_v55 = vrot.slane %v4356_v62, %v4397_v30 }
0x19ca   :  { %v1520_v8 = vrot.slane %v1483_v59, %v4461_v56 }
0x19cb   :  { %v1536_v29 = vsel %vm1535_vm13, %v1504_v7, %v1534_v20 }
0x19cc   :  { %v1474_v57 = vpop.permute.xlu1 %1473 }
0x19cd   :  { %v1486_v58 = vpop.permute.xlu0 %1485  ;;  %v1508_v11 = vrot.slane %v1474_v57, %v4461_v56 }
0x19ce   :  { %v1524_v12 = vrot.slane %v1486_v58, %v4461_v56 }
0x19cf   :  { %v1538_v17 = vsel %vm1537_vm14, %v1508_v11, %v1536_v29 }
0x19d0   :  { %v1480_v3 = vpop.permute.xlu1 %1479 }
0x19d1   :  { %v1516_v9 = vrot.slane %v1480_v3, %v4461_v56  ;;  %v1489_v10 = vpop.permute.xlu0 %1488 }
0x19d2   :  { %v1528_v18 = vrot.slane %v1489_v10, %v4461_v56 }
0x19d3   :  { %v1541_v16 = vsel %vm1533_vm12, %v1520_v8, %v1516_v9 }
0x19d4   :  { %v1477_v21 = vpop.permute.xlu1 %1476  ;;  %v1542_v45 = vsel %vm1535_vm13, %v1524_v12, %v1541_v16 }
0x19d5   :  { %v1512_v25 = vrot.slane %v1477_v21, %v4461_v56  ;;  %v1492_v27 = vpop.permute.xlu0 %1491  ;;  %v1543_v36 = vsel %vm1537_vm14, %v1528_v18, %v1542_v45 }
0x19d6   :  { %v1532_v33 = vrot.slane %v1492_v27, %v4461_v56 }
0x19d7   :  { %v1540_v26 = vsel %vm1539_vm15, %v1512_v25, %v1538_v17 }
0x19d8   :  { %v1547_v37 = vsel %vm1342_vm11, %v1540_v26, -inf  ;;  %v1544_v40 = vsel %vm1539_vm15, %v1532_v33, %v1543_v36 }
0x19d9   :  { %1548 = vmax.xlane.f32.xlu1 %v1547_v37  ;;  %v1550_v53 = vsel %vm1342_vm11, %v1544_v40, -inf }
0x19da   :  { %1551 = vmax.xlane.f32.xlu0 %v1550_v53 }
0x19ea   :  { %1748 = vbcast.lane.b32.xlu1 %v1746_v54, 256 }
0x19f0   :  { %1741 = vbcast.lane.b32.xlu0 %v1739_v55, 256 }
0x1a66   :  { %v4488_v59 = vpop.xlane.xlu1 %1548 }
0x1a67   :  { %5459 = vst [vmem:[#allocation29_spill] sm:$0xff] %v4488_v59  ;;  %v4490_v57 = vpop.xlane.xlu0 %1551 }
0x1a68   :  { %5460 = vst [vmem:[#allocation30_spill] sm:$0xff] %v4490_v57 }
0x1a6a   :  { %v1749_v58 = vpop.permute.xlu1 %1748 }
0x1a6b   :  { %v1742_v44 = vpop.permute.xlu0 %1741  ;;  %v1753_v3 = vadd.f32 %v1749_v58, %v4490_v57 }
0x1a6c   :  { %v1752_v2 = vadd.f32 %v1742_v44, %v4488_v59 }
0x1a6d   :  { %v4503_v8 = vadd.f32 %v1753_v3, %v4407_v14  ;;  %v4511_v10 = vadd.f32 %v1753_v3, %v4405_v13  ;;  %v4519_v12 = vadd.f32 %v1753_v3, %v4429_v48  ;;  %v4522_v16 = vadd.f32 %v1753_v3, %v4403_v34 }
0x1a6e   :  { %v4495_v7 = vadd.f32 %v1752_v2, %v4407_v14  ;;  %v4498_v61 = vadd.f32 %v1752_v2, %v4403_v34  ;;  %v4506_v9 = vadd.f32 %v1752_v2, %v4405_v13  ;;  %v4514_v11 = vadd.f32 %v1752_v2, %v4429_v48 }
0x1a6f   :  { %5463 = vst [vmem:[#allocation33_spill] sm:$0xff] %v4503_v8  ;;  %5465 = vst [vmem:[#allocation35_spill] sm:$0xff] %v4511_v10  ;;  %v4527_v18 = vadd.f32 %v1753_v3, %v4444_v41  ;;  %v4530_v20 = vadd.f32 %v1752_v2, %v4444_v41 }
0x1a70   :  { %5461 = vst [vmem:[#allocation31_spill] sm:$0xff] %v4495_v7  ;;  %5462 = vst [vmem:[#allocation32_spill] sm:$0xff] %v4498_v61  ;;  %1778 = vperm.xlu0 %3841, %v4495_v7   ;;  %1775 = vperm.xlu1 %3842, %v4498_v61  }
0x1a71   :  { %5464 = vst [vmem:[#allocation34_spill] sm:$0xff] %v4506_v9  ;;  %5466 = vst [vmem:[#allocation36_spill] sm:$0xff] %v4514_v11 }
0x1a72   :  { %5467 = vst [vmem:[#allocation37_spill] sm:$0xff] %v4519_v12  ;;  %5468 = vst [vmem:[#allocation38_spill] sm:$0xff] %v4522_v16 }
0x1a73   :  { %5469 = vst [vmem:[#allocation39_spill] sm:$0xff] %v4527_v18  ;;  %5470 = vst [vmem:[#allocation40_spill] sm:$0xff] %v4530_v20 }
0x1a74   :  { %1793 = vperm.xlu0 %3841, %v4503_v8   ;;  %1781 = vperm.xlu1 %3842, %v4506_v9  }
0x1a78   :  { %1796 = vperm.xlu0 %3841, %v4511_v10   ;;  %1784 = vperm.xlu1 %3842, %v4514_v11  }
0x1a7c   :  { %1799 = vperm.xlu0 %3841, %v4519_v12   ;;  %1790 = vperm.xlu1 %3842, %v4522_v16  }
0x1a80   :  { %1802 = vperm.xlu0 %3841, %v4527_v18   ;;  %1787 = vperm.xlu1 %3842, %v4530_v20  }
0x1aef   :  { %v1779_v21 = vpop.permute.xlu0 %1778  ;;  %v1776_v45 = vpop.permute.xlu1 %1775 }
0x1af0   :  { %v1811_v17 = vrot.slane %v1779_v21, %v4461_v56  ;;  %v1807_v26 = vrot.slane %v1776_v45, %v4461_v56 }
0x1af2   :  { %v1844_v3 = vsel %vm1533_vm12, %v1811_v17, %v1807_v26 }
0x1af3   :  { %v1794_v25 = vpop.permute.xlu0 %1793  ;;  %v1782_v27 = vpop.permute.xlu1 %1781 }
0x1af4   :  { %v1831_v40 = vrot.slane %v1794_v25, %v4461_v56  ;;  %v1815_v53 = vrot.slane %v1782_v27, %v4461_v56 }
0x1af7   :  { %v1797_v29 = vpop.permute.xlu0 %1796  ;;  %v1785_v33 = vpop.permute.xlu1 %1784 }
0x1af8   :  { %v1835_v55 = vrot.slane %v1797_v29, %v4461_v56  ;;  %v1819_v58 = vrot.slane %v1785_v33, %v4461_v56  ;;  %v1845_v29 = vsel %vm1535_vm13, %v1815_v53, %v1844_v3 }
0x1afa   :  { %v1846_v33 = vsel %vm1537_vm14, %v1819_v58, %v1845_v29 }
0x1afb   :  { %v1800_v36 = vpop.permute.xlu0 %1799  ;;  %v1791_v37 = vpop.permute.xlu1 %1790 }
0x1afc   :  { %v1827_v54 = vrot.slane %v1791_v37, %v4461_v56  ;;  %v1839_v44 = vrot.slane %v1800_v36, %v4461_v56 }
0x1afe   :  { %v1848_v2 = vsel %vm1533_vm12, %v1831_v40, %v1827_v54  ;;  %v2050_v54 = vrot.slane %v4356_v62, %v2049_v63 }
0x1aff   :  { %v1803_v21 = vpop.permute.xlu0 %1802  ;;  %v1788_v45 = vpop.permute.xlu1 %1787  ;;  %v1849_v1 = vsel %vm1535_vm13, %v1835_v55, %v1848_v2 }
0x1b00   :  { %v1843_v25 = vrot.slane %v1803_v21, %v4461_v56  ;;  %v1823_v27 = vrot.slane %v1788_v45, %v4461_v56  ;;  %v1850_v37 = vsel %vm1537_vm14, %v1839_v44, %v1849_v1  ;;  %v5471_v1 = vsub.s32 6, %v4312_v31 }
0x1b02   :  { %v1851_v36 = vsel %vm1539_vm15, %v1843_v25, %v1850_v37  ;;  %v1847_v40 = vsel %vm1539_vm15, %v1823_v27, %v1846_v33  ;;  %v2043_v53 = vrot.slane %v4356_v62, %v5471_v1 }
0x1b03   :  { %v1857_v17 = vsel %vm1342_vm11, %v1851_v36, -inf  ;;  %v1854_v26 = vsel %vm1342_vm11, %v1847_v40, -inf }
0x1b04   :  { %1858 = vmax.xlane.f32.xlu0 %v1857_v17  ;;  %1855 = vmax.xlane.f32.xlu1 %v1854_v26 }
0x1b15   :  { %2052 = vbcast.lane.b32.xlu1 %v2050_v54, 256 }
0x1b1a   :  { %2045 = vbcast.lane.b32.xlu0 %v2043_v53, 256 }
0x1b91   :  { %v4560_v55 = vpop.xlane.xlu0 %1858  ;;  %v4562_v58 = vpop.xlane.xlu1 %1855 }
0x1b92   :  { %5472 = vst [vmem:[#allocation41_spill] sm:$0xff] %v4560_v55  ;;  %5473 = vst [vmem:[#allocation42_spill] sm:$0xff] %v4562_v58 }
0x1b95   :  { %v2046_v44 = vpop.permute.xlu0 %2045  ;;  %v2053_v2 = vpop.permute.xlu1 %2052 }
0x1b96   :  { %v2056_v3 = vadd.f32 %v2046_v44, %v4562_v58  ;;  %v2057_v21 = vadd.f32 %v2053_v2, %v4560_v55 }
0x1b98   :  { %v4567_v45 = vadd.f32 %v2056_v3, %v4407_v14  ;;  %v4570_v63 = vadd.f32 %v2056_v3, %v4403_v34  ;;  %v4575_v31 = vadd.f32 %v2056_v3, %v4405_v13  ;;  %v4578_v62 = vadd.f32 %v2057_v21, %v4407_v14 }
0x1b99   :  { %v4583_v25 = vadd.f32 %v2056_v3, %v4429_v48  ;;  %v4586_v27 = vadd.f32 %v2057_v21, %v4405_v13  ;;  %v4591_v37 = vadd.f32 %v2057_v21, %v4429_v48  ;;  %v4594_v29 = vadd.f32 %v2057_v21, %v4403_v34 }
0x1b9a   :  { %5474 = vst [vmem:[#allocation43_spill] sm:$0xff] %v4567_v45  ;;  %2082 = vperm.xlu0 %3841, %v4567_v45   ;;  %2079 = vperm.xlu1 %3842, %v4570_v63   ;;  %5475 = vst [vmem:[#allocation44_spill] sm:$0xff] %v4575_v31  ;;  %v4599_v33 = vadd.f32 %v2057_v21, %v4444_v41  ;;  %v4602_v36 = vadd.f32 %v2056_v3, %v4444_v41 }
0x1b9b   :  { %5476 = vst [vmem:[#allocation45_spill] sm:$0xff] %v4578_v62  ;;  %5477 = vst [vmem:[#allocation46_spill] sm:$0xff] %v4583_v25 }
0x1b9c   :  { %5478 = vst [vmem:[#allocation47_spill] sm:$0xff] %v4586_v27  ;;  %5479 = vst [vmem:[#allocation48_spill] sm:$0xff] %v4591_v37 }
0x1b9d   :  { %5480 = vst [vmem:[#allocation49_spill] sm:$0xff] %v4594_v29  ;;  %5481 = vst [vmem:[#allocation50_spill] sm:$0xff] %v4599_v33 }
0x1b9e   :  { %2085 = vperm.xlu1 %3842, %v4575_v31   ;;  %2097 = vperm.xlu0 %3841, %v4578_v62   ;;  %5482 = vst [vmem:[#allocation51_spill] sm:$0xff] %v4602_v36 }
0x1ba2   :  { %2088 = vperm.xlu1 %3842, %v4583_v25   ;;  %2100 = vperm.xlu0 %3841, %v4586_v27  }
0x1ba6   :  { %2103 = vperm.xlu0 %3841, %v4591_v37   ;;  %2094 = vperm.xlu1 %3842, %v4594_v29  }
0x1baa   :  { %2106 = vperm.xlu0 %3841, %v4599_v33   ;;  %2091 = vperm.xlu1 %3842, %v4602_v36  }
0x1c19   :  { %v2083_v40 = vpop.permute.xlu0 %2082  ;;  %v2080_v17 = vpop.permute.xlu1 %2079 }
0x1c1a   :  { %v2115_v44 = vrot.slane %v2083_v40, %v4461_v56  ;;  %v2111_v2 = vrot.slane %v2080_v17, %v4461_v56 }
0x1c1c   :  { %v2148_v40 = vsel %vm1533_vm12, %v2115_v44, %v2111_v2 }
0x1c1d   :  { %v2098_v26 = vpop.permute.xlu0 %2097  ;;  %v2086_v54 = vpop.permute.xlu1 %2085 }
0x1c1e   :  { %v2135_v32 = vrot.slane %v2098_v26, %v4461_v56  ;;  %v2119_v3 = vrot.slane %v2086_v54, %v4461_v56 }
0x1c21   :  { %v2101_v1 = vpop.permute.xlu0 %2100  ;;  %v2089_v53 = vpop.permute.xlu1 %2088 }
0x1c22   :  { %v2139_v35 = vrot.slane %v2101_v1, %v4461_v56  ;;  %v2123_v51 = vrot.slane %v2089_v53, %v4461_v56  ;;  %v2149_v1 = vsel %vm1535_vm13, %v2119_v3, %v2148_v40 }
0x1c24   :  { %v2150_v53 = vsel %vm1537_vm14, %v2123_v51, %v2149_v1 }
0x1c25   :  { %v2104_v28 = vpop.permute.xlu0 %2103  ;;  %v2095_v21 = vpop.permute.xlu1 %2094 }
0x1c26   :  { %v2131_v22 = vrot.slane %v2095_v21, %v4461_v56  ;;  %v2143_v49 = vrot.slane %v2104_v28, %v4461_v56 }
0x1c28   :  { %v2152_v46 = vsel %vm1533_vm12, %v2135_v32, %v2131_v22 }
0x1c29   :  { %v2107_v39 = vpop.permute.xlu0 %2106  ;;  %v2092_v17 = vpop.permute.xlu1 %2091  ;;  %v2153_v20 = vsel %vm1535_vm13, %v2139_v35, %v2152_v46  ;;  %v2355_v35 = vrot.slane %v4353_v42, %v4344_v24 }
0x1c2a   :  { %v2147_v26 = vrot.slane %v2107_v39, %v4461_v56  ;;  %v2127_v54 = vrot.slane %v2092_v17, %v4461_v56  ;;  %v2154_v21 = vsel %vm1537_vm14, %v2143_v49, %v2153_v20  ;;  %v2348_v39 = vrot.slane %v4353_v42, %v4320_v23 }
0x1c2c   :  { %v2155_v28 = vsel %vm1539_vm15, %v2147_v26, %v2154_v21  ;;  %v2151_v22 = vsel %vm1539_vm15, %v2127_v54, %v2150_v53 }
0x1c2d   :  { %v2161_v32 = vsel %vm1342_vm11, %v2155_v28, -inf  ;;  %v2158_v44 = vsel %vm1342_vm11, %v2151_v22, -inf }
0x1c2e   :  { %2162 = vmax.xlane.f32.xlu0 %v2161_v32  ;;  %2159 = vmax.xlane.f32.xlu1 %v2158_v44 }
0x1c3f   :  { %2357 = vbcast.lane.b32.xlu1 %v2355_v35, 256 }
0x1c44   :  { %2350 = vbcast.lane.b32.xlu0 %v2348_v39, 256 }
0x1cbb   :  { %v4630_v46 = vpop.xlane.xlu0 %2162  ;;  %v4632_v49 = vpop.xlane.xlu1 %2159 }
0x1cbc   :  { %5483 = vst [vmem:[#allocation52_spill] sm:$0xff] %v4630_v46 }
0x1cbf   :  { %v2351_v51 = vpop.permute.xlu0 %2350  ;;  %v2358_v20 = vpop.permute.xlu1 %2357 }
0x1cc0   :  { %v2361_v2 = vadd.f32 %v2351_v51, %v4632_v49  ;;  %v2362_v3 = vadd.f32 %v2358_v20, %v4630_v46 }
0x1cc2   :  { %v4637_v40 = vadd.f32 %v2361_v2, %v4407_v14  ;;  %v4640_v17 = vadd.f32 %v2361_v2, %v4403_v34  ;;  %v4645_v26 = vadd.f32 %v2361_v2, %v4405_v13  ;;  %v4648_v54 = vadd.f32 %v2362_v3, %v4407_v14 }
0x1cc3   :  { %v4653_v21 = vadd.f32 %v2361_v2, %v4429_v48  ;;  %v4656_v1 = vadd.f32 %v2362_v3, %v4405_v13  ;;  %v4661_v53 = vadd.f32 %v2362_v3, %v4429_v48  ;;  %v4664_v28 = vadd.f32 %v2362_v3, %v4403_v34 }
0x1cc4   :  { %2387 = vperm.xlu0 %3841, %v4637_v40   ;;  %2384 = vperm.xlu1 %3842, %v4640_v17   ;;  %v4669_v22 = vadd.f32 %v2362_v3, %v4444_v41  ;;  %v4672_v32 = vadd.f32 %v2361_v2, %v4444_v41 }
0x1cc8   :  { %2390 = vperm.xlu1 %3842, %v4645_v26   ;;  %2402 = vperm.xlu0 %3841, %v4648_v54  }
0x1ccc   :  { %2393 = vperm.xlu1 %3842, %v4653_v21   ;;  %2405 = vperm.xlu0 %3841, %v4656_v1  }
0x1cd0   :  { %2408 = vperm.xlu0 %3841, %v4661_v53   ;;  %2399 = vperm.xlu1 %3842, %v4664_v28  }
0x1cd4   :  { %2411 = vperm.xlu0 %3841, %v4669_v22   ;;  %2396 = vperm.xlu1 %3842, %v4672_v32  }
0x1d43   :  { %v2388_v44 = vpop.permute.xlu0 %2387  ;;  %v2385_v35 = vpop.permute.xlu1 %2384 }
0x1d44   :  { %v2420_v43 = vrot.slane %v2388_v44, %v4461_v56  ;;  %v2416_v19 = vrot.slane %v2385_v35, %v4461_v56 }
0x1d46   :  { %v2453_v44 = vsel %vm1533_vm12, %v2420_v43, %v2416_v19 }
0x1d47   :  { %v2403_v39 = vpop.permute.xlu0 %2402  ;;  %v2391_v51 = vpop.permute.xlu1 %2390 }
0x1d48   :  { %v2440_v50 = vrot.slane %v2403_v39, %v4461_v56  ;;  %v2424_v2 = vrot.slane %v2391_v51, %v4461_v56 }
0x1d4b   :  { %v2406_v20 = vpop.permute.xlu0 %2405  ;;  %v2394_v52 = vpop.permute.xlu1 %2393 }
0x1d4c   :  { %v2444_v38 = vrot.slane %v2406_v20, %v4461_v56  ;;  %v2428_v59 = vrot.slane %v2394_v52, %v4461_v56  ;;  %v2454_v20 = vsel %vm1535_vm13, %v2424_v2, %v2453_v44 }
0x1d4e   :  { %v2455_v52 = vsel %vm1537_vm14, %v2428_v59, %v2454_v20 }
0x1d4f   :  { %v2409_v47 = vpop.permute.xlu0 %2408  ;;  %v2400_v3 = vpop.permute.xlu1 %2399 }
0x1d50   :  { %v2436_v57 = vrot.slane %v2400_v3, %v4461_v56  ;;  %v2448_v11 = vrot.slane %v2409_v47, %v4461_v56 }
0x1d52   :  { %v2457_v18 = vsel %vm1533_vm12, %v2440_v50, %v2436_v57  ;;  %v2652_v57 = vrot.slane %v4353_v42, %v4341_v0 }
0x1d53   :  { %v2412_v12 = vpop.permute.xlu0 %2411  ;;  %v2397_v35 = vpop.permute.xlu1 %2396  ;;  %v2458_v10 = vsel %vm1535_vm13, %v2444_v38, %v2457_v18  ;;  %v2659_v38 = vrot.slane %v4353_v42, %v4351_v60 }
0x1d54   :  { %v2452_v39 = vrot.slane %v2412_v12, %v4461_v56  ;;  %v2432_v51 = vrot.slane %v2397_v35, %v4461_v56  ;;  %v2459_v3 = vsel %vm1537_vm14, %v2448_v11, %v2458_v10 }
0x1d56   :  { %v2460_v47 = vsel %vm1539_vm15, %v2452_v39, %v2459_v3  ;;  %v2456_v50 = vsel %vm1539_vm15, %v2432_v51, %v2455_v52 }
0x1d57   :  { %v2466_v19 = vsel %vm1342_vm11, %v2460_v47, -inf  ;;  %v2463_v43 = vsel %vm1342_vm11, %v2456_v50, -inf }
0x1d58   :  { %2467 = vmax.xlane.f32.xlu0 %v2466_v19  ;;  %2464 = vmax.xlane.f32.xlu1 %v2463_v43 }
0x1d69   :  { %2661 = vbcast.lane.b32.xlu1 %v2659_v38, 256 }
0x1d6e   :  { %2654 = vbcast.lane.b32.xlu0 %v2652_v57, 256 }
0x1de5   :  { %v4700_v10 = vpop.xlane.xlu0 %2467  ;;  %v4702_v59 = vpop.xlane.xlu1 %2464 }
0x1de9   :  { %v2655_v11 = vpop.permute.xlu0 %2654  ;;  %v2662_v12 = vpop.permute.xlu1 %2661 }
0x1dea   :  { %v2665_v18 = vadd.f32 %v2655_v11, %v4702_v59  ;;  %v2666_v2 = vadd.f32 %v2662_v12, %v4700_v10 }
0x1dec   :  { %v4707_v44 = vadd.f32 %v2665_v18, %v4407_v14  ;;  %v4710_v35 = vadd.f32 %v2665_v18, %v4403_v34  ;;  %v4715_v39 = vadd.f32 %v2665_v18, %v4405_v13  ;;  %v4718_v51 = vadd.f32 %v2666_v2, %v4407_v14 }
0x1ded   :  { %v4723_v3 = vadd.f32 %v2665_v18, %v4429_v48  ;;  %v4726_v20 = vadd.f32 %v2666_v2, %v4405_v13  ;;  %v4731_v52 = vadd.f32 %v2666_v2, %v4429_v48  ;;  %v4734_v47 = vadd.f32 %v2666_v2, %v4403_v34 }
0x1dee   :  { %2691 = vperm.xlu0 %3841, %v4707_v44   ;;  %2688 = vperm.xlu1 %3842, %v4710_v35   ;;  %v4739_v50 = vadd.f32 %v2666_v2, %v4444_v41  ;;  %v4742_v19 = vadd.f32 %v2665_v18, %v4444_v41 }
0x1df2   :  { %2694 = vperm.xlu1 %3842, %v4715_v39   ;;  %2706 = vperm.xlu0 %3841, %v4718_v51  }
0x1df6   :  { %2697 = vperm.xlu1 %3842, %v4723_v3   ;;  %2709 = vperm.xlu0 %3841, %v4726_v20  }
0x1dfa   :  { %2712 = vperm.xlu0 %3841, %v4731_v52   ;;  %2703 = vperm.xlu1 %3842, %v4734_v47  }
0x1dfe   :  { %2715 = vperm.xlu0 %3841, %v4739_v50   ;;  %2700 = vperm.xlu1 %3842, %v4742_v19  }
0x1e6d   :  { %v2692_v43 = vpop.permute.xlu0 %2691  ;;  %v2689_v38 = vpop.permute.xlu1 %2688 }
0x1e6e   :  { %v2724_v16 = vrot.slane %v2692_v43, %v4461_v56  ;;  %v2720_v55 = vrot.slane %v2689_v38, %v4461_v56 }
0x1e70   :  { %v2757_v43 = vsel %vm1533_vm12, %v2724_v16, %v2720_v55  ;;  %v2956_v55 = vrot.slane %v4353_v42, %v4397_v30 }
0x1e71   :  { %v2707_v57 = vpop.permute.xlu0 %2706  ;;  %v2695_v11 = vpop.permute.xlu1 %2694 }
0x1e72   :  { %v2744_v9 = vrot.slane %v2707_v57, %v4461_v56  ;;  %v2728_v18 = vrot.slane %v2695_v11, %v4461_v56 }
0x1e74   :  { %v2758_v57 = vsel %vm1535_vm13, %v2728_v18, %v2757_v43 }
0x1e75   :  { %v2710_v12 = vpop.permute.xlu0 %2709  ;;  %v2698_v8 = vpop.permute.xlu1 %2697 }
0x1e76   :  { %v2748_v58 = vrot.slane %v2710_v12, %v4461_v56  ;;  %v2732_v33 = vrot.slane %v2698_v8, %v4461_v56 }
0x1e78   :  { %v2759_v8 = vsel %vm1537_vm14, %v2732_v33, %v2758_v57 }
0x1e79   :  { %v2713_v7 = vpop.permute.xlu0 %2712  ;;  %v2704_v2 = vpop.permute.xlu1 %2703 }
0x1e7a   :  { %v2740_v61 = vrot.slane %v2704_v2, %v4461_v56  ;;  %v2752_v37 = vrot.slane %v2713_v7, %v4461_v56 }
0x1e7c   :  { %v2761_v27 = vsel %vm1533_vm12, %v2744_v9, %v2740_v61 }
0x1e7d   :  { %v2716_v62 = vpop.permute.xlu0 %2715  ;;  %v2701_v38 = vpop.permute.xlu1 %2700  ;;  %v2762_v29 = vsel %vm1535_vm13, %v2748_v58, %v2761_v27 }
0x1e7e   :  { %v2756_v11 = vrot.slane %v2716_v62, %v4461_v56  ;;  %v2736_v2 = vrot.slane %v2701_v38, %v4461_v56  ;;  %v2763_v12 = vsel %vm1537_vm14, %v2752_v37, %v2762_v29 }
0x1e80   :  { %v2764_v7 = vsel %vm1539_vm15, %v2756_v11, %v2763_v12  ;;  %v2760_v61 = vsel %vm1539_vm15, %v2736_v2, %v2759_v8 }
0x1e81   :  { %v2770_v9 = vsel %vm1342_vm11, %v2764_v7, -inf  ;;  %v2767_v16 = vsel %vm1342_vm11, %v2760_v61, -inf }
0x1e82   :  { %2771 = vmax.xlane.f32.xlu0 %v2770_v9  ;;  %2768 = vmax.xlane.f32.xlu1 %v2767_v16 }
0x1e93   :  { %2965 = vbcast.lane.b32.xlu1 %v4367_v4, 256 }
0x1e98   :  { %2958 = vbcast.lane.b32.xlu0 %v2956_v55, 256 }
0x1f0f   :  { %v4769_v58 = vpop.xlane.xlu0 %2771  ;;  %v4771_v62 = vpop.xlane.xlu1 %2768 }
0x1f13   :  { %v2959_v27 = vpop.permute.xlu0 %2958  ;;  %v2966_v37 = vpop.permute.xlu1 %2965 }
0x1f14   :  { %v2969_v29 = vadd.f32 %v2959_v27, %v4771_v62  ;;  %v2970_v33 = vadd.f32 %v2966_v37, %v4769_v58 }
0x1f16   :  { %v4776_v18 = vadd.f32 %v2969_v29, %v4407_v14  ;;  %v4779_v43 = vadd.f32 %v2969_v29, %v4403_v34  ;;  %v4784_v42 = vadd.f32 %v2969_v29, %v4405_v13  ;;  %v4787_v4 = vadd.f32 %v2970_v33, %v4407_v14 }
0x1f17   :  { %v4792_v38 = vadd.f32 %v2969_v29, %v4429_v48  ;;  %v4795_v57 = vadd.f32 %v2970_v33, %v4405_v13  ;;  %v4800_v11 = vadd.f32 %v2970_v33, %v4429_v48  ;;  %v4803_v14 = vadd.f32 %v2970_v33, %v4403_v34 }
0x1f18   :  { %2995 = vperm.xlu0 %3841, %v4776_v18   ;;  %2992 = vperm.xlu1 %3842, %v4779_v43   ;;  %v4808_v2 = vadd.f32 %v2970_v33, %v4444_v41  ;;  %v4811_v13 = vadd.f32 %v2969_v29, %v4444_v41 }
0x1f1c   :  { %2998 = vperm.xlu1 %3842, %v4784_v42   ;;  %3010 = vperm.xlu0 %3841, %v4787_v4  }
0x1f20   :  { %3001 = vperm.xlu1 %3842, %v4792_v38   ;;  %3013 = vperm.xlu0 %3841, %v4795_v57  }
0x1f24   :  { %3016 = vperm.xlu0 %3841, %v4800_v11   ;;  %3007 = vperm.xlu1 %3842, %v4803_v14  }
0x1f28   :  { %3019 = vperm.xlu0 %3841, %v4808_v2   ;;  %3004 = vperm.xlu1 %3842, %v4811_v13  }
0x1f97   :  { %v2996_v12 = vpop.permute.xlu0 %2995  ;;  %v2993_v48 = vpop.permute.xlu1 %2992 }
0x1f98   :  { %v3028_v9 = vrot.slane %v2996_v12, %v4461_v56  ;;  %v3024_v16 = vrot.slane %v2993_v48, %v4461_v56 }
0x1f9a   :  { %v3061_v12 = vsel %vm1533_vm12, %v3028_v9, %v3024_v16 }
0x1f9b   :  { %v3011_v8 = vpop.permute.xlu0 %3010  ;;  %v2999_v7 = vpop.permute.xlu1 %2998 }
0x1f9c   :  { %v3048_v37 = vrot.slane %v3011_v8, %v4461_v56  ;;  %v3032_v41 = vrot.slane %v2999_v7, %v4461_v56 }
0x1f9e   :  { %v3062_v8 = vsel %vm1535_vm13, %v3032_v41, %v3061_v12 }
0x1f9f   :  { %v3014_v34 = vpop.permute.xlu0 %3013  ;;  %v3002_v61 = vpop.permute.xlu1 %3001 }
0x1fa0   :  { %v3052_v33 = vrot.slane %v3014_v34, %v4461_v56  ;;  %v3036_v46 = vrot.slane %v3002_v61, %v4461_v56 }
0x1fa2   :  { %v3063_v61 = vsel %vm1537_vm14, %v3036_v46, %v3062_v8 }
0x1fa3   :  { %v3017_v55 = vpop.permute.xlu0 %3016  ;;  %v3008_v27 = vpop.permute.xlu1 %3007 }
0x1fa4   :  { %v3044_v29 = vrot.slane %v3008_v27, %v4461_v56  ;;  %v3056_v45 = vrot.slane %v3017_v55, %v4461_v56 }
0x1fa6   :  { %v3065_v36 = vsel %vm1533_vm12, %v3048_v37, %v3044_v29 }
0x1fa7   :  { %v3020_v25 = vpop.permute.xlu0 %3019  ;;  %v3005_v48 = vpop.permute.xlu1 %3004  ;;  %v3066_v31 = vsel %vm1535_vm13, %v3052_v33, %v3065_v36 }
0x1fa8   :  { %v3060_v7 = vrot.slane %v3020_v25, %v4461_v56  ;;  %v3040_v27 = vrot.slane %v3005_v48, %v4461_v56  ;;  %v3067_v34 = vsel %vm1537_vm14, %v3056_v45, %v3066_v31  ;;  %v3582_v25 = vld [vmem:[%s5399_s9] ss:$0 sm:$0xff]  ;;  %s4038_s9 = smov [#allocation10]  }
0x1fa9   :  { %s3544_s21 = sshll.u32 %s4038_s9, 4  ;;  %s3545_s21 = int_to_ptr.vmem [resolvable:$true] %s3544_s21 }
0x1faa   :  { %v3068_v55 = vsel %vm1539_vm15, %v3060_v7, %v3067_v34  ;;  %v3064_v37 = vsel %vm1539_vm15, %v3040_v27, %v3063_v61  ;;  %s3995_s4 = scalar_lea.vmem %s3545_s21, 32  ;;  %p4000_p5 = scmp.lt.s32.totalorder %s3545_s21, %s3545_s21 }
0x1fab   :  { %v3074_v9 = vsel %vm1342_vm11, %v3068_v55, -inf  ;;  %v3071_v16 = vsel %vm1342_vm11, %v3064_v37, -inf  ;;  %p3996_p4 = scmp.ne.s32.totalorder %s3545_s21, %s3995_s4  ;;  %p4001_p6 = scmp.lt.s32.totalorder %s3995_s4, %s3995_s4 }
0x1fac   :  { %3075 = vmax.xlane.f32.xlu0 %v3074_v9  ;;  %3072 = vmax.xlane.f32.xlu1 %v3071_v16 }
0x1fad   :  { %p4002_p7 = por %p4001_p6, %p4000_p5 }
0x1faf   :  { %p4003_p8 = pnand %p4002_p7, %p3996_p4 }
0x1fbd   :  { %3269 = vbcast.lane.b32.xlu1 %v4372_v5, 256 }
0x1fc1   :  { %3282 = vbcast.lane.b32.xlu1 %v3582_v25, 256 }
0x1fc2   :  { %3262 = vbcast.lane.b32.xlu0 %v4377_v6, 256 }
0x2039   :  { %v3076_v45 = vpop.xlane.xlu0 %3075  ;;  %v3073_v31 = vpop.xlane.xlu1 %3072 }
0x203a   :  { %v3082_v7 = vrot.slane %v3073_v31, %v4320_v23  ;;  %v3086_v37 = vrot.slane %v3073_v31, %v4344_v24  ;;  %v3090_v16 = vrot.slane %v3073_v31, %v4341_v0 }
0x203c   :  { %vm3129_vm1 = vcmp.ge.f32.partialorder %v4779_v43, %v3082_v7  ;;  %vm3130_vm2 = vcmp.ge.f32.partialorder %v4776_v18, %v3086_v37  ;;  %vm3131_vm3 = vcmp.ge.f32.partialorder %v4784_v42, %v3090_v16  ;;  %v3102_v43 = vrot.slane %v3076_v45, %v4320_v23 }
0x203d   :  { %v3263_v36 = vpop.permute.xlu0 %3262  ;;  %v3270_v46 = vpop.permute.xlu1 %3269  ;;  %v3106_v18 = vrot.slane %v3076_v45, %v4344_v24  ;;  %v3114_v42 = vrot.slane %v3076_v45, %v4351_v60 }
0x203e   :  { %v3273_v41 = vadd.f32 %v3263_v36, %v3073_v31  ;;  %v3274_v29 = vadd.f32 %v3270_v46, %v3076_v45  ;;  %v3094_v36 = vrot.slane %v3073_v31, %v4351_v60  ;;  %vm3134_vm5 = vcmp.ge.f32.partialorder %v4803_v14, %v3102_v43 }
0x203f   :  { %vm3135_vm6 = vcmp.ge.f32.partialorder %v4787_v4, %v3106_v18  ;;  %vm3137_vm7 = vcmp.ge.f32.partialorder %v4800_v11, %v3114_v42  ;;  %v3098_v14 = vrot.slane %v3073_v31, %v4397_v30  ;;  %v3118_v4 = vrot.slane %v3076_v45, %v4397_v30 }
0x2040   :  { %vm3132_vm4 = vcmp.ge.f32.partialorder %v4792_v38, %v3094_v36 }
0x2041   :  { %v3283_v33 = vpop.permute.xlu1 %3282  ;;  %vm3133_vm9 = vcmp.ge.f32.partialorder %v4811_v13, %v3098_v14  ;;  %vm3138_vm10 = vcmp.ge.f32.partialorder %v4808_v2, %v3118_v4 }
0x2042   :  { %v3285_v12 = vadd.f32 %v3283_v33, %v3273_v41  ;;  %v4840_v48 = vadd.f32 %v3283_v33, %v3274_v29  ;;  %v3110_v33 = vrot.slane %v3076_v45, %v4341_v0 }
0x2044   :  { %3293 = vperm.xlu1 %3842, %v4840_v48   ;;  %3290 = vperm.xlu0 %3841, %v3285_v12   ;;  %vm3136_vm8 = vcmp.ge.f32.partialorder %v4795_v57, %v3110_v33 }
0x2048   :  { %1616 = vbcast.lane.b32.xlu1 %v4167_v15, 256 }
0x20c3   :  { %v3294_v5 = vpop.permute.xlu1 %3293  ;;  %v3291_v8 = vpop.permute.xlu0 %3290 }
0x20c4   :  { %v3302_v6 = vrot.slane %v3294_v5, %v4461_v56  ;;  %v3298_v27 = vrot.slane %v3291_v8, %v4461_v56 }
0x20c6   :  { %v3303_v34 = vsel %vm1533_vm12, %v3302_v6, %v3298_v27 }
0x20c7   :  { %v4848_v61 = vpop.permute.xlu1 %1616  ;;  %v3306_v55 = vsel %vm3305_vm0, %v3303_v34, -inf }
0x20c8   :  { %3307 = vmax.xlane.f32.xlu0 %v3306_v55  ;;  %v3139_v9 = vsel %vm3129_vm1, %v4848_v61, 5  ;;  %v3140_v25 = vsel %vm3130_vm2, %v4848_v61, 5  ;;  %v3141_v46 = vsel %vm3131_vm3, %v4848_v61, 5  ;;  %v3142_v41 = vsel %vm3132_vm4, %v4848_v61, 5 }
0x20c9   :  { %3150 = vperm.xlu1 %3842, %v3139_v9   ;;  %v3144_v29 = vsel %vm3134_vm5, %v4848_v61, 5  ;;  %v3145_v38 = vsel %vm3135_vm6, %v4848_v61, 5  ;;  %v3147_v5 = vsel %vm3137_vm7, %v4848_v61, 5  ;;  %v3146_v8 = vsel %vm3136_vm8, %v4848_v61, 5 }
0x20ca   :  { %v3143_v7 = vsel %vm3133_vm9, %v4848_v61, 5  ;;  %v3148_v11 = vsel %vm3138_vm10, %v4848_v61, 5 }
0x20cd   :  { %3153 = vperm.xlu1 %3842, %v3140_v25  }
0x20d1   :  { %3156 = vperm.xlu1 %3842, %v3141_v46  }
0x20d5   :  { %3159 = vperm.xlu1 %3842, %v3142_v41  }
0x20d9   :  { %3165 = vperm.xlu1 %3842, %v3144_v29  }
0x20dd   :  { %3168 = vperm.xlu1 %3842, %v3145_v38  }
0x20de   :  { %3174 = vperm.xlu0 %3841, %v3147_v5  }
0x20e1   :  { %3171 = vperm.xlu1 %3842, %v3146_v8  }
0x20e5   :  { %3162 = vperm.xlu1 %3842, %v3143_v7  }
0x20e9   :  { %3177 = vperm.xlu1 %3842, %v3148_v11  }
0x2148   :  { %v3151_v6 = vpop.permute.xlu1 %3150 }
0x2149   :  { %v3182_v11 = vrot.slane %v3151_v6, %v4461_v56  ;;  %v2782_v6 = vrot.slane %v4771_v62, %v4344_v24 }
0x214b   :  { %vm2826_vm3 = vcmp.ge.f32.partialorder %v4707_v44, %v2782_v6 }
0x214c   :  { %v3154_v27 = vpop.permute.xlu1 %3153 }
0x214d   :  { %v3186_v8 = vrot.slane %v3154_v27, %v4461_v56 }
0x2150   :  { %v3157_v57 = vpop.permute.xlu1 %3156 }
0x2151   :  { %v3190_v7 = vrot.slane %v3157_v57, %v4461_v56  ;;  %v2836_v57 = vsel %vm2826_vm3, %v4848_v61, 5 }
0x2154   :  { %v3160_v34 = vpop.permute.xlu1 %3159 }
0x2155   :  { %v3308_v31 = vpop.xlane.xlu0 %3307 }
0x2156   :  { %v3313_v55 = vrot.slane %v3308_v31, %v4320_v23  ;;  %v3317_v37 = vrot.slane %v3308_v31, %v4344_v24  ;;  %v3194_v31 = vrot.slane %v3160_v34, %v4461_v56  ;;  %v2778_v34 = vrot.slane %v4771_v62, %v4320_v23 }
0x2158   :  { %vm3320_vm1 = vcmp.ge.f32.partialorder %v3285_v12, %v3313_v55  ;;  %v3166_v13 = vpop.permute.xlu1 %3165  ;;  %vm3321_vm2 = vcmp.ge.f32.partialorder %v4840_v48, %v3317_v37  ;;  %v3219_v37 = vsel %vm1533_vm12, %v3186_v8, %v3182_v11  ;;  %vm2825_vm4 = vcmp.ge.f32.partialorder %v4710_v35, %v2778_v34 }
0x2159   :  { %v3322_v45 = vsel %vm3320_vm1, %v4848_v61, 5  ;;  %v3323_v9 = vsel %vm3321_vm2, %v4848_v61, 5  ;;  %v3202_v46 = vrot.slane %v3166_v13, %v4461_v56  ;;  %v3220_v13 = vsel %vm1535_vm13, %v3190_v7, %v3219_v37 }
0x215a   :  { %3325 = vperm.xlu1 %3842, %v3322_v45   ;;  %v3221_v45 = vsel %vm1537_vm14, %v3194_v31, %v3220_v13 }
0x215c   :  { %v3169_v2 = vpop.permute.xlu1 %3168 }
0x215d   :  { %v3206_v25 = vrot.slane %v3169_v2, %v4461_v56  ;;  %v3175_v41 = vpop.permute.xlu0 %3174 }
0x215e   :  { %3328 = vperm.xlu1 %3842, %v3323_v9   ;;  %v3214_v48 = vrot.slane %v3175_v41, %v4461_v56  ;;  %v2790_v41 = vrot.slane %v4771_v62, %v4351_v60 }
0x215f   :  { %v3223_v12 = vsel %vm1533_vm12, %v3206_v25, %v3202_v46  ;;  %v2798_v25 = vrot.slane %v4769_v58, %v4320_v23  ;;  %v2802_v46 = vrot.slane %v4769_v58, %v4344_v24 }
0x2160   :  { %v3172_v16 = vpop.permute.xlu1 %3171  ;;  %vm2828_vm8 = vcmp.ge.f32.partialorder %v4723_v3, %v2790_v41 }
0x2161   :  { %v3210_v36 = vrot.slane %v3172_v16, %v4461_v56  ;;  %vm2830_vm5 = vcmp.ge.f32.partialorder %v4734_v47, %v2798_v25  ;;  %vm2831_vm6 = vcmp.ge.f32.partialorder %v4718_v51, %v2802_v46  ;;  %v2838_v51 = vsel %vm2828_vm8, %v4848_v61, 5 }
0x2162   :  { %v2840_v44 = vsel %vm2830_vm5, %v4848_v61, 5  ;;  %v2841_v35 = vsel %vm2831_vm6, %v4848_v61, 5 }
0x2163   :  { %v3224_v18 = vsel %vm1535_vm13, %v3210_v36, %v3223_v12  ;;  %v2835_v36 = vsel %vm2825_vm4, %v4848_v61, 5  ;;  %v2794_v12 = vrot.slane %v4771_v62, %v4397_v30 }
0x2164   :  { %v3163_v43 = vpop.permute.xlu1 %3162  ;;  %v3225_v33 = vsel %vm1537_vm14, %v3214_v48, %v3224_v18 }
0x2165   :  { %v3198_v55 = vrot.slane %v3163_v43, %v4461_v56  ;;  %v2786_v43 = vrot.slane %v4771_v62, %v4341_v0  ;;  %vm2829_vm9 = vcmp.ge.f32.partialorder %v4742_v19, %v2794_v12  ;;  %v2806_v12 = vrot.slane %v4769_v58, %v4341_v0 }
0x2166   :  { %v2839_v18 = vsel %vm2829_vm9, %v4848_v61, 5 }
0x2167   :  { %v3222_v2 = vsel %vm1539_vm15, %v3198_v55, %v3221_v45  ;;  %vm2827_vm7 = vcmp.ge.f32.partialorder %v4715_v39, %v2786_v43  ;;  %vm2832_vm2 = vcmp.ge.f32.partialorder %v4726_v20, %v2806_v12 }
0x2168   :  { %v3178_v29 = vpop.permute.xlu1 %3177  ;;  %v3227_v27 = vsel %vm1342_vm11, %v3222_v2, 2147483647  ;;  %v2837_v47 = vsel %vm2827_vm7, %v4848_v61, 5 }
0x2169   :  { %v3218_v42 = vrot.slane %v3178_v29, %v4461_v56  ;;  %v3229_v9 = vshra.s32 %v3227_v27, 16  ;;  %v3228_v8 = vand.u32 65535, %v3227_v27 }
0x216b   :  { %v3226_v38 = vsel %vm1539_vm15, %v3218_v42, %v3225_v33  ;;  %v3231_v16 = vcvt.s32.f32 %v3229_v9  ;;  %v3230_v7 = vcvt.s32.f32 %v3228_v8 }
0x216c   :  { %v3242_v5 = vsel %vm1342_vm11, %v3226_v38, 2147483647 }
0x216d   :  { %v3244_v14 = vshra.s32 %v3242_v5, 16  ;;  %v3243_v3 = vand.u32 65535, %v3242_v5 }
0x216f   :  { %v3246_v4 = vcvt.s32.f32 %v3244_v14  ;;  %v3245_v62 = vcvt.s32.f32 %v3243_v3  ;;  %v2490_v3 = vrot.slane %v4702_v59, %v4397_v30 }
0x2171   :  { %3247 = vmin.xlane.f32.xlu0 %v3246_v4  ;;  %vm2525_vm8 = vcmp.ge.f32.partialorder %v4672_v32, %v2490_v3 }
0x2182   :  { %3232 = vmin.xlane.f32.xlu1 %v3231_v16 }
0x2187   :  { %2849 = vperm.xlu0 %3841, %v2836_v57  }
0x2193   :  { %2846 = vperm.xlu1 %3842, %v2835_v36  }
0x2197   :  { %2861 = vperm.xlu1 %3842, %v2840_v44  }
0x219b   :  { %2864 = vperm.xlu1 %3842, %v2841_v35  }
0x219f   :  { %2852 = vperm.xlu1 %3842, %v2837_v47  }
0x21a3   :  { %2855 = vperm.xlu1 %3842, %v2838_v51   ;;  %v2810_v51 = vrot.slane %v4769_v58, %v4351_v60 }
0x21a5   :  { %vm2833_vm3 = vcmp.ge.f32.partialorder %v4731_v52, %v2810_v51 }
0x21a7   :  { %2858 = vperm.xlu1 %3842, %v2839_v18   ;;  %v2842_v18 = vsel %vm2832_vm2, %v4848_v61, 5 }
0x21d9   :  { %v3326_v39 = vpop.permute.xlu1 %3325 }
0x21da   :  { %v3333_v29 = vrot.slane %v3326_v39, %v4461_v56  ;;  %v2814_v39 = vrot.slane %v4769_v58, %v4397_v30  ;;  %v2486_v58 = vrot.slane %v4702_v59, %v4351_v60 }
0x21dc   :  { %vm2834_vm4 = vcmp.ge.f32.partialorder %v4739_v50, %v2814_v39  ;;  %vm2524_vm7 = vcmp.ge.f32.partialorder %v4653_v21, %v2486_v58 }
0x21dd   :  { %v3329_v48 = vpop.permute.xlu1 %3328  ;;  %v2844_v20 = vsel %vm2834_vm4, %v4848_v61, 5 }
0x21de   :  { %v3337_v42 = vrot.slane %v3329_v48, %v4461_v56  ;;  %v2843_v48 = vsel %vm2833_vm3, %v4848_v61, 5 }
0x21e0   :  { %v3338_v33 = vsel %vm1533_vm12, %v3337_v42, %v3333_v29  ;;  %v2474_v29 = vrot.slane %v4702_v59, %v4320_v23  ;;  %v2482_v42 = vrot.slane %v4702_v59, %v4341_v0 }
0x21e2   :  { %vm2521_vm5 = vcmp.ge.f32.partialorder %v4640_v17, %v2474_v29  ;;  %vm2523_vm6 = vcmp.ge.f32.partialorder %v4645_v26, %v2482_v42  ;;  %v2534_v17 = vsel %vm2524_vm7, %v4848_v61, 5  ;;  %v4988_v26 = vsel %vm3305_vm0, %v3338_v33, 2147483647 }
0x21e3   :  { %v2531_v52 = vsel %vm2521_vm5, %v4848_v61, 5  ;;  %v2533_v50 = vsel %vm2523_vm6, %v4848_v61, 5  ;;  %v3341_v8 = vshra.s32 %v4988_v26, 16 }
0x21fe   :  { %v4936_v38 = vpop.xlane.xlu0 %3247 }
0x21ff   :  { %vm3249_vm10 = vcmp.eq.f32.partialorder %v3246_v4, %v4936_v38  ;;  %v3254_v12 = vcvt.f32.s32 %v4936_v38 }
0x2200   :  { %v3250_v14 = vsel %vm3249_vm10, %v3245_v62, inf  ;;  %v2535_v62 = vsel %vm2525_vm8, %v4848_v61, 5 }
0x2206   :  { %v2850_v2 = vpop.permute.xlu0 %2849 }
0x220f   :  { %v4939_v19 = vpop.xlane.xlu1 %3232 }
0x2210   :  { %vm3234_vm1 = vcmp.eq.f32.partialorder %v3231_v16, %v4939_v19  ;;  %v2882_v16 = vrot.slane %v2850_v2, %v4461_v56 }
0x2211   :  { %v4942_v11 = vsel %vm3234_vm1, %v3230_v7, inf  ;;  %v4991_v7 = vcvt.s32.f32 %v3341_v8 }
0x2213   :  { %v2847_v31 = vpop.permute.xlu1 %2846 }
0x2214   :  { %v2878_v27 = vrot.slane %v2847_v31, %v4461_v56 }
0x2216   :  { %v2915_v34 = vsel %vm1533_vm12, %v2882_v16, %v2878_v27 }
0x2217   :  { %v2862_v55 = vpop.permute.xlu1 %2861 }
0x2218   :  { %v2898_v13 = vrot.slane %v2862_v55, %v4461_v56 }
0x221b   :  { %v2865_v37 = vpop.permute.xlu1 %2864 }
0x221c   :  { %v2902_v5 = vrot.slane %v2865_v37, %v4461_v56 }
0x221e   :  { %v4947_v45 = vsel %vm1533_vm12, %v2902_v5, %v2898_v13 }
0x221f   :  { %v2853_v4 = vpop.permute.xlu1 %2852 }
0x2220   :  { %v2886_v6 = vrot.slane %v2853_v4, %v4461_v56 }
0x2222   :  { %v2916_v36 = vsel %vm1535_vm13, %v2886_v6, %v2915_v34  ;;  %v2478_v34 = vrot.slane %v4702_v59, %v4344_v24  ;;  %v2502_v59 = vrot.slane %v4700_v10, %v4341_v0 }
0x2223   :  { %v2856_v9 = vpop.permute.xlu1 %2855 }
0x2224   :  { %v2890_v57 = vrot.slane %v2856_v9, %v4461_v56  ;;  %vm2522_vm10 = vcmp.ge.f32.partialorder %v4637_v40, %v2478_v34  ;;  %vm2528_vm3 = vcmp.ge.f32.partialorder %v4656_v1, %v2502_v59 }
0x2226   :  { %v2917_v44 = vsel %vm1537_vm14, %v2890_v57, %v2916_v36  ;;  %v2498_v36 = vrot.slane %v4700_v10, %v4344_v24 }
0x2227   :  { %v2859_v25 = vpop.permute.xlu1 %2858 }
0x2228   :  { %v2894_v46 = vrot.slane %v2859_v25, %v4461_v56  ;;  %v2494_v25 = vrot.slane %v4700_v10, %v4320_v23  ;;  %vm2527_vm2 = vcmp.ge.f32.partialorder %v4648_v54, %v2498_v36 }
0x2229   :  { %v2537_v40 = vsel %vm2527_vm2, %v4848_v61, 5 }
0x222a   :  { %v2918_v43 = vsel %vm1539_vm15, %v2894_v46, %v2917_v44  ;;  %vm2526_vm1 = vcmp.ge.f32.partialorder %v4664_v28, %v2494_v25  ;;  %v2506_v44 = vrot.slane %v4700_v10, %v4351_v60  ;;  %v2538_v28 = vsel %vm2528_vm3, %v4848_v61, 5 }
0x222b   :  { %v2923_v35 = vsel %vm1342_vm11, %v2918_v43, 2147483647  ;;  %v2536_v46 = vsel %vm2526_vm1, %v4848_v61, 5 }
0x222c   :  { %v2925_v41 = vshra.s32 %v2923_v35, 16  ;;  %v2924_v21 = vand.u32 65535, %v2923_v35  ;;  %vm2529_vm4 = vcmp.ge.f32.partialorder %v4661_v53, %v2506_v44 }
0x222d   :  { %v2539_v35 = vsel %vm2529_vm4, %v4848_v61, 5 }
0x222e   :  { %v2927_v47 = vcvt.s32.f32 %v2925_v41  ;;  %v2926_v55 = vcvt.s32.f32 %v2924_v21 }
0x2230   :  { %2928 = vmin.xlane.f32.xlu0 %v2927_v47 }
0x2246   :  { %2867 = vperm.xlu0 %3841, %v2842_v18   ;;  %v3255_v18 = vshll.u32 %v3254_v12, 16 }
0x224a   :  { %2870 = vperm.xlu0 %3841, %v2843_v48   ;;  %v2510_v48 = vrot.slane %v4700_v10, %v4397_v30 }
0x224c   :  { %vm2530_vm5 = vcmp.ge.f32.partialorder %v4669_v22, %v2510_v48 }
0x224d   :  { %v2540_v53 = vsel %vm2530_vm5, %v4848_v61, 5 }
0x224e   :  { %2873 = vperm.xlu0 %3841, %v2844_v20  }
0x2252   :  { %2542 = vperm.xlu0 %3841, %v2531_v52  }
0x2256   :  { %2548 = vperm.xlu0 %3841, %v2533_v50  }
0x225a   :  { %2551 = vperm.xlu0 %3841, %v2534_v17  }
0x225e   :  { %2554 = vperm.xlu0 %3841, %v2535_v62  }
0x227d   :  { %3251 = vmin.xlane.f32.xlu0 %v3250_v14 }
0x2281   :  { %3344 = vmin.xlane.f32.xlu0 %v4991_v7 }
0x22bd   :  { %v4994_v31 = vpop.xlane.xlu0 %2928 }
0x22be   :  { %vm2930_vm9 = vcmp.eq.f32.partialorder %v2927_v47, %v4994_v31 }
0x22bf   :  { %v2931_v32 = vsel %vm2930_vm9, %v2926_v55, inf }
0x22c0   :  { %2932 = vmin.xlane.f32.xlu0 %v2931_v32 }
0x22c5   :  { %v2868_v37 = vpop.permute.xlu0 %2867 }
0x22c6   :  { %v2906_v33 = vrot.slane %v2868_v37, %v4461_v56  ;;  %v2169_v37 = vrot.slane %v4632_v49, %v4320_v23 }
0x22c8   :  { %v2920_v14 = vsel %vm1535_vm13, %v2906_v33, %v4947_v45  ;;  %v2532_v45 = vsel %vm2522_vm10, %v4848_v61, 5  ;;  %vm2216_vm7 = vcmp.ge.f32.partialorder %v4570_v63, %v2169_v37 }
0x22c9   :  { %v2871_v13 = vpop.permute.xlu0 %2870  ;;  %v2226_v33 = vsel %vm2216_vm7, %v4848_v61, 5 }
0x22ca   :  { %v2910_v5 = vrot.slane %v2871_v13, %v4461_v56  ;;  %v2177_v13 = vrot.slane %v4632_v49, %v4341_v0 }
0x22cc   :  { %v2921_v27 = vsel %vm1537_vm14, %v2910_v5, %v2920_v14  ;;  %v5484_v5 = vld [vmem:[#allocation44_spill] sm:$0xff] }
0x22cd   :  { %v2874_v4 = vpop.permute.xlu0 %2873  ;;  %vm2218_vm8 = vcmp.ge.f32.partialorder %v5484_v5, %v2177_v13 }
0x22ce   :  { %v2914_v2 = vrot.slane %v2874_v4, %v4461_v56  ;;  %v2181_v4 = vrot.slane %v4632_v49, %v4351_v60  ;;  %v2228_v14 = vsel %vm2218_vm8, %v4848_v61, 5 }
0x22d0   :  { %v2922_v9 = vsel %vm1539_vm15, %v2914_v2, %v2921_v27  ;;  %v5485_v2 = vld [vmem:[#allocation46_spill] sm:$0xff]  ;;  %v2185_v27 = vrot.slane %v4632_v49, %v4397_v30 }
0x22d1   :  { %v2938_v6 = vsel %vm1342_vm11, %v2922_v9, 2147483647  ;;  %v2543_v43 = vpop.permute.xlu0 %2542  ;;  %vm2219_vm9 = vcmp.ge.f32.partialorder %v5485_v2, %v2181_v4 }
0x22d2   :  { %v2940_v16 = vshra.s32 %v2938_v6, 16  ;;  %v2939_v29 = vand.u32 65535, %v2938_v6  ;;  %v2574_v58 = vrot.slane %v2543_v43, %v4461_v56  ;;  %v2229_v63 = vsel %vm2219_vm9, %v4848_v61, 5  ;;  %v5486_v6 = vld [vmem:[#allocation51_spill] sm:$0xff] }
0x22d3   :  { %vm2220_vm10 = vcmp.ge.f32.partialorder %v5486_v6, %v2185_v27 }
0x22d4   :  { %v2942_v57 = vcvt.s32.f32 %v2940_v16  ;;  %v2941_v42 = vcvt.s32.f32 %v2939_v29  ;;  %v2230_v16 = vsel %vm2220_vm10, %v4848_v61, 5 }
0x22d5   :  { %v2549_v54 = vpop.permute.xlu0 %2548 }
0x22d6   :  { %2943 = vmin.xlane.f32.xlu1 %v2942_v57  ;;  %v2582_v10 = vrot.slane %v2549_v54, %v4461_v56 }
0x22d9   :  { %v2552_v41 = vpop.permute.xlu0 %2551 }
0x22da   :  { %v2586_v22 = vrot.slane %v2552_v41, %v4461_v56 }
0x22dd   :  { %v2555_v47 = vpop.permute.xlu0 %2554 }
0x22de   :  { %v2590_v3 = vrot.slane %v2555_v47, %v4461_v56  ;;  %v3340_v47 = vand.u32 65535, %v4988_v26 }
0x22e7   :  { %2545 = vperm.xlu1 %3842, %v2532_v45   ;;  %v3239_v45 = vcvt.f32.s32 %v4939_v19 }
0x22e9   :  { %v3240_v59 = vshll.u32 %v3239_v45, 16 }
0x22eb   :  { %2557 = vperm.xlu1 %3842, %v2536_v46  }
0x22ef   :  { %2560 = vperm.xlu1 %3842, %v2537_v40  }
0x22f3   :  { %2563 = vperm.xlu1 %3842, %v2538_v28  }
0x22f7   :  { %2566 = vperm.xlu1 %3842, %v2539_v35  }
0x230a   :  { %v3252_v51 = vpop.xlane.xlu0 %3251 }
0x230b   :  { %v3253_v1 = vcvt.f32.s32 %v3252_v51 }
0x230d   :  { %v5026_v39 = vadd.s32 %v3255_v18, %v3253_v1 }
0x230e   :  { %v5077_v12 = vpop.xlane.xlu0 %3344 }
0x230f   :  { %v3362_v19 = vrot.slane %v5026_v39, %v4461_v56  ;;  %vm3346_vm1 = vcmp.eq.f32.partialorder %v4991_v7, %v5077_v12  ;;  %v3342_v39 = vcvt.s32.f32 %v3340_v47  ;;  %v5489_v7 = vld [vmem:[#allocation49_spill] sm:$0xff] }
0x231b   :  { %3236 = vmin.xlane.f32.xlu1 %v4942_v11 }
0x232c   :  { %2569 = vperm.xlu1 %3842, %v2540_v53  }
0x234d   :  { %v2933_v27 = vpop.xlane.xlu0 %2932 }
0x2363   :  { %v5033_v20 = vpop.xlane.xlu1 %2943 }
0x2364   :  { %vm2945_vm6 = vcmp.eq.f32.partialorder %v2942_v57, %v5033_v20  ;;  %v2950_v6 = vcvt.f32.s32 %v5033_v20 }
0x2365   :  { %v2946_v38 = vsel %vm2945_vm6, %v2941_v42, inf }
0x2366   :  { %2947 = vmin.xlane.f32.xlu1 %v2946_v38  ;;  %v3347_v38 = vsel %vm3346_vm1, %v3342_v39, inf }
0x2367   :  { %v2546_v52 = vpop.permute.xlu1 %2545 }
0x2368   :  { %v2578_v11 = vrot.slane %v2546_v52, %v4461_v56 }
0x236a   :  { %v2611_v50 = vsel %vm1533_vm12, %v2578_v11, %v2574_v58  ;;  %v2173_v58 = vrot.slane %v4632_v49, %v4344_v24  ;;  %v5487_v11 = vld [vmem:[#allocation43_spill] sm:$0xff] }
0x236b   :  { %v2612_v17 = vsel %vm1535_vm13, %v2582_v10, %v2611_v50  ;;  %v2558_v9 = vpop.permute.xlu1 %2557  ;;  %v5488_v10 = vld [vmem:[#allocation52_spill] sm:$0xff] }
0x236c   :  { %v2613_v62 = vsel %vm1537_vm14, %v2586_v22, %v2612_v17  ;;  %v2594_v28 = vrot.slane %v2558_v9, %v4461_v56  ;;  %vm2217_vm2 = vcmp.ge.f32.partialorder %v5487_v11, %v2173_v58  ;;  %v2189_v22 = vrot.slane %v5488_v10, %v4320_v23 }
0x236d   :  { %v2614_v8 = vsel %vm1539_vm15, %v2590_v3, %v2613_v62  ;;  %v2227_v50 = vsel %vm2217_vm2, %v4848_v61, 5  ;;  %v2193_v3 = vrot.slane %v5488_v10, %v4344_v24  ;;  %v5490_v62 = vld [vmem:[#allocation45_spill] sm:$0xff]  ;;  %v2197_v49 = vrot.slane %v5488_v10, %v4341_v0 }
0x236e   :  { %v5046_v21 = vsel %vm1342_vm11, %v2614_v8, 2147483647  ;;  %vm2221_vm3 = vcmp.ge.f32.partialorder %v5489_v7, %v2189_v22  ;;  %v2201_v37 = vrot.slane %v5488_v10, %v4351_v60  ;;  %v2205_v5 = vrot.slane %v5488_v10, %v4397_v30 }
0x236f   :  { %v2621_v55 = vshra.s32 %v5046_v21, 16  ;;  %v2561_v57 = vpop.permute.xlu1 %2560  ;;  %v2231_v17 = vsel %vm2221_vm3, %v4848_v61, 5  ;;  %vm2222_vm4 = vcmp.ge.f32.partialorder %v5490_v62, %v2193_v3  ;;  %v2934_v9 = vcvt.f32.s32 %v2933_v27 }
0x2370   :  { %v2598_v36 = vrot.slane %v2561_v57, %v4461_v56  ;;  %v2232_v8 = vsel %vm2222_vm4, %v4848_v61, 5 }
0x2371   :  { %v5049_v32 = vcvt.s32.f32 %v2621_v55  ;;  %v5491_v55 = vld [vmem:[#allocation47_spill] sm:$0xff] }
0x2372   :  { %v2615_v54 = vsel %vm1533_vm12, %v2598_v36, %v2594_v28  ;;  %vm2223_vm5 = vcmp.ge.f32.partialorder %v5491_v55, %v2197_v49 }
0x2373   :  { %2624 = vmin.xlane.f32.xlu0 %v5049_v32  ;;  %v2564_v34 = vpop.permute.xlu1 %2563  ;;  %v2233_v13 = vsel %vm2223_vm5, %v4848_v61, 5 }
0x2374   :  { %v2602_v40 = vrot.slane %v2564_v34, %v4461_v56 }
0x2376   :  { %v2616_v51 = vsel %vm1535_vm13, %v2602_v40, %v2615_v54 }
0x2377   :  { %v2567_v25 = vpop.permute.xlu1 %2566 }
0x2378   :  { %v2606_v43 = vrot.slane %v2567_v25, %v4461_v56  ;;  %v2951_v25 = vshll.u32 %v2950_v6, 16  ;;  %v5495_v6 = vld [vmem:[#allocation32_spill] sm:$0xff] }
0x237a   :  { %v2617_v48 = vsel %vm1537_vm14, %v2606_v43, %v2616_v51 }
0x2389   :  { %2237 = vperm.xlu0 %3841, %v2226_v33   ;;  %v5492_v33 = vld [vmem:[#allocation48_spill] sm:$0xff] }
0x238a   :  { %vm2224_vm6 = vcmp.ge.f32.partialorder %v5492_v33, %v2201_v37 }
0x238b   :  { %v2234_v4 = vsel %vm2224_vm6, %v4848_v61, 5 }
0x238d   :  { %2243 = vperm.xlu0 %3841, %v2228_v14   ;;  %v5493_v14 = vld [vmem:[#allocation50_spill] sm:$0xff] }
0x238e   :  { %vm2225_vm7 = vcmp.ge.f32.partialorder %v5493_v14, %v2205_v5 }
0x238f   :  { %v2235_v2 = vsel %vm2225_vm7, %v4848_v61, 5 }
0x2391   :  { %2246 = vperm.xlu0 %3841, %v2229_v63   ;;  %v2935_v63 = vcvt.f32.s32 %v4994_v31 }
0x2395   :  { %2249 = vperm.xlu0 %3841, %v2230_v16   ;;  %v2936_v16 = vshll.u32 %v2935_v63, 16  ;;  %v5494_v63 = vld [vmem:[#allocation42_spill] sm:$0xff] }
0x2397   :  { %v2937_v34 = vadd.s32 %v2936_v16, %v2934_v9  ;;  %v1865_v9 = vrot.slane %v5494_v63, %v4320_v23  ;;  %v1873_v16 = vrot.slane %v5494_v63, %v4341_v0 }
0x2399   :  { %vm1912_vm10 = vcmp.ge.f32.partialorder %v5495_v6, %v1865_v9 }
0x23a8   :  { %v3237_v46 = vpop.xlane.xlu1 %3236 }
0x23a9   :  { %v3238_v44 = vcvt.f32.s32 %v3237_v46  ;;  %v3382_v46 = vrot.slane %v2937_v34, %v4461_v56  ;;  %v5496_v34 = vld [vmem:[#allocation34_spill] sm:$0xff] }
0x23aa   :  { %vm1914_vm1 = vcmp.ge.f32.partialorder %v5496_v34, %v1873_v16 }
0x23ab   :  { %v3241_v35 = vadd.s32 %v3240_v59, %v3238_v44  ;;  %v2620_v44 = vand.u32 65535, %v5046_v21 }
0x23ac   :  { %v2570_v41 = vpop.permute.xlu1 %2569 }
0x23ad   :  { %v3358_v18 = vrot.slane %v3241_v35, %v4461_v56  ;;  %v2610_v1 = vrot.slane %v2570_v41, %v4461_v56  ;;  %v2622_v31 = vcvt.s32.f32 %v2620_v44  ;;  %v5498_v44 = vld [vmem:[#allocation41_spill] sm:$0xff] }
0x23af   :  { %v2618_v53 = vsel %vm1539_vm15, %v2610_v1, %v2617_v48  ;;  %v5085_v29 = vsel %vm1533_vm12, %v3362_v19, %v3358_v18 }
0x23b0   :  { %v2634_v26 = vsel %vm1342_vm11, %v2618_v53, 2147483647 }
0x23b1   :  { %v2636_v42 = vshra.s32 %v2634_v26, 16  ;;  %v2635_v54 = vand.u32 65535, %v2634_v26 }
0x23b3   :  { %v2638_v52 = vcvt.s32.f32 %v2636_v42  ;;  %v2637_v19 = vcvt.s32.f32 %v2635_v54  ;;  %v5499_v54 = vld [vmem:[#allocation38_spill] sm:$0xff] }
0x23b4   :  { %3348 = vmin.xlane.f32.xlu0 %v3347_v38 }
0x23b5   :  { %2639 = vmin.xlane.f32.xlu1 %v2638_v52 }
0x23c6   :  { %2240 = vperm.xlu1 %3842, %v2227_v50  }
0x23ca   :  { %2252 = vperm.xlu1 %3842, %v2231_v17  }
0x23ce   :  { %2255 = vperm.xlu1 %3842, %v2232_v8  }
0x23d2   :  { %2258 = vperm.xlu1 %3842, %v2233_v13  }
0x23d6   :  { %2261 = vperm.xlu1 %3842, %v2234_v4  }
0x23da   :  { %2264 = vperm.xlu1 %3842, %v2235_v2  }
0x23f3   :  { %v2948_v57 = vpop.xlane.xlu1 %2947 }
0x23f4   :  { %v2949_v45 = vcvt.f32.s32 %v2948_v57  ;;  %v1922_v57 = vsel %vm1912_vm10, %v4848_v61, 5 }
0x23f6   :  { %v2952_v36 = vadd.s32 %v2951_v25, %v2949_v45  ;;  %v1924_v25 = vsel %vm1914_vm1, %v4848_v61, 5  ;;  %v1869_v45 = vrot.slane %v5494_v63, %v4344_v24 }
0x23f8   :  { %v3386_v59 = vrot.slane %v2952_v36, %v4461_v56 }
0x23fa   :  { %v5119_v40 = vsel %vm1533_vm12, %v3386_v59, %v3382_v46  ;;  %v3351_v46 = vcvt.f32.s32 %v5077_v12  ;;  %v5497_v59 = vld [vmem:[#allocation31_spill] sm:$0xff]  ;;  %v5500_v12 = vld [vmem:[#allocation33_spill] sm:$0xff] }
0x23fb   :  { %vm1913_vm2 = vcmp.ge.f32.partialorder %v5497_v59, %v1869_v45 }
0x2400   :  { %v5122_v28 = vpop.xlane.xlu0 %2624 }
0x2401   :  { %vm2626_vm8 = vcmp.eq.f32.partialorder %v5049_v32, %v5122_v28 }
0x2402   :  { %v2627_v20 = vsel %vm2626_vm8, %v2622_v31, inf  ;;  %v1885_v31 = vrot.slane %v5498_v44, %v4320_v23 }
0x2403   :  { %2628 = vmin.xlane.f32.xlu0 %v2627_v20  ;;  %v1923_v20 = vsel %vm1913_vm2, %v4848_v61, 5 }
0x2404   :  { %vm1917_vm3 = vcmp.ge.f32.partialorder %v5499_v54, %v1885_v31 }
0x2408   :  { %v2238_v43 = vpop.permute.xlu0 %2237 }
0x2409   :  { %v2269_v18 = vrot.slane %v2238_v43, %v4461_v56 }
0x240c   :  { %v2244_v35 = vpop.permute.xlu0 %2243 }
0x240d   :  { %v2277_v32 = vrot.slane %v2244_v35, %v4461_v56  ;;  %v3352_v35 = vshll.u32 %v3351_v46, 16 }
0x2410   :  { %v2247_v41 = vpop.permute.xlu0 %2246 }
0x2411   :  { %v2281_v53 = vrot.slane %v2247_v41, %v4461_v56  ;;  %v1889_v41 = vrot.slane %v5498_v44, %v4344_v24 }
0x2413   :  { %vm1918_vm4 = vcmp.ge.f32.partialorder %v5500_v12, %v1889_v41 }
0x2414   :  { %v2250_v1 = vpop.permute.xlu0 %2249 }
0x2415   :  { %v2285_v39 = vrot.slane %v2250_v1, %v4461_v56  ;;  %v5501_v1 = vld [vmem:[#allocation35_spill] sm:$0xff] }
0x2441   :  { %v3349_v36 = vpop.xlane.xlu0 %3348 }
0x2442   :  { %v5126_v47 = vpop.xlane.xlu1 %2639  ;;  %v3350_v43 = vcvt.f32.s32 %v3349_v36 }
0x2443   :  { %vm2641_vm9 = vcmp.eq.f32.partialorder %v2638_v52, %v5126_v47 }
0x2444   :  { %v2642_v51 = vsel %vm2641_vm9, %v2637_v19, inf  ;;  %v1927_v19 = vsel %vm1917_vm3, %v4848_v61, 5 }
0x2445   :  { %2643 = vmin.xlane.f32.xlu1 %v2642_v51  ;;  %v5180_v51 = vadd.s32 %v3352_v35, %v3350_v43 }
0x2446   :  { %v2241_v21 = vpop.permute.xlu1 %2240 }
0x2447   :  { %v2273_v48 = vrot.slane %v2241_v21, %v4461_v56  ;;  %v1893_v21 = vrot.slane %v5498_v44, %v4341_v0  ;;  %vm3354_vm5 = vcmp.eq.s32.totalorder %v4167_v15, %v5180_v51 }
0x2449   :  { %v2306_v26 = vsel %vm1533_vm12, %v2273_v48, %v2269_v18  ;;  %v1928_v18 = vsel %vm1918_vm4, %v4848_v61, 5  ;;  %vm1919_vm6 = vcmp.ge.f32.partialorder %v5501_v1, %v1893_v21  ;;  %v1897_v48 = vrot.slane %v5498_v44, %v4351_v60 }
0x244a   :  { %v2307_v42 = vsel %vm1535_vm13, %v2277_v32, %v2306_v26  ;;  %v2253_v38 = vpop.permute.xlu1 %2252  ;;  %v3364_v32 = vsel %vm3354_vm5, %v5085_v29, 0  ;;  %v5502_v26 = vld [vmem:[#allocation37_spill] sm:$0xff] }
0x244b   :  { %v2308_v52 = vsel %vm1537_vm14, %v2281_v53, %v2307_v42  ;;  %v2289_v49 = vrot.slane %v2253_v38, %v4461_v56  ;;  %v1929_v53 = vsel %vm1919_vm6, %v4848_v61, 5  ;;  %vm1920_vm7 = vcmp.ge.f32.partialorder %v5502_v26, %v1897_v48 }
0x244c   :  { %v2309_v58 = vsel %vm1539_vm15, %v2285_v39, %v2308_v52  ;;  %v1901_v39 = vrot.slane %v5498_v44, %v4397_v30  ;;  %v3365_v42 = vsel %vm3305_vm0, %v3364_v32, 0  ;;  %v1930_v38 = vsel %vm1920_vm7, %v4848_v61, 5 }
0x244d   :  { %v5139_v11 = vsel %vm1342_vm11, %v2309_v58, 2147483647  ;;  %v3367_v52 = vshrl.u32 %v3365_v42, 16  ;;  %v5503_v58 = vld [vmem:[#allocation39_spill] sm:$0xff] }
0x244e   :  { %v2256_v10 = vpop.permute.xlu1 %2255  ;;  %v2316_v22 = vshra.s32 %v5139_v11, 16  ;;  %vm1921_vm8 = vcmp.ge.f32.partialorder %v5503_v58, %v1901_v39  ;;  %v2315_v34 = vand.u32 65535, %v5139_v11 }
0x244f   :  { %v2293_v3 = vrot.slane %v2256_v10, %v4461_v56  ;;  %v1931_v10 = vsel %vm1921_vm8, %v4848_v61, 5  ;;  %v3369_v29 = vcvt.s32.f32 %v3367_v52 }
0x2450   :  { %v5142_v50 = vcvt.s32.f32 %v2316_v22  ;;  %v3366_v22 = vand.u32 65535, %v3365_v42 }
0x2451   :  { %v2310_v55 = vsel %vm1533_vm12, %v2293_v3, %v2289_v49  ;;  %v1877_v3 = vrot.slane %v5494_v63, %v4351_v60 }
0x2452   :  { %v2259_v7 = vpop.permute.xlu1 %2258  ;;  %2319 = vmin.xlane.f32.xlu0 %v5142_v50 }
0x2453   :  { %v2297_v62 = vrot.slane %v2259_v7, %v4461_v56  ;;  %v3368_v7 = vcvt.s32.f32 %v3366_v22 }
0x2455   :  { %v2311_v13 = vsel %vm1535_vm13, %v2297_v62, %v2310_v55  ;;  %v2646_v55 = vcvt.f32.s32 %v5126_v47 }
0x2456   :  { %v2262_v17 = vpop.permute.xlu1 %2261 }
0x2457   :  { %v2301_v8 = vrot.slane %v2262_v17, %v4461_v56  ;;  %v5504_v17 = vld [vmem:[#allocation36_spill] sm:$0xff] }
0x2458   :  { %vm1915_vm9 = vcmp.ge.f32.partialorder %v5504_v17, %v1877_v3 }
0x2459   :  { %v2312_v5 = vsel %vm1537_vm14, %v2301_v8, %v2311_v13  ;;  %v1925_v62 = vsel %vm1915_vm9, %v4848_v61, 5  ;;  %v2631_v8 = vcvt.f32.s32 %v5122_v28  ;;  %v2317_v28 = vcvt.s32.f32 %v2315_v34 }
0x245a   :  { %v2265_v37 = vpop.permute.xlu1 %2264 }
0x245b   :  { %v2305_v33 = vrot.slane %v2265_v37, %v4461_v56  ;;  %v2632_v13 = vshll.u32 %v2631_v8, 16  ;;  %v5506_v8 = vld [vmem:[#allocation18_spill] sm:$0xff] }
0x245d   :  { %v2313_v4 = vsel %vm1539_vm15, %v2305_v33, %v2312_v5  ;;  %v2647_v5 = vshll.u32 %v2646_v55, 16  ;;  %v5507_v55 = vld [vmem:[#allocation30_spill] sm:$0xff] }
0x245e   :  { %v5155_v14 = vsel %vm1342_vm11, %v2313_v4, 2147483647 }
0x245f   :  { %v2331_v2 = vshra.s32 %v5155_v14, 16  ;;  %v2330_v45 = vand.u32 65535, %v5155_v14 }
0x2461   :  { %v5158_v27 = vcvt.s32.f32 %v2331_v2  ;;  %v2332_v59 = vcvt.s32.f32 %v2330_v45 }
0x2463   :  { %2334 = vmin.xlane.f32.xlu1 %v5158_v27 }
0x2468   :  { %1933 = vperm.xlu0 %3841, %v1922_v57  }
0x246c   :  { %1939 = vperm.xlu0 %3841, %v1924_v25  }
0x2474   :  { %1936 = vperm.xlu1 %3842, %v1923_v20  }
0x2478   :  { %1948 = vperm.xlu1 %3842, %v1927_v19  }
0x247c   :  { %1951 = vperm.xlu1 %3842, %v1928_v18  }
0x2480   :  { %1954 = vperm.xlu1 %3842, %v1929_v53  }
0x2484   :  { %1957 = vperm.xlu1 %3842, %v1930_v38  }
0x2488   :  { %1960 = vperm.xlu1 %3842, %v1931_v10  }
0x248b   :  { %3372 = vadd.xlane.f32.xlu0 %v3369_v29 }
0x248f   :  { %3370 = vadd.xlane.f32.xlu0 %v3368_v7  ;;  %v5505_v7 = vld [vmem:[#allocation29_spill] sm:$0xff] }
0x2490   :  { %v2629_v49 = vpop.xlane.xlu0 %2628  ;;  %v1562_v3 = vrot.slane %v5505_v7, %v4344_v24 }
0x2491   :  { %v2630_v37 = vcvt.f32.s32 %v2629_v49 }
0x2492   :  { %vm1606_vm2 = vcmp.ge.f32.partialorder %v5506_v8, %v1562_v3 }
0x2493   :  { %v2633_v4 = vadd.s32 %v2632_v13, %v2630_v37  ;;  %v1578_v37 = vrot.slane %v5507_v55, %v4320_v23  ;;  %v1619_v13 = vsel %vm1606_vm2, %v4848_v61, 5 }
0x2495   :  { %v3406_v6 = vrot.slane %v2633_v4, %v4461_v56  ;;  %v5508_v4 = vld [vmem:[#allocation25_spill] sm:$0xff] }
0x2496   :  { %vm1610_vm4 = vcmp.ge.f32.partialorder %v5508_v4, %v1578_v37 }
0x24a5   :  { %1942 = vperm.xlu0 %3841, %v1925_v62  }
0x24d2   :  { %v2644_v33 = vpop.xlane.xlu1 %2643 }
0x24d3   :  { %v2645_v2 = vcvt.f32.s32 %v2644_v33 }
0x24d5   :  { %v2648_v9 = vadd.s32 %v2647_v5, %v2645_v2 }
0x24d7   :  { %v3410_v16 = vrot.slane %v2648_v9, %v4461_v56  ;;  %v1582_v9 = vrot.slane %v5507_v55, %v4344_v24  ;;  %v1590_v24 = vrot.slane %v5507_v55, %v4351_v60 }
0x24d9   :  { %v5209_v57 = vsel %vm1533_vm12, %v3410_v16, %v3406_v6  ;;  %v1623_v6 = vsel %vm1610_vm4, %v4848_v61, 5 }
0x24df   :  { %v5212_v25 = vpop.xlane.xlu0 %2319 }
0x24e0   :  { %vm2321_vm10 = vcmp.eq.f32.partialorder %v5142_v50, %v5212_v25 }
0x24e1   :  { %v5216_v47 = vsel %vm2321_vm10, %v2317_v28, inf  ;;  %v5509_v28 = vld [vmem:[#allocation22_spill] sm:$0xff] }
0x24e2   :  { %vm1611_vm5 = vcmp.ge.f32.partialorder %v5509_v28, %v1582_v9 }
0x24e3   :  { %v1624_v45 = vsel %vm1611_vm5, %v4848_v61, 5 }
0x24e7   :  { %v1934_v36 = vpop.permute.xlu0 %1933 }
0x24e8   :  { %v1965_v20 = vrot.slane %v1934_v36, %v4461_v56 }
0x24eb   :  { %v1940_v31 = vpop.permute.xlu0 %1939 }
0x24ec   :  { %v1973_v50 = vrot.slane %v1940_v31, %v4461_v56  ;;  %v5511_v31 = vld [vmem:[#allocation26_spill] sm:$0xff] }
0x24ed   :  { %vm1613_vm7 = vcmp.ge.f32.partialorder %v5511_v31, %v1590_v24 }
0x24f0   :  { %v5219_v46 = vpop.xlane.xlu1 %2334 }
0x24f1   :  { %vm2336_vm1 = vcmp.eq.f32.partialorder %v5158_v27, %v5219_v46 }
0x24f2   :  { %v2337_v44 = vsel %vm2336_vm1, %v2332_v59, inf  ;;  %v5510_v59 = vld [vmem:[#allocation24_spill] sm:$0xff] }
0x24f3   :  { %2338 = vmin.xlane.f32.xlu1 %v2337_v44 }
0x24f4   :  { %v1937_v11 = vpop.permute.xlu1 %1936 }
0x24f5   :  { %v1969_v43 = vrot.slane %v1937_v11, %v4461_v56  ;;  %v1594_v11 = vrot.slane %v5507_v55, %v4397_v30 }
0x24f7   :  { %v2002_v35 = vsel %vm1533_vm12, %v1969_v43, %v1965_v20  ;;  %v1626_v20 = vsel %vm1613_vm7, %v4848_v61, 5  ;;  %v5512_v43 = vld [vmem:[#allocation28_spill] sm:$0xff] }
0x24f8   :  { %v1949_v14 = vpop.permute.xlu1 %1948  ;;  %v5228_v54 = vsel %vm1535_vm13, %v1973_v50, %v2002_v35  ;;  %vm1614_vm8 = vcmp.ge.f32.partialorder %v5512_v43, %v1594_v11  ;;  %v1881_v35 = vrot.slane %v5494_v63, %v4397_v30  ;;  %v5516_v11 = vld [vmem:[#allocation23_spill] sm:$0xff] }
0x24f9   :  { %v1985_v18 = vrot.slane %v1949_v14, %v4461_v56  ;;  %v1627_v50 = vsel %vm1614_vm8, %v4848_v61, 5  ;;  %v5513_v14 = vld [vmem:[#allocation40_spill] sm:$0xff] }
0x24fa   :  { %vm1916_vm9 = vcmp.ge.f32.partialorder %v5513_v14, %v1881_v35 }
0x24fc   :  { %v1952_v41 = vpop.permute.xlu1 %1951 }
0x24fd   :  { %v1989_v27 = vrot.slane %v1952_v41, %v4461_v56  ;;  %v1926_v41 = vsel %vm1916_vm9, %v4848_v61, 5 }
0x24ff   :  { %v2006_v48 = vsel %vm1533_vm12, %v1989_v27, %v1985_v18 }
0x2500   :  { %v1955_v19 = vpop.permute.xlu1 %1954 }
0x2501   :  { %v1993_v21 = vrot.slane %v1955_v19, %v4461_v56  ;;  %v2341_v19 = vcvt.f32.s32 %v5219_v46 }
0x2503   :  { %v2007_v53 = vsel %vm1535_vm13, %v1993_v21, %v2006_v48 }
0x2504   :  { %v1958_v12 = vpop.permute.xlu1 %1957 }
0x2505   :  { %v1997_v1 = vrot.slane %v1958_v12, %v4461_v56  ;;  %v2342_v12 = vshll.u32 %v2341_v19, 16 }
0x2507   :  { %v2008_v39 = vsel %vm1537_vm14, %v1997_v1, %v2007_v53 }
0x2508   :  { %v1961_v32 = vpop.permute.xlu1 %1960 }
0x2509   :  { %v2001_v26 = vrot.slane %v1961_v32, %v4461_v56 }
0x250b   :  { %v2009_v42 = vsel %vm1539_vm15, %v2001_v26, %v2008_v39 }
0x250c   :  { %v2025_v38 = vsel %vm1342_vm11, %v2009_v42, 2147483647 }
0x250d   :  { %v2027_v52 = vshra.s32 %v2025_v38, 16  ;;  %v2026_v1 = vand.u32 65535, %v2025_v38 }
0x250f   :  { %v2029_v58 = vcvt.s32.f32 %v2027_v52  ;;  %v2028_v32 = vcvt.s32.f32 %v2026_v1 }
0x2511   :  { %2030 = vmin.xlane.f32.xlu1 %v2029_v58 }
0x2518   :  { %v3373_v10 = vpop.xlane.xlu0 %3372 }
0x2519   :  { %v3375_v29 = vcvt.f32.s32 %v3373_v10 }
0x251b   :  { %v3376_v17 = vshll.u32 %v3375_v29, 16 }
0x251c   :  { %v3371_v22 = vpop.xlane.xlu0 %3370 }
0x251d   :  { %v3374_v62 = vcvt.f32.s32 %v3371_v22 }
0x251f   :  { %v5242_v49 = vadd.s32 %v3376_v17, %v3374_v62 }
0x2521   :  { %vm3378_vm3 = vcmp.eq.s32.totalorder %v4167_v15, %v5242_v49 }
0x2522   :  { %v3388_v33 = vsel %vm3378_vm3, %v5119_v40, 0  ;;  %1632 = vperm.xlu1 %3842, %v1619_v13   ;;  %v1586_v40 = vrot.slane %v5507_v55, %v4341_v0 }
0x2523   :  { %v3389_v5 = vsel %vm3305_vm0, %v3388_v33, 0 }
0x2524   :  { %v3391_v2 = vshrl.u32 %v3389_v5, 16  ;;  %v3390_v34 = vand.u32 65535, %v3389_v5  ;;  %vm1612_vm6 = vcmp.ge.f32.partialorder %v5510_v59, %v1586_v40  ;;  %v1943_v52 = vpop.permute.xlu0 %1942  ;;  %v1566_v59 = vrot.slane %v5505_v7, %v4341_v0 }
0x2525   :  { %v1625_v44 = vsel %vm1612_vm6, %v4848_v61, 5  ;;  %v1977_v4 = vrot.slane %v1943_v52, %v4461_v56 }
0x2526   :  { %1644 = vperm.xlu1 %3842, %v1623_v6   ;;  %v3393_v16 = vcvt.s32.f32 %v3391_v2  ;;  %v3392_v36 = vcvt.s32.f32 %v3390_v34 }
0x2527   :  { %v2004_v6 = vsel %vm1537_vm14, %v1977_v4, %v5228_v54  ;;  %v1570_v54 = vrot.slane %v5505_v7, %v4351_v60 }
0x2528   :  { %3396 = vadd.xlane.f32.xlu0 %v3393_v16 }
0x2529   :  { %vm1608_vm3 = vcmp.ge.f32.partialorder %v5516_v11, %v1570_v54 }
0x252a   :  { %1647 = vperm.xlu1 %3842, %v1624_v45   ;;  %v1558_v45 = vrot.slane %v5505_v7, %v4320_v23  ;;  %v1621_v23 = vsel %vm1608_vm3, %v4848_v61, 5  ;;  %vm3522_vm3 = vcmask 7168  }
0x252c   :  { %3394 = vadd.xlane.f32.xlu0 %v3392_v36  ;;  %v5514_v36 = vld [vmem:[#allocation19_spill] sm:$0xff] }
0x252d   :  { %vm1605_vm1 = vcmp.ge.f32.partialorder %v5514_v36, %v1558_v45 }
0x252e   :  { %1650 = vperm.xlu1 %3842, %v1625_v44   ;;  %v1618_v24 = vsel %vm1605_vm1, %v4848_v61, 5  ;;  %v5515_v44 = vld [vmem:[#allocation21_spill] sm:$0xff] }
0x252f   :  { %vm1607_vm2 = vcmp.ge.f32.partialorder %v5515_v44, %v1566_v59 }
0x2530   :  { %v1620_v31 = vsel %vm1607_vm2, %v4848_v61, 5 }
0x2532   :  { %1653 = vperm.xlu1 %3842, %v1626_v20   ;;  %v2326_v20 = vcvt.f32.s32 %v5212_v25 }
0x2536   :  { %1656 = vperm.xlu1 %3842, %v1627_v50   ;;  %v2327_v50 = vshll.u32 %v2326_v20, 16 }
0x2542   :  { %1945 = vperm.xlu0 %3841, %v1926_v41  }
0x2561   :  { %2323 = vmin.xlane.f32.xlu0 %v5216_v47 }
0x2580   :  { %v2339_v27 = vpop.xlane.xlu1 %2338 }
0x2581   :  { %v2340_v21 = vcvt.f32.s32 %v2339_v27 }
0x2583   :  { %v5276_v18 = vadd.s32 %v2342_v12, %v2340_v21 }
0x2585   :  { %v3434_v60 = vrot.slane %v5276_v18, %v4461_v56  ;;  %v1574_v18 = vrot.slane %v5505_v7, %v4397_v30 }
0x259e   :  { %v5278_v48 = vpop.xlane.xlu1 %2030 }
0x259f   :  { %vm2032_vm10 = vcmp.eq.f32.partialorder %v2029_v58, %v5278_v48 }
0x25a0   :  { %v2033_v63 = vsel %vm2032_vm10, %v2028_v32, inf }
0x25a1   :  { %2034 = vmin.xlane.f32.xlu1 %v2033_v63 }
0x25a2   :  { %v5281_v53 = vpop.permute.xlu1 %1632 }
0x25a6   :  { %v1645_v26 = vpop.permute.xlu1 %1644 }
0x25a7   :  { %v1681_v38 = vrot.slane %v1645_v26, %v4461_v56 }
0x25aa   :  { %v1648_v39 = vpop.permute.xlu1 %1647 }
0x25ab   :  { %v1685_v46 = vrot.slane %v1648_v39, %v4461_v56 }
0x25ad   :  { %v1702_v22 = vsel %vm1533_vm12, %v1685_v46, %v1681_v38 }
0x25ae   :  { %v1651_v47 = vpop.permute.xlu1 %1650 }
0x25af   :  { %v1689_v10 = vrot.slane %v1651_v47, %v4461_v56  ;;  %v5517_v47 = vld [vmem:[#allocation27_spill] sm:$0xff] }
0x25b0   :  { %vm1609_vm5 = vcmp.ge.f32.partialorder %v5517_v47, %v1574_v18  ;;  %v5521_v18 = vld [vmem:[#allocation16_spill] sm:$0xff] }
0x25b1   :  { %v1703_v3 = vsel %vm1535_vm13, %v1689_v10, %v1702_v22  ;;  %v1622_v46 = vsel %vm1609_vm5, %v4848_v61, 5  ;;  %vm3528_vm5 = vcmask 31744  }
0x25b2   :  { %v1654_v42 = vpop.permute.xlu1 %1653 }
0x25b3   :  { %v1693_v29 = vrot.slane %v1654_v42, %v4461_v56  ;;  %v2037_v42 = vcvt.f32.s32 %v5278_v48 }
0x25b5   :  { %v3397_v17 = vpop.xlane.xlu0 %3396  ;;  %v1704_v8 = vsel %vm1537_vm14, %v1693_v29, %v1703_v3 }
0x25b6   :  { %v1657_v58 = vpop.permute.xlu1 %1656  ;;  %v3399_v43 = vcvt.f32.s32 %v3397_v17 }
0x25b7   :  { %v1697_v62 = vrot.slane %v1657_v58, %v4461_v56 }
0x25b8   :  { %v3400_v19 = vshll.u32 %v3399_v43, 16 }
0x25b9   :  { %v1705_v55 = vsel %vm1539_vm15, %v1697_v62, %v1704_v8  ;;  %v3395_v33 = vpop.xlane.xlu0 %3394 }
0x25ba   :  { %v1721_v37 = vsel %vm1342_vm11, %v1705_v55, 2147483647  ;;  %v3398_v14 = vcvt.f32.s32 %v3395_v33 }
0x25bb   :  { %v1723_v13 = vshra.s32 %v1721_v37, 16  ;;  %v1722_v29 = vand.u32 65535, %v1721_v37 }
0x25bc   :  { %v5315_v12 = vadd.s32 %v3400_v19, %v3398_v14 }
0x25bd   :  { %v1725_v5 = vcvt.s32.f32 %v1723_v13  ;;  %v1724_v58 = vcvt.s32.f32 %v1722_v29 }
0x25be   :  { %vm3402_vm4 = vcmp.eq.s32.totalorder %v4167_v15, %v5315_v12 }
0x25bf   :  { %1726 = vmin.xlane.f32.xlu1 %v1725_v5  ;;  %v3412_v25 = vsel %vm3402_vm4, %v5209_v57, 0  ;;  %v2038_v57 = vshll.u32 %v2037_v42, 16  ;;  %vm3524_vm4 = vcmask 15360  }
0x25c0   :  { %v3413_v1 = vsel %vm3305_vm0, %v3412_v25, 0 }
0x25c1   :  { %v1946_v2 = vpop.permute.xlu0 %1945  ;;  %v3415_v32 = vshrl.u32 %v3413_v1, 16  ;;  %v3414_v26 = vand.u32 65535, %v3413_v1 }
0x25c2   :  { %v1981_v9 = vrot.slane %v1946_v2, %v4461_v56 }
0x25c3   :  { %v3417_v63 = vcvt.s32.f32 %v3415_v32  ;;  %v3416_v39 = vcvt.s32.f32 %v3414_v26  ;;  %v5519_v26 = vld [vmem:[#allocation15_spill] sm:$0xff] }
0x25c4   :  { %v2005_v16 = vsel %vm1539_vm15, %v1981_v9, %v2004_v6  ;;  %v1665_v6 = vrot.slane %v5281_v53, %v4461_v56 }
0x25c5   :  { %v2010_v34 = vsel %vm1342_vm11, %v2005_v16, 2147483647 }
0x25c6   :  { %v2012_v28 = vshra.s32 %v2010_v34, 16  ;;  %v2011_v30 = vand.u32 65535, %v2010_v34 }
0x25c8   :  { %v2014_v40 = vcvt.s32.f32 %v2012_v28  ;;  %v2013_v17 = vcvt.s32.f32 %v2011_v30 }
0x25ca   :  { %2015 = vmin.xlane.f32.xlu0 %v2014_v40 }
0x25e0   :  { %1629 = vperm.xlu0 %3841, %v1618_v24  }
0x25e4   :  { %1635 = vperm.xlu0 %3841, %v1620_v31  }
0x25e8   :  { %1638 = vperm.xlu0 %3841, %v1621_v23  }
0x25ee   :  { %v2324_v0 = vpop.xlane.xlu0 %2323 }
0x25ef   :  { %v2325_v35 = vcvt.f32.s32 %v2324_v0 }
0x25f1   :  { %v2328_v41 = vadd.s32 %v2327_v50, %v2325_v35 }
0x25f3   :  { %v3430_v27 = vrot.slane %v2328_v41, %v4461_v56 }
0x25f5   :  { %v3435_v21 = vsel %vm1533_vm12, %v3434_v60, %v3430_v27 }
0x2607   :  { %3420 = vadd.xlane.f32.xlu0 %v3417_v63  ;;  %v5518_v63 = vld [vmem:[#allocation17_spill] sm:$0xff] }
0x260b   :  { %3418 = vadd.xlane.f32.xlu0 %v3416_v39  ;;  %v5520_v39 = vld [vmem:[#allocation20_spill] sm:$0xff] }
0x2621   :  { %1641 = vperm.xlu0 %3841, %v1622_v46  }
0x262e   :  { %v2035_v52 = vpop.xlane.xlu1 %2034 }
0x262f   :  { %v2036_v10 = vcvt.f32.s32 %v2035_v52 }
0x2631   :  { %v2039_v38 = vadd.s32 %v2038_v57, %v2036_v10 }
0x2633   :  { %v3458_v19 = vrot.slane %v2039_v38, %v4461_v56 }
0x264c   :  { %v5327_v22 = vpop.xlane.xlu1 %1726 }
0x264d   :  { %vm1728_vm6 = vcmp.eq.f32.partialorder %v1725_v5, %v5327_v22 }
0x264e   :  { %v1729_v3 = vsel %vm1728_vm6, %v1724_v58, inf  ;;  %vm3530_vm6 = vcmask 39936  }
0x264f   :  { %1730 = vmin.xlane.f32.xlu1 %v1729_v3 }
0x2657   :  { %v2016_v7 = vpop.xlane.xlu0 %2015 }
0x2658   :  { %vm2017_vm7 = vcmp.eq.f32.partialorder %v2014_v40, %v2016_v7  ;;  %v2022_v0 = vcvt.f32.s32 %v2016_v7 }
0x2659   :  { %v2018_v61 = vsel %vm2017_vm7, %v2013_v17, inf  ;;  %vm3534_vm7 = vcmask 56320  }
0x265a   :  { %2019 = vmin.xlane.f32.xlu0 %v2018_v61  ;;  %v2023_v35 = vshll.u32 %v2022_v0, 16 }
0x265f   :  { %v1630_v62 = vpop.permute.xlu0 %1629 }
0x2660   :  { %v1661_v5 = vrot.slane %v1630_v62, %v4461_v56 }
0x2662   :  { %v1698_v40 = vsel %vm1533_vm12, %v1665_v6, %v1661_v5  ;;  %v1733_v5 = vcvt.f32.s32 %v5327_v22 }
0x2663   :  { %v1636_v48 = vpop.permute.xlu0 %1635 }
0x2664   :  { %v1669_v9 = vrot.slane %v1636_v48, %v4461_v56 }
0x2666   :  { %v1699_v59 = vsel %vm1535_vm13, %v1669_v9, %v1698_v40  ;;  %vm1349_vm13 = vcmp.ge.f32.partialorder %v5519_v26, %v5518_v63 }
0x2667   :  { %v1639_v8 = vpop.permute.xlu0 %1638  ;;  %v1351_v52 = vsel %vm1349_vm13, %v4167_v15, 5 }
0x2668   :  { %v1673_v16 = vrot.slane %v1639_v8, %v4461_v56  ;;  %v1353_v7 = vsel %vm1342_vm11, %v1351_v52, 2147483647 }
0x266a   :  { %v1700_v44 = vsel %vm1537_vm14, %v1673_v16, %v1699_v59  ;;  %vm1350_vm14 = vcmp.ge.f32.partialorder %v5521_v18, %v5520_v39 }
0x266b   :  { %v1352_v57 = vsel %vm1350_vm14, %v4167_v15, 5 }
0x266c   :  { %v1368_v30 = vsel %vm1342_vm11, %v1352_v57, 2147483647 }
0x266d   :  { %v1370_v8 = vshra.s32 %v1368_v30, 16  ;;  %v1369_v59 = vand.u32 65535, %v1368_v30 }
0x2694   :  { %v3421_v55 = vpop.xlane.xlu0 %3420 }
0x2695   :  { %v3423_v13 = vcvt.f32.s32 %v3421_v55  ;;  %v1355_v55 = vshra.s32 %v1353_v7, 16 }
0x2697   :  { %v3424_v37 = vshll.u32 %v3423_v13, 16  ;;  %v1372_v13 = vcvt.s32.f32 %v1370_v8 }
0x2698   :  { %v3419_v33 = vpop.xlane.xlu0 %3418 }
0x2699   :  { %v3422_v4 = vcvt.f32.s32 %v3419_v33  ;;  %v1357_v33 = vcvt.s32.f32 %v1355_v55 }
0x269b   :  { %v5330_v2 = vadd.s32 %v3424_v37, %v3422_v4 }
0x269d   :  { %vm3426_vm8 = vcmp.eq.s32.totalorder %v4167_v15, %v5330_v2 }
0x269e   :  { %v3436_v34 = vsel %vm3426_vm8, %v3435_v21, 0  ;;  %vm3536_vm8 = vcmask 58368  }
0x269f   :  { %v3437_v28 = vsel %vm3305_vm0, %v3436_v34, 0 }
0x26a0   :  { %v1642_v45 = vpop.permute.xlu0 %1641  ;;  %v3439_v36 = vshrl.u32 %v3437_v28, 16  ;;  %v3438_v31 = vand.u32 65535, %v3437_v28  ;;  %v1734_v28 = vshll.u32 %v1733_v5, 16 }
0x26a1   :  { %v1677_v24 = vrot.slane %v1642_v45, %v4461_v56 }
0x26a2   :  { %v3441_v54 = vcvt.s32.f32 %v3439_v36  ;;  %v3440_v23 = vcvt.s32.f32 %v3438_v31 }
0x26a3   :  { %v1701_v11 = vsel %vm1539_vm15, %v1677_v24, %v1700_v44  ;;  %v1354_v24 = vand.u32 65535, %v1353_v7 }
0x26a4   :  { %3444 = vadd.xlane.f32.xlu0 %v3441_v54  ;;  %v1706_v53 = vsel %vm1342_vm11, %v1701_v11, 2147483647 }
0x26a5   :  { %v1708_v20 = vshra.s32 %v1706_v53, 16  ;;  %v1707_v32 = vand.u32 65535, %v1706_v53  ;;  %v1356_v22 = vcvt.s32.f32 %v1354_v24 }
0x26a7   :  { %v1710_v43 = vcvt.s32.f32 %v1708_v20  ;;  %v1709_v38 = vcvt.s32.f32 %v1707_v32 }
0x26a8   :  { %3442 = vadd.xlane.f32.xlu0 %v3440_v23 }
0x26ac   :  { %1711 = vmin.xlane.f32.xlu0 %v1710_v43 }
0x26dc   :  { %v1731_v4 = vpop.xlane.xlu1 %1730 }
0x26dd   :  { %v1732_v16 = vcvt.f32.s32 %v1731_v4 }
0x26df   :  { %v1735_v44 = vadd.s32 %v1734_v28, %v1732_v16 }
0x26e1   :  { %v3482_v0 = vrot.slane %v1735_v44, %v4461_v56 }
0x26e7   :  { %v2020_v50 = vpop.xlane.xlu0 %2019 }
0x26e8   :  { %v2021_v14 = vcvt.f32.s32 %v2020_v50 }
0x26ea   :  { %v2024_v41 = vadd.s32 %v2023_v35, %v2021_v14 }
0x26ec   :  { %v3454_v60 = vrot.slane %v2024_v41, %v4461_v56 }
0x26ee   :  { %v3459_v27 = vsel %vm1533_vm12, %v3458_v19, %v3454_v60 }
0x2731   :  { %v3445_v21 = vpop.xlane.xlu0 %3444 }
0x2732   :  { %v3447_v25 = vcvt.f32.s32 %v3445_v21 }
0x2734   :  { %v3448_v47 = vshll.u32 %v3447_v25, 16 }
0x2735   :  { %v3443_v1 = vpop.xlane.xlu0 %3442 }
0x2736   :  { %v3446_v46 = vcvt.f32.s32 %v3443_v1 }
0x2738   :  { %v5353_v42 = vadd.s32 %v3448_v47, %v3446_v46 }
0x2739   :  { %v1712_v10 = vpop.xlane.xlu0 %1711 }
0x273a   :  { %vm3450_vm15 = vcmp.eq.s32.totalorder %v4167_v15, %v5353_v42  ;;  %vm1713_vm9 = vcmp.eq.f32.partialorder %v1710_v43, %v1712_v10  ;;  %v1718_v37 = vcvt.f32.s32 %v1712_v10  ;;  %v1371_v43 = vcvt.s32.f32 %v1369_v59 }
0x273b   :  { %v3460_v29 = vsel %vm3450_vm15, %v3459_v27, 0  ;;  %v1714_v58 = vsel %vm1713_vm9, %v1709_v38, inf }
0x273c   :  { %1715 = vmin.xlane.f32.xlu0 %v1714_v58  ;;  %v3461_v3 = vsel %vm3305_vm0, %v3460_v29, 0  ;;  %v1719_v34 = vshll.u32 %v1718_v37, 16 }
0x273d   :  { %v3462_v17 = vand.u32 65535, %v3461_v3  ;;  %v3463_v61 = vshrl.u32 %v3461_v3, 16 }
0x273f   :  { %v3464_v62 = vcvt.s32.f32 %v3462_v17  ;;  %v3465_v48 = vcvt.s32.f32 %v3463_v61 }
0x2741   :  { %3466 = vadd.xlane.f32.xlu1 %v3464_v62  ;;  %3468 = vadd.xlane.f32.xlu0 %v3465_v48 }
0x2745   :  { %1373 = vmin.xlane.f32.xlu1 %v1372_v13  ;;  %1358 = vmin.xlane.f32.xlu0 %v1357_v33 }
0x27c9   :  { %v1716_v9 = vpop.xlane.xlu0 %1715 }
0x27ca   :  { %v1717_v6 = vcvt.f32.s32 %v1716_v9 }
0x27cc   :  { %v1720_v40 = vadd.s32 %v1719_v34, %v1717_v6 }
0x27ce   :  { %v3467_v45 = vpop.xlane.xlu1 %3466  ;;  %v3469_v36 = vpop.xlane.xlu0 %3468  ;;  %v3478_v31 = vrot.slane %v1720_v40, %v4461_v56 }
0x27cf   :  { %v3471_v54 = vcvt.f32.s32 %v3469_v36  ;;  %v3470_v11 = vcvt.f32.s32 %v3467_v45 }
0x27d0   :  { %v3483_v41 = vsel %vm1533_vm12, %v3482_v0, %v3478_v31 }
0x27d1   :  { %v3472_v53 = vshll.u32 %v3471_v54, 16 }
0x27d2   :  { %v1374_v23 = vpop.xlane.xlu1 %1373  ;;  %v1359_v20 = vpop.xlane.xlu0 %1358 }
0x27d3   :  { %v3473_v50 = vadd.s32 %v3472_v53, %v3470_v11  ;;  %vm1375_vm11 = vcmp.eq.f32.partialorder %v1372_v13, %v1374_v23  ;;  %vm1360_vm10 = vcmp.eq.f32.partialorder %v1357_v33, %v1359_v20  ;;  %v1380_v32 = vcvt.f32.s32 %v1374_v23 }
0x27d4   :  { %v1376_v35 = vsel %vm1375_vm11, %v1371_v43, inf  ;;  %v1361_v14 = vsel %vm1360_vm10, %v1356_v22, inf  ;;  %v1365_v63 = vcvt.f32.s32 %v1359_v20 }
0x27d5   :  { %vm3474_vm1 = vcmp.eq.s32.totalorder %v4167_v15, %v3473_v50  ;;  %1377 = vmin.xlane.f32.xlu1 %v1376_v35  ;;  %1362 = vmin.xlane.f32.xlu0 %v1361_v14  ;;  %v1381_v46 = vshll.u32 %v1380_v32, 16 }
0x27d6   :  { %v3484_v19 = vsel %vm3474_vm1, %v3483_v41, 0  ;;  %v1366_v52 = vshll.u32 %v1365_v63, 16 }
0x27d7   :  { %v3485_v60 = vsel %vm3305_vm0, %v3484_v19, 0 }
0x27d8   :  { %v3486_v27 = vand.u32 65535, %v3485_v60  ;;  %v3487_v21 = vshrl.u32 %v3485_v60, 16 }
0x27da   :  { %v3488_v25 = vcvt.s32.f32 %v3486_v27  ;;  %v3489_v1 = vcvt.s32.f32 %v3487_v21 }
0x27dc   :  { %3490 = vadd.xlane.f32.xlu1 %v3488_v25  ;;  %3492 = vadd.xlane.f32.xlu0 %v3489_v1 }
0x2862   :  { %v1378_v26 = vpop.xlane.xlu1 %1377  ;;  %v1363_v39 = vpop.xlane.xlu0 %1362 }
0x2863   :  { %v1379_v18 = vcvt.f32.s32 %v1378_v26  ;;  %v1364_v47 = vcvt.f32.s32 %v1363_v39 }
0x2865   :  { %v1382_v57 = vadd.s32 %v1381_v46, %v1379_v18  ;;  %v1367_v10 = vadd.s32 %v1366_v52, %v1364_v47 }
0x2867   :  { %v3506_v3 = vrot.slane %v1382_v57, %v4461_v56  ;;  %v3502_v30 = vrot.slane %v1367_v10, %v4461_v56 }
0x2869   :  { %v3491_v38 = vpop.xlane.xlu1 %3490  ;;  %v3493_v29 = vpop.xlane.xlu0 %3492  ;;  %v3507_v62 = vsel %vm1533_vm12, %v3506_v3, %v3502_v30  ;;  %vm3526_vm12 = vcmask 23552  }
0x286a   :  { %v3495_v58 = vcvt.f32.s32 %v3493_v29  ;;  %v3494_v7 = vcvt.f32.s32 %v3491_v38 }
0x286c   :  { %v3496_v17 = vshll.u32 %v3495_v58, 16 }
0x286e   :  { %v3497_v61 = vadd.s32 %v3496_v17, %v3494_v7 }
0x2870   :  { %vm3498_vm2 = vcmp.eq.s32.totalorder %v4167_v15, %v3497_v61 }
0x2871   :  { %v3508_v48 = vsel %vm3498_vm2, %v3507_v62, 0 }
0x2872   :  { %v3509_v8 = vsel %vm3305_vm0, %v3508_v48, 0  ;;  %vm3532_vm0 = vcmask 48128  }
0x2873   :  { %v3511_v55 = vshrl.u32 %v3509_v8, 16  ;;  %v3510_v13 = vand.u32 65535, %v3509_v8 }
0x2875   :  { %v3513_v33 = vcvt.s32.f32 %v3511_v55  ;;  %v3512_v37 = vcvt.s32.f32 %v3510_v13 }
0x2877   :  { %3516 = vadd.xlane.f32.xlu0 %v3513_v33  ;;  %3514 = vadd.xlane.f32.xlu1 %v3512_v37 }
0x2904   :  { %v3517_v4 = vpop.xlane.xlu0 %3516  ;;  %v3515_v5 = vpop.xlane.xlu1 %3514 }
0x2905   :  { %v3519_v9 = vcvt.f32.s32 %v3517_v4  ;;  %v3518_v6 = vcvt.f32.s32 %v3515_v5 }
0x2907   :  { %v3520_v56 = vshll.u32 %v3519_v9, 16 }
0x2909   :  { %v3521_v16 = vadd.s32 %v3520_v56, %v3518_v6 }
0x290b   :  { %v3523_v34 = vsel %vm3522_vm3, %v3521_v16, %v3497_v61 }
0x290c   :  { %v3525_v15 = vsel %vm3524_vm4, %v3523_v34, %v3473_v50 }
0x290d   :  { %v3527_v28 = vsel %vm3526_vm12, %v3525_v15, %v5353_v42 }
0x290e   :  { %v3529_v40 = vsel %vm3528_vm5, %v3527_v28, %v5330_v2 }
0x290f   :  { %v3531_v45 = vsel %vm3530_vm6, %v3529_v40, %v5315_v12 }
0x2910   :  { %v3533_v36 = vsel %vm3532_vm0, %v3531_v45, %v5242_v49 }
0x2911   :  { %v3535_v59 = vsel %vm3534_vm7, %v3533_v36, %v5180_v51 }
0x2912   :  { %3537 = vst.msk [vmem:[#allocation10] sm:$0x3] %vm3536_vm8, %v3535_v59 }
0x2913   :  { %4006 = shalt.err (!%p4003_p8)
}
0x2914   :  { %s4007_s24 = scalar_lea.hbm %s5400_s10, 32 }
0x2915   :  { %p4008_p9 = scmp.ne.s32.totalorder %s5400_s10, %s4007_s24  ;;  %p4011_p10 = scmp.lt.u32.totalorder %s4007_s24, %s5400_s10 }
0x2917   :  { %p4013_p11 = pnand %p4011_p10, %p4008_p9 }
0x2919   :  { %4016 = shalt.err (!%p4013_p11)
}
0x291a   :  { %3547 = dma.vmem_to_hbm [thread:$0]  %s3545_s21, 32, %s5400_s10, [#allocation4]  }
0x291b   :  { %4023 = dma.done.wait [#allocation4], 32  }
0x291c   :  { %4024 = vsyncadd [#allocation4], 4294967264 }
0x291d   :  { %3551 = vsyncpa [#allocation3], 1 }
0x291e   :  { %3552 = vsyncpa [#allocation6], 1 }
0x291f   :  { %3553 = vsyncpa [#allocation9], 1 }
0x2920   :  { %3554 = vsyncpa [#allocation4], 1 }

</bundles_post_ra>
